<compile_context>
chip_gen: v7x
topology: tpu7x:2x2x1
jax: 0.10.0
libtpu: 0.0.40
codegen_flags: <defaults>
</compile_context>

<pallas_src>
import functools

import jax
import jax.numpy as jnp
from jax.experimental import pallas as pl
from jax.experimental.pallas import tpu as pltpu


_MAX_ROW_TILE = 512   # rows per tile (measured ~85% of HBM roofline at 512)
_NEG = -1e9           # finite "masked" logit (avoids -inf -> NaN in logsumexp)
_VMEM_LIMIT = 48 * 1024 * 1024   # explicit scoped-VMEM budget; < v7x 64 MiB physical


def _pad128(n):
    return ((n + 127) // 128) * 128


def _row_tile(n):
    if n <= _MAX_ROW_TILE:
        return n, 1
    return _MAX_ROW_TILE, pl.cdiv(n, _MAX_ROW_TILE)


def _dep_row_tile(n, n_classes, h):
    # keep the two (tm, C*H) f32 in-kernel intermediates within ~8 MiB
    budget = 8 * 1024 * 1024
    tm = budget // (2 * n_classes * h * 4)
    tm = max(8, min(_MAX_ROW_TILE, (tm // 8) * 8))
    if n <= tm:
        return n, 1
    return tm, pl.cdiv(n, tm)


def _cparams():
    return pltpu.CompilerParams(
        dimension_semantics=("parallel",),
        vmem_limit_bytes=_VMEM_LIMIT)


# ----------------------------------------------------------------------------
# In-kernel helpers
# ----------------------------------------------------------------------------
def _ce_partial(scores, tgt, extra_valid, n_cols):
    """Partial CE sums for one tile. scores (R, Vp) f32, tgt (R, 1) i32.

    extra_valid: extra row-validity mask ((R,1) array or scalar bool).
    n_cols: number of REAL logit columns (padded cols >= n_cols are excluded)."""
    r, vp = scores.shape
    col = jax.lax.broadcasted_iota(jnp.int32, (r, vp), 1)
    sc = jnp.where(col < n_cols, scores, _NEG) if n_cols < vp else scores
    valid = (tgt != -100) & extra_valid
    mx = jnp.max(sc, axis=1, keepdims=True)
    logz = jnp.log(jnp.sum(jnp.exp(sc - mx), axis=1, keepdims=True)) + mx
    tgt_logit = jnp.sum(jnp.where(col == tgt, sc, 0.0), axis=1, keepdims=True)
    per_row = logz - tgt_logit
    num = jnp.sum(jnp.where(valid, per_row, 0.0), axis=0, keepdims=True)   # (1,1)
    den = jnp.sum(valid.astype(jnp.float32), axis=0, keepdims=True)        # (1,1)
    return num, den


def _pack_ce(vals):
    """Pack up to 8 (1,1) f32 scalars into a (1,8) lane row (no concat)."""
    lane = jax.lax.broadcasted_iota(jnp.int32, (1, 8), 1)
    out = jnp.zeros((1, 8), jnp.float32)
    for idx, v in enumerate(vals):
        out = out + jnp.where(lane == idx, v, 0.0)
    return out


# ----------------------------------------------------------------------------
# Kernels
# ----------------------------------------------------------------------------
def _tag_down_kernel(x_ref, e_ref, tgt_ref, w_ref, we_ref, b_ref,
                     down_ref, ce_ref, *, segs, vdims, n_rows):
    """Fused upos/xpos/feats CE + down projection over one row tile of word_reprs."""
    pu, px, pf, _pd = segs
    vu, vx, vf = vdims
    x = x_ref[...]                                                     # bf16 (TM, D)
    scores = jnp.dot(x, w_ref[...], preferred_element_type=jnp.float32) + b_ref[...]
    xe = jnp.dot(e_ref[...], we_ref[...], preferred_element_type=jnp.float32)
    o0, o1, o2 = pu, pu + px, pu + px + pf
    tm = x.shape[0]
    row = jax.lax.broadcasted_iota(jnp.int32, (tm, 1), 0) + pl.program_id(0) * tm
    row_ok = row < n_rows                                              # partial-tile rows
    tgt = tgt_ref[...]
    nu, du = _ce_partial(scores[:, :o0], tgt[:, 0:1], row_ok, vu)
    nx, dx = _ce_partial(scores[:, o0:o1] + xe, tgt[:, 1:2], row_ok, vx)
    nf, df = _ce_partial(scores[:, o1:o2], tgt[:, 2:3], row_ok, vf)
    down_ref[...] = scores[:, o2:].astype(down_ref.dtype)
    ce_ref[0] = _pack_ce([nu, du, nx, dx, nf, df])


def _linear_kernel(x_ref, w_ref, b_ref, o_ref, *, relu):
    y = jnp.dot(x_ref[...], w_ref[...], preferred_element_type=jnp.float32) + b_ref[...]
    if relu:
        y = jnp.maximum(y, 0.0)
    o_ref[...] = y.astype(o_ref.dtype)


def _hproj_kernel(x_ref, w_ref, b_ref, o1_ref, o2_ref, o3_ref, o4_ref, *, pd):
    """Fused ReLU projections: [unlabeled.wl | unlabeled.wr | deprel.wl | deprel.wr]."""
    y = jnp.dot(x_ref[...], w_ref[...], preferred_element_type=jnp.float32) + b_ref[...]
    y = jnp.maximum(y, 0.0)
    o1_ref[...] = y[:, 0 * pd:1 * pd].astype(o1_ref.dtype)
    o2_ref[...] = y[:, 1 * pd:2 * pd].astype(o2_ref.dtype)
    o3_ref[...] = y[:, 2 * pd:3 * pd].astype(o3_ref.dtype)
    o4_ref[...] = y[:, 3 * pd:4 * pd].astype(o4_ref.dtype)


def _unlabeled_ce_kernel(h1_ref, h2_ref, mask_ref, tgt_ref, whh_ref, wh1_ref, w1h_ref,
                         w11_ref, ce_ref, *, tb, n_batch):
    """Per-batch-tile biaffine head-attachment scores with fused cross-entropy.

    score = h1 Whh h2^T + h1.wh1 + w1h.h2^T + w11 (bias-1 column folded at init);
    diagonal and word_mask columns set to -1e9; only (num, den) CE partials leave VMEM."""
    b0 = pl.program_id(0) * tb
    whh = whh_ref[...]
    wh1 = wh1_ref[...]                    # (1, H) f32
    w1h = w1h_ref[...]                    # (1, H) f32 (folded into the first dot)
    w11 = w11_ref[...]                    # (1, 1) f32
    num_t = jnp.zeros((1, 1), jnp.float32)
    den_t = jnp.zeros((1, 1), jnp.float32)
    for bi in range(tb):                  # static, small
        h1 = h1_ref[bi]                   # (L, H) bf16
        h2 = h2_ref[bi]                   # (L, H) bf16
        t = jnp.dot(h1, whh, preferred_element_type=jnp.float32) + w1h
        bil = jax.lax.dot_general(t.astype(jnp.bfloat16), h2,
                                  (((1,), (1,)), ((), ())),
                                  preferred_element_type=jnp.float32)   # (L, L)
        # width-1 matmul replaced by VPU multiply + lane reduce
        lin1 = jnp.sum(h1.astype(jnp.float32) * wh1, axis=1, keepdims=True)
        s = bil + lin1 + w11
        n = s.shape[0]
        r = jax.lax.broadcasted_iota(jnp.int32, (n, n), 0)
        c = jax.lax.broadcasted_iota(jnp.int32, (n, n), 1)
        s = jnp.where(r == c, _NEG, s)                      # no self-heads
        s = jnp.where(mask_ref[bi] != 0, _NEG, s)           # padded-word columns
        num, den = _ce_partial(s, tgt_ref[bi], (b0 + bi) < n_batch, n)
        num_t = num_t + num
        den_t = den_t + den
    ce_ref[0] = _pack_ce([num_t, den_t])


def _deprel_ce_kernel(h1_ref, h2_ref, tgt_ref, whh_ref, sel_ref, wh1_ref, w1h_ref,
                      w11_ref, ce_ref, *, n_rows, n_classes):
    """Gold-head deprel scores (TM, C) + fused CE, no per-class loop.

    bil[n,c] = h1[n] Whh_c h2[n]^T computed as ((h1 @ Whh_big) * tile_C(h2)) @ Sel,
    where Whh_big is (H, C*H) and Sel is the 0/1 block-sum matrix (C*H, Pc)."""
    h1 = h1_ref[...]                                                    # bf16 (TM, H)
    h2 = h2_ref[...]
    t = jnp.dot(h1, whh_ref[...], preferred_element_type=jnp.float32)  # (TM, C*H)
    h2f = h2.astype(jnp.float32)
    h2_rep = jnp.concatenate([h2f] * n_classes, axis=1)                 # (TM, C*H)
    m = (t * h2_rep).astype(jnp.bfloat16)
    bil = jnp.dot(m, sel_ref[...], preferred_element_type=jnp.float32)  # (TM, Pc)
    lin = (jnp.dot(h1, wh1_ref[...], preferred_element_type=jnp.float32)
           + jnp.dot(h2, w1h_ref[...], preferred_element_type=jnp.float32)
           + w11_ref[...])
    scores = bil + lin
    tm = scores.shape[0]
    row = jax.lax.broadcasted_iota(jnp.int32, (tm, 1), 0) + pl.program_id(0) * tm
    num, den = _ce_partial(scores, tgt_ref[...], row < n_rows, n_classes)
    ce_ref[0] = _pack_ce([num, den])


# ----------------------------------------------------------------------------
# Wrappers
# ----------------------------------------------------------------------------
def pallas_tag_down(x, emb, tgt3, w_main, w_xe, b_main, *, segs, vdims):
    n, d = x.shape
    e = emb.shape[1]
    ns = w_main.shape[1]
    pd = segs[3]
    tm, steps = _row_tile(n)
    kern = functools.partial(_tag_down_kernel, segs=segs, vdims=vdims, n_rows=n)
    return pl.pallas_call(
        kern,
        out_shape=(jax.ShapeDtypeStruct((n, pd), jnp.bfloat16),
                   jax.ShapeDtypeStruct((steps, 1, 8), jnp.float32)),
        grid=(steps,),
        in_specs=[pl.BlockSpec((tm, d), lambda i: (i, 0)),
                  pl.BlockSpec((tm, e), lambda i: (i, 0)),
                  pl.BlockSpec((tm, 3), lambda i: (i, 0)),
                  pl.BlockSpec((d, ns), lambda i: (0, 0)),
                  pl.BlockSpec((e, w_xe.shape[1]), lambda i: (0, 0)),
                  pl.BlockSpec((1, ns), lambda i: (0, 0))],
        out_specs=(pl.BlockSpec((tm, pd), lambda i: (i, 0)),
                   pl.BlockSpec((1, 1, 8), lambda i: (i, 0, 0))),
        compiler_params=_cparams(),
    )(x, emb, tgt3, w_main, w_xe, b_main)


def pallas_linear(x, w, b, *, relu=False, out_dtype=jnp.float32):
    n, din = x.shape
    dout = w.shape[1]
    tm, steps = _row_tile(n)
    return pl.pallas_call(
        functools.partial(_linear_kernel, relu=relu),
        out_shape=jax.ShapeDtypeStruct((n, dout), out_dtype),
        grid=(steps,),
        in_specs=[pl.BlockSpec((tm, din), lambda i: (i, 0)),
                  pl.BlockSpec((din, dout), lambda i: (0, 0)),
                  pl.BlockSpec((1, dout), lambda i: (0, 0))],
        out_specs=pl.BlockSpec((tm, dout), lambda i: (i, 0)),
        compiler_params=_cparams(),
    )(x, w, b)


def pallas_h_proj(x, w, b):
    n, pd = x.shape
    ns = w.shape[1]          # 4 * pd
    tm, steps = _row_tile(n)
    return pl.pallas_call(
        functools.partial(_hproj_kernel, pd=pd),
        out_shape=tuple(jax.ShapeDtypeStruct((n, pd), jnp.bfloat16) for _ in range(4)),
        grid=(steps,),
        in_specs=[pl.BlockSpec((tm, pd), lambda i: (i, 0)),
                  pl.BlockSpec((pd, ns), lambda i: (0, 0)),
                  pl.BlockSpec((1, ns), lambda i: (0, 0))],
        out_specs=tuple(pl.BlockSpec((tm, pd), lambda i: (i, 0)) for _ in range(4)),
        compiler_params=_cparams(),
    )(x, w, b)


def pallas_unlabeled_ce(h1, h2, mask3, tgt3d, u):
    B, L, H = h1.shape
    tb = B if B <= 8 else 8
    steps = pl.cdiv(B, tb)
    kern = functools.partial(_unlabeled_ce_kernel, tb=tb, n_batch=B)
    return pl.pallas_call(
        kern,
        out_shape=jax.ShapeDtypeStruct((steps, 1, 8), jnp.float32),
        grid=(steps,),
        in_specs=[pl.BlockSpec((tb, L, H), lambda b: (b, 0, 0)),
                  pl.BlockSpec((tb, L, H), lambda b: (b, 0, 0)),
                  pl.BlockSpec((tb, 1, L), lambda b: (b, 0, 0)),
                  pl.BlockSpec((tb, L, 1), lambda b: (b, 0, 0)),
                  pl.BlockSpec((H, H), lambda b: (0, 0)),
                  pl.BlockSpec((1, H), lambda b: (0, 0)),
                  pl.BlockSpec((1, H), lambda b: (0, 0)),
                  pl.BlockSpec((1, 1), lambda b: (0, 0))],
        out_specs=pl.BlockSpec((1, 1, 8), lambda b: (b, 0, 0)),
        compiler_params=_cparams(),
    )(h1, h2, mask3, tgt3d, u['whh'], u['wh1'], u['w1h'], u['w11'])


def pallas_deprel_ce(h1g, h2g, tgt, d, *, n_classes, pc):
    n, H = h1g.shape
    tm, steps = _dep_row_tile(n, n_classes, H)
    tgt2 = tgt.reshape(n, 1)
    kern = functools.partial(_deprel_ce_kernel, n_rows=n, n_classes=n_classes)
    return pl.pallas_call(
        kern,
        out_shape=jax.ShapeDtypeStruct((steps, 1, 8), jnp.float32),
        grid=(steps,),
        in_specs=[pl.BlockSpec((tm, H), lambda i: (i, 0)),
                  pl.BlockSpec((tm, H), lambda i: (i, 0)),
                  pl.BlockSpec((tm, 1), lambda i: (i, 0)),
                  pl.BlockSpec((H, n_classes * H), lambda i: (0, 0)),
                  pl.BlockSpec((n_classes * H, pc), lambda i: (0, 0)),
                  pl.BlockSpec((H, pc), lambda i: (0, 0)),
                  pl.BlockSpec((H, pc), lambda i: (0, 0)),
                  pl.BlockSpec((1, pc), lambda i: (0, 0))],
        out_specs=pl.BlockSpec((1, 1, 8), lambda i: (i, 0, 0)),
        compiler_params=_cparams(),
    )(h1g, h2g, tgt2, d['whh'], d['sel'], d['wh1'], d['w1h'], d['w11'])


# ----------------------------------------------------------------------------
# Parameters (synthetic); all lane-padding / weight re-layout done once here.
# ----------------------------------------------------------------------------
def init_params(key, xlmr_dim, n_upos, n_xpos, n_feats, n_deprel, down_dim, emb_dim=50):
    s = 0.05
    pu, px, pf = _pad128(n_upos), _pad128(n_xpos), _pad128(n_feats)
    pd, pc = _pad128(down_dim), _pad128(n_deprel)
    keys = jax.random.split(key, 12)

    def lin(k, din, dout, p):
        kw, kb = jax.random.split(k)
        w = jax.random.normal(kw, (din, dout), jnp.float32) * s
        b = jax.random.normal(kb, (dout,), jnp.float32) * s
        wp = jnp.pad(w, ((0, 0), (0, p - dout))).astype(jnp.bfloat16)
        bp = jnp.pad(b, (0, p - dout)).reshape(1, p)
        return wp, bp

    upos_w, upos_b = lin(keys[0], xlmr_dim, n_upos, pu)
    xpos_wa, xpos_b = lin(keys[1], xlmr_dim, n_xpos, px)           # word_reprs part
    kxe, _ = jax.random.split(keys[2])
    w_xe = jnp.pad(jax.random.normal(kxe, (emb_dim, n_xpos), jnp.float32) * s,
                   ((0, 0), (0, px - n_xpos))).astype(jnp.bfloat16)  # upos-emb part
    feats_w, feats_b = lin(keys[3], xlmr_dim, n_feats, pf)
    down_w, down_b = lin(keys[4], xlmr_dim, down_dim, pd)

    # one fused weight for upos | xpos | feats | down_project
    w_main = jnp.concatenate([upos_w, xpos_wa, feats_w, down_w], axis=1)
    b_main = jnp.concatenate([upos_b, xpos_b, feats_b, down_b], axis=1)

    upos_emb = jax.random.normal(keys[5], (n_upos, emb_dim), jnp.float32) * s

    def hid_lin(k):
        kw, kb = jax.random.split(k)
        w = jax.random.normal(kw, (down_dim, down_dim), jnp.float32) * s
        b = jax.random.normal(kb, (down_dim,), jnp.float32) * s
        wp = jnp.zeros((pd, pd), jnp.float32).at[:down_dim, :down_dim].set(w)
        bp = jnp.pad(b, (0, pd - down_dim)).reshape(1, pd)
        return wp.astype(jnp.bfloat16), bp

    u_wl, u_bl = hid_lin(keys[6])
    u_wr, u_br = hid_lin(keys[7])
    d_wl, d_bl = hid_lin(keys[8])
    d_wr, d_br = hid_lin(keys[9])
    h_w = jnp.concatenate([u_wl, u_wr, d_wl, d_wr], axis=1)        # (pd, 4*pd)
    h_b = jnp.concatenate([u_bl, u_br, d_bl, d_br], axis=1)

    # unlabeled Deep_Biaffine pairwise weight with bias-1 column pre-split
    pwu = jax.random.normal(keys[10], (down_dim + 1, down_dim + 1), jnp.float32) * s
    unlabeled = dict(
        whh=jnp.zeros((pd, pd), jnp.float32)
            .at[:down_dim, :down_dim].set(pwu[:down_dim, :down_dim]).astype(jnp.bfloat16),
        wh1=jnp.zeros((1, pd), jnp.float32).at[0, :down_dim].set(pwu[:down_dim, down_dim]),
        w1h=jnp.zeros((1, pd), jnp.float32).at[0, :down_dim].set(pwu[down_dim, :down_dim]),
        w11=pwu[down_dim, down_dim].reshape(1, 1),
    )

    # deprel pairwise weight laid out as (H, C*H) + block-sum selection matrix
    pwd = jax.random.normal(keys[11], (down_dim + 1, down_dim + 1, n_deprel),
                            jnp.float32) * s
    whh3 = jnp.zeros((pd, pd, n_deprel), jnp.float32).at[:down_dim, :down_dim, :].set(
        pwd[:down_dim, :down_dim, :])
    deprel = dict(
        whh=jnp.transpose(whh3, (0, 2, 1)).reshape(pd, n_deprel * pd).astype(jnp.bfloat16),
        sel=jnp.repeat(jnp.eye(n_deprel, pc, dtype=jnp.float32), pd,
                       axis=0).astype(jnp.bfloat16),
        wh1=jnp.zeros((pd, pc), jnp.float32)
            .at[:down_dim, :n_deprel].set(pwd[:down_dim, down_dim, :]).astype(jnp.bfloat16),
        w1h=jnp.zeros((pd, pc), jnp.float32)
            .at[:down_dim, :n_deprel].set(pwd[down_dim, :down_dim, :]).astype(jnp.bfloat16),
        w11=jnp.zeros((1, pc), jnp.float32).at[0, :n_deprel].set(pwd[down_dim, down_dim, :]),
    )

    params = dict(upos_emb=upos_emb, w_main=w_main, b_main=b_main, w_xe=w_xe,
                  down_w=down_w, down_b=down_b, h_w=h_w, h_b=h_b,
                  unlabeled=unlabeled, deprel=deprel)
    dims = (pu, px, pf, pd, pc, n_upos, n_xpos, n_feats, n_deprel)
    return params, dims


# ----------------------------------------------------------------------------
# Forward pass (hot paths in Pallas; only tiny gathers/concats in XLA glue)
# ----------------------------------------------------------------------------
def posdep_forward(params, word_reprs, cls_reprs, upos_ids,
                   upos_type_idxs, xpos_type_idxs, feats_type_idxs,
                   head_idxs, deprel_idxs, word_mask, *, dims):
    pu, px, pf, pd, pc, n_upos, n_xpos, n_feats, n_deprel = dims
    B, T, D = word_reprs.shape
    L = T + 1

    wr2 = word_reprs.reshape(B * T, D).astype(jnp.bfloat16)
    emb = params['upos_emb'][upos_ids].reshape(B * T, -1).astype(jnp.bfloat16)
    tgt3 = jnp.stack([upos_type_idxs, xpos_type_idxs, feats_type_idxs],
                     axis=1).astype(jnp.int32)

    # --- fused tag heads (upos/xpos/feats CE) + down projection: one read of wr2 ---
    dp_word, tag_ce = pallas_tag_down(wr2, emb, tgt3, params['w_main'],
                                      params['w_xe'], params['b_main'],
                                      segs=(pu, px, pf, pd),
                                      vdims=(n_upos, n_xpos, n_feats))
    s = jnp.sum(tag_ce, axis=(0, 1))
    loss = (s[0] / jnp.maximum(s[1], 1.0)
            + s[2] / jnp.maximum(s[3], 1.0)
            + s[4] / jnp.maximum(s[5], 1.0))

    # --- down projection of the tiny cls rows ---
    cls2 = cls_reprs.reshape(B, D).astype(jnp.bfloat16)
    dp_cls = pallas_linear(cls2, params['down_w'], params['down_b'],
                           relu=False, out_dtype=jnp.bfloat16)

    dp = jnp.concatenate([dp_cls.reshape(B, 1, pd),
                          dp_word.reshape(B, T, pd)], axis=1)           # (B, L, pd) bf16
    dp2 = dp.reshape(B * L, pd)

    # --- fused ReLU projections for both biaffine heads: one read of dp2 ---
    h1u, h2u, h1d, h2d = pallas_h_proj(dp2, params['h_w'], params['h_b'])

    # --- unlabeled (head attachment) biaffine + fused CE; (B,L,L) never hits HBM ---
    u = params['unlabeled']
    unl_tgt = jnp.concatenate(
        [jnp.full((B, 1), -100, jnp.int32),                              # cls row excluded
         jnp.where(word_mask[:, 1:], -100, head_idxs).astype(jnp.int32)], axis=1)
    mask3 = word_mask.astype(jnp.int32).reshape(B, 1, L)
    unl_ce = pallas_unlabeled_ce(h1u.reshape(B, L, pd), h2u.reshape(B, L, pd),
                                 mask3, unl_tgt.reshape(B, L, 1), u)
    s = jnp.sum(unl_ce, axis=(0, 1))
    loss = loss + s[0] / jnp.maximum(s[1], 1.0)

    # --- labeled (deprel) scores only at gold heads + fused CE ---
    d = params['deprel']
    h1g = h1d.reshape(B, L, pd)[:, 1:, :].reshape(B * T, pd)
    idx = jnp.broadcast_to(head_idxs[:, :, None], (B, T, pd))
    h2g = jnp.take_along_axis(h2d.reshape(B, L, pd), idx, axis=1).reshape(B * T, pd)
    dep_tgt = jnp.where(word_mask[:, 1:], -100, deprel_idxs).reshape(B * T).astype(jnp.int32)
    dep_ce = pallas_deprel_ce(h1g, h2g, dep_tgt, d, n_classes=n_deprel, pc=pc)
    s = jnp.sum(dep_ce, axis=(0, 1))
    loss = loss + s[0] / jnp.maximum(s[1], 1.0)

    return loss


# ----------------------------------------------------------------------------
# Example run
# ----------------------------------------------------------------------------
if __name__ == "__main__":
    B, T = 2, 8
    XLMR_DIM = 64          # small stand-in for the 768/1024 XLM-R hidden size
    N_UPOS, N_XPOS, N_FEATS, N_DEPREL = 16, 24, 20, 8
    DOWN_DIM = XLMR_DIM // 4
    L = T + 1

    key = jax.random.PRNGKey(0)
    kp, k1, k2, k3, k4, k5, k6, k7, k8 = jax.random.split(key, 9)

    params, dims = init_params(kp, XLMR_DIM, N_UPOS, N_XPOS, N_FEATS, N_DEPREL, DOWN_DIM)

    word_reprs = jax.random.normal(k1, (B, T, XLMR_DIM), jnp.float32)
    cls_reprs = jax.random.normal(k2, (B, 1, XLMR_DIM), jnp.float32)
    upos_ids = jax.random.randint(k3, (B, T), 0, N_UPOS)
    upos_type_idxs = jax.random.randint(k4, (B * T,), 0, N_UPOS)
    xpos_type_idxs = jax.random.randint(k5, (B * T,), 0, N_XPOS)
    feats_type_idxs = jax.random.randint(k6, (B * T,), 0, N_FEATS)

    raw_heads = jax.random.randint(k7, (B, T), 0, L - 1)          # avoid padded column
    t_idx = jnp.arange(T)[None, :]
    head_idxs = jnp.where(raw_heads == t_idx + 1, 0, raw_heads)   # no self-heads
    deprel_idxs = jax.random.randint(k8, (B, T), 0, N_DEPREL)

    word_mask = jnp.zeros((B, L), dtype=bool).at[1, L - 1].set(True)  # pad last word of sent 1

    fwd = jax.jit(posdep_forward, static_argnames=("dims",))
    loss = fwd(params, word_reprs, cls_reprs, upos_ids,
               upos_type_idxs, xpos_type_idxs, feats_type_idxs,
               head_idxs, deprel_idxs, word_mask, dims=dims)
    loss = jax.block_until_ready(loss)
    assert jnp.isfinite(loss), f"loss is not finite: {loss}"
    print("KERNEL_OK")
</pallas_src>

<mosaic_0001>
module attributes {stable_mosaic.version = 11 : i64} {
  func.func private @main(%arg0: i32) attributes {dimension_semantics = [#tpu.dimension_semantics<core_parallel>], iteration_bounds = array<i64: 2>, tpu.core_type = #tpu.core_type<sc_scalar_subcore>, window_params = []} {
    return
  }
}

module attributes {stable_mosaic.version = 11 : i64} {
  func.func private @main(%arg0: i32) attributes {dimension_semantics = [#tpu.dimension_semantics<core_parallel>], iteration_bounds = array<i64: 2>, tpu.core_type = #tpu.core_type<sc_scalar_subcore>, window_params = []} {
    return
  }
}

module attributes {stable_mosaic.version = 11 : i64} {
  func.func @_linear_kernel(%arg0: i32, %arg1: memref<2x64xbf16, #tpu.memory_space<vmem>>, %arg2: memref<64x128xbf16, #tpu.memory_space<vmem>>, %arg3: memref<1x128xf32, #tpu.memory_space<vmem>>, %arg4: memref<2x128xbf16, #tpu.memory_space<vmem>>) attributes {dimension_semantics = [#tpu.dimension_semantics<parallel>], iteration_bounds = array<i64: 1>, scalar_prefetch = 0 : i64, scratch_operands = 0 : i64, tpu.core_type = #tpu.core_type<tc>, window_params = [{transform_indices = @transform_0, window_bounds = array<i64: 2, 64>}, {pipeline_mode = #tpu.pipeline_mode<synchronous>, transform_indices = @transform_1, window_bounds = array<i64: 64, 128>}, {pipeline_mode = #tpu.pipeline_mode<synchronous>, transform_indices = @transform_2, window_bounds = array<i64: 1, 128>}, {transform_indices = @transform_3, window_bounds = array<i64: 2, 128>}]} {
    %c0 = arith.constant 0 : index
    %c0_0 = arith.constant 0 : index
    %0 = vector.load %arg1[%c0, %c0_0] : memref<2x64xbf16, #tpu.memory_space<vmem>>, vector<2x64xbf16>
    %c0_1 = arith.constant 0 : index
    %c0_2 = arith.constant 0 : index
    %1 = vector.load %arg2[%c0_1, %c0_2] : memref<64x128xbf16, #tpu.memory_space<vmem>>, vector<64x128xbf16>
    %cst = arith.constant dense<0.000000e+00> : vector<2x128xf32>
    %2 = tpu.matmul %0, %1, %cst {dimension_numbers = #tpu.dot_dimension_numbers<[1], [0], [0], [1], [0, 0, 1, 1], [], []>} : vector<2x64xbf16>, vector<64x128xbf16>, vector<2x128xf32> -> vector<2x128xf32>
    %c0_3 = arith.constant 0 : index
    %c0_4 = arith.constant 0 : index
    %3 = vector.load %arg3[%c0_3, %c0_4] : memref<1x128xf32, #tpu.memory_space<vmem>>, vector<1x128xf32>
    %4 = vector.broadcast %3 : vector<1x128xf32> to vector<2x128xf32>
    %5 = arith.addf %2, %4 : vector<2x128xf32>
    %6 = arith.truncf %5 : vector<2x128xf32> to vector<2x128xbf16>
    %c0_5 = arith.constant 0 : index
    %c0_6 = arith.constant 0 : index
    %7 = vector.load %arg4[%c0_5, %c0_6] : memref<2x128xbf16, #tpu.memory_space<vmem>>, vector<2x128xbf16>
    tpu.vector_store %arg4[%c0_5, %c0_6], %6 {strides = array<i32>} : memref<2x128xbf16, #tpu.memory_space<vmem>>, vector<2x128xbf16>,
    return
  }
  func.func @transform_0(%arg0: i32) -> (i32, i32) {
    %c0_i32 = arith.constant 0 : i32
    %c0_i32_0 = arith.constant 0 : i32
    return %arg0, %c0_i32 : i32, i32
  }
  func.func @transform_1(%arg0: i32) -> (i32, i32) {
    %c0_i32 = arith.constant 0 : i32
    %c0_i32_0 = arith.constant 0 : i32
    %c0_i32_1 = arith.constant 0 : i32
    return %c0_i32, %c0_i32_0 : i32, i32
  }
  func.func @transform_2(%arg0: i32) -> (i32, i32) {
    %c0_i32 = arith.constant 0 : i32
    %c0_i32_0 = arith.constant 0 : i32
    %c0_i32_1 = arith.constant 0 : i32
    return %c0_i32, %c0_i32_0 : i32, i32
  }
  func.func @transform_3(%arg0: i32) -> (i32, i32) {
    %c0_i32 = arith.constant 0 : i32
    %c0_i32_0 = arith.constant 0 : i32
    return %arg0, %c0_i32 : i32, i32
  }
}

module attributes {stable_mosaic.version = 11 : i64} {
  func.func @_tag_down_kernel(%arg0: i32, %arg1: memref<16x64xbf16, #tpu.memory_space<vmem>>, %arg2: memref<16x50xbf16, #tpu.memory_space<vmem>>, %arg3: memref<16x3xi32, #tpu.memory_space<vmem>>, %arg4: memref<64x512xbf16, #tpu.memory_space<vmem>>, %arg5: memref<50x128xbf16, #tpu.memory_space<vmem>>, %arg6: memref<1x512xf32, #tpu.memory_space<vmem>>, %arg7: memref<16x128xbf16, #tpu.memory_space<vmem>>, %arg8: memref<1x1x8xf32, #tpu.memory_space<vmem>>) attributes {dimension_semantics = [#tpu.dimension_semantics<parallel>], iteration_bounds = array<i64: 1>, scalar_prefetch = 0 : i64, scratch_operands = 0 : i64, tpu.core_type = #tpu.core_type<tc>, window_params = [{transform_indices = @transform_0, window_bounds = array<i64: 16, 64>}, {transform_indices = @transform_1, window_bounds = array<i64: 16, 50>}, {transform_indices = @transform_2, window_bounds = array<i64: 16, 3>}, {pipeline_mode = #tpu.pipeline_mode<synchronous>, transform_indices = @transform_3, window_bounds = array<i64: 64, 512>}, {pipeline_mode = #tpu.pipeline_mode<synchronous>, transform_indices = @transform_4, window_bounds = array<i64: 50, 128>}, {pipeline_mode = #tpu.pipeline_mode<synchronous>, transform_indices = @transform_5, window_bounds = array<i64: 1, 512>}, {transform_indices = @transform_6, window_bounds = array<i64: 16, 128>}, {transform_indices = @transform_7, window_bounds = array<i64: 1, 1, 8>}]} {
    %c0 = arith.constant 0 : index
    %c0_0 = arith.constant 0 : index
    %0 = vector.load %arg1[%c0, %c0_0] : memref<16x64xbf16, #tpu.memory_space<vmem>>, vector<16x64xbf16>
    %c0_1 = arith.constant 0 : index
    %c0_2 = arith.constant 0 : index
    %1 = vector.load %arg4[%c0_1, %c0_2] : memref<64x512xbf16, #tpu.memory_space<vmem>>, vector<64x512xbf16>
    %cst = arith.constant dense<0.000000e+00> : vector<16x512xf32>
    %2 = tpu.matmul %0, %1, %cst {dimension_numbers = #tpu.dot_dimension_numbers<[1], [0], [0], [1], [0, 0, 1, 1], [], []>} : vector<16x64xbf16>, vector<64x512xbf16>, vector<16x512xf32> -> vector<16x512xf32>
    %c0_3 = arith.constant 0 : index
    %c0_4 = arith.constant 0 : index
    %3 = vector.load %arg6[%c0_3, %c0_4] : memref<1x512xf32, #tpu.memory_space<vmem>>, vector<1x512xf32>
    %4 = vector.broadcast %3 : vector<1x512xf32> to vector<16x512xf32>
    %5 = arith.addf %2, %4 : vector<16x512xf32>
    %c0_5 = arith.constant 0 : index
    %c0_6 = arith.constant 0 : index
    %6 = vector.load %arg2[%c0_5, %c0_6] : memref<16x50xbf16, #tpu.memory_space<vmem>>, vector<16x50xbf16>
    %c0_7 = arith.constant 0 : index
    %c0_8 = arith.constant 0 : index
    %7 = vector.load %arg5[%c0_7, %c0_8] : memref<50x128xbf16, #tpu.memory_space<vmem>>, vector<50x128xbf16>
    %cst_9 = arith.constant dense<0.000000e+00> : vector<16x128xf32>
    %8 = tpu.matmul %6, %7, %cst_9 {dimension_numbers = #tpu.dot_dimension_numbers<[1], [0], [0], [1], [0, 0, 1, 1], [], []>} : vector<16x50xbf16>, vector<50x128xbf16>, vector<16x128xf32> -> vector<16x128xf32>
    %9 = tpu.iota {dimensions = array<i32: 0>} : vector<16x1xi32>
    %c16_i32 = arith.constant 16 : i32
    %10 = arith.muli %arg0, %c16_i32 : i32
    %11 = vector.broadcast %10 : i32 to vector<16x1xi32>
    %12 = arith.addi %9, %11 : vector<16x1xi32>
    %c16_i32_10 = arith.constant 16 : i32
    %13 = vector.broadcast %c16_i32_10 : i32 to vector<16x1xi32>
    %14 = arith.cmpi slt, %12, %13 : vector<16x1xi32>
    %c0_11 = arith.constant 0 : index
    %c0_12 = arith.constant 0 : index
    %15 = vector.load %arg3[%c0_11, %c0_12] : memref<16x3xi32, #tpu.memory_space<vmem>>, vector<16x3xi32>
    %16 = vector.extract_strided_slice %5 {offsets = [0, 0], sizes = [16, 128], strides = [1, 1]} : vector<16x512xf32> to vector<16x128xf32>
    %17 = vector.extract_strided_slice %15 {offsets = [0, 0], sizes = [16, 1], strides = [1, 1]} : vector<16x3xi32> to vector<16x1xi32>
    %18 = tpu.iota {dimensions = array<i32: 1>} : vector<16x128xi32>
    %c16_i32_13 = arith.constant 16 : i32
    %19 = vector.broadcast %c16_i32_13 : i32 to vector<16x128xi32>
    %20 = arith.cmpi slt, %18, %19 : vector<16x128xi32>
    %cst_14 = arith.constant -1.000000e+09 : f32
    %21 = vector.broadcast %cst_14 : f32 to vector<16x128xf32>
    %22 = arith.select %20, %16, %21 : vector<16x128xi1>, vector<16x128xf32>
    %c-100_i32 = arith.constant -100 : i32
    %23 = vector.broadcast %c-100_i32 : i32 to vector<16x1xi32>
    %24 = arith.cmpi ne, %17, %23 : vector<16x1xi32>
    %25 = arith.andi %24, %14 : vector<16x1xi1>
    %cst_15 = arith.constant dense<0xFF800000> : vector<16xf32>
    %26 = vector.multi_reduction <maximumf>, %22, %cst_15 [1] : vector<16x128xf32> to vector<16xf32>
    %27 = vector.shape_cast %26 : vector<16xf32> to vector<16x1xf32>
    %28 = vector.broadcast %27 : vector<16x1xf32> to vector<16x128xf32>
    %29 = arith.subf %22, %28 : vector<16x128xf32>
    %30 = math.exp %29 : vector<16x128xf32>
    %cst_16 = arith.constant dense<0.000000e+00> : vector<16xf32>
    %31 = vector.multi_reduction <add>, %30, %cst_16 [1] : vector<16x128xf32> to vector<16xf32>
    %32 = vector.shape_cast %31 : vector<16xf32> to vector<16x1xf32>
    %33 = math.log %32 : vector<16x1xf32>
    %34 = arith.addf %33, %27 : vector<16x1xf32>
    %35 = vector.broadcast %17 : vector<16x1xi32> to vector<16x128xi32>
    %36 = arith.cmpi eq, %18, %35 : vector<16x128xi32>
    %cst_17 = arith.constant 0.000000e+00 : f32
    %37 = vector.broadcast %cst_17 : f32 to vector<16x128xf32>
    %38 = arith.select %36, %22, %37 : vector<16x128xi1>, vector<16x128xf32>
    %cst_18 = arith.constant dense<0.000000e+00> : vector<16xf32>
    %39 = vector.multi_reduction <add>, %38, %cst_18 [1] : vector<16x128xf32> to vector<16xf32>
    %40 = vector.shape_cast %39 : vector<16xf32> to vector<16x1xf32>
    %41 = arith.subf %34, %40 : vector<16x1xf32>
    %cst_19 = arith.constant 0.000000e+00 : f32
    %42 = vector.broadcast %cst_19 : f32 to vector<16x1xf32>
    %43 = arith.select %25, %41, %42 : vector<16x1xi1>, vector<16x1xf32>
    %cst_20 = arith.constant dense<0.000000e+00> : vector<1xf32>
    %44 = vector.multi_reduction <add>, %43, %cst_20 [0] : vector<16x1xf32> to vector<1xf32>
    %45 = vector.shape_cast %44 : vector<1xf32> to vector<1x1xf32>
    %46 = arith.extui %25 : vector<16x1xi1> to vector<16x1xi32>
    %47 = arith.sitofp %46 : vector<16x1xi32> to vector<16x1xf32>
    %cst_21 = arith.constant dense<0.000000e+00> : vector<1xf32>
    %48 = vector.multi_reduction <add>, %47, %cst_21 [0] : vector<16x1xf32> to vector<1xf32>
    %49 = vector.shape_cast %48 : vector<1xf32> to vector<1x1xf32>
    %50 = vector.extract_strided_slice %5 {offsets = [0, 128], sizes = [16, 128], strides = [1, 1]} : vector<16x512xf32> to vector<16x128xf32>
    %51 = arith.addf %50, %8 : vector<16x128xf32>
    %52 = vector.extract_strided_slice %15 {offsets = [0, 1], sizes = [16, 1], strides = [1, 1]} : vector<16x3xi32> to vector<16x1xi32>
    %53 = tpu.iota {dimensions = array<i32: 1>} : vector<16x128xi32>
    %c24_i32 = arith.constant 24 : i32
    %54 = vector.broadcast %c24_i32 : i32 to vector<16x128xi32>
    %55 = arith.cmpi slt, %53, %54 : vector<16x128xi32>
    %cst_22 = arith.constant -1.000000e+09 : f32
    %56 = vector.broadcast %cst_22 : f32 to vector<16x128xf32>
    %57 = arith.select %55, %51, %56 : vector<16x128xi1>, vector<16x128xf32>
    %c-100_i32_23 = arith.constant -100 : i32
    %58 = vector.broadcast %c-100_i32_23 : i32 to vector<16x1xi32>
    %59 = arith.cmpi ne, %52, %58 : vector<16x1xi32>
    %60 = arith.andi %59, %14 : vector<16x1xi1>
    %cst_24 = arith.constant dense<0xFF800000> : vector<16xf32>
    %61 = vector.multi_reduction <maximumf>, %57, %cst_24 [1] : vector<16x128xf32> to vector<16xf32>
    %62 = vector.shape_cast %61 : vector<16xf32> to vector<16x1xf32>
    %63 = vector.broadcast %62 : vector<16x1xf32> to vector<16x128xf32>
    %64 = arith.subf %57, %63 : vector<16x128xf32>
    %65 = math.exp %64 : vector<16x128xf32>
    %cst_25 = arith.constant dense<0.000000e+00> : vector<16xf32>
    %66 = vector.multi_reduction <add>, %65, %cst_25 [1] : vector<16x128xf32> to vector<16xf32>
    %67 = vector.shape_cast %66 : vector<16xf32> to vector<16x1xf32>
    %68 = math.log %67 : vector<16x1xf32>
    %69 = arith.addf %68, %62 : vector<16x1xf32>
    %70 = vector.broadcast %52 : vector<16x1xi32> to vector<16x128xi32>
    %71 = arith.cmpi eq, %53, %70 : vector<16x128xi32>
    %cst_26 = arith.constant 0.000000e+00 : f32
    %72 = vector.broadcast %cst_26 : f32 to vector<16x128xf32>
    %73 = arith.select %71, %57, %72 : vector<16x128xi1>, vector<16x128xf32>
    %cst_27 = arith.constant dense<0.000000e+00> : vector<16xf32>
    %74 = vector.multi_reduction <add>, %73, %cst_27 [1] : vector<16x128xf32> to vector<16xf32>
    %75 = vector.shape_cast %74 : vector<16xf32> to vector<16x1xf32>
    %76 = arith.subf %69, %75 : vector<16x1xf32>
    %cst_28 = arith.constant 0.000000e+00 : f32
    %77 = vector.broadcast %cst_28 : f32 to vector<16x1xf32>
    %78 = arith.select %60, %76, %77 : vector<16x1xi1>, vector<16x1xf32>
    %cst_29 = arith.constant dense<0.000000e+00> : vector<1xf32>
    %79 = vector.multi_reduction <add>, %78, %cst_29 [0] : vector<16x1xf32> to vector<1xf32>
    %80 = vector.shape_cast %79 : vector<1xf32> to vector<1x1xf32>
    %81 = arith.extui %60 : vector<16x1xi1> to vector<16x1xi32>
    %82 = arith.sitofp %81 : vector<16x1xi32> to vector<16x1xf32>
    %cst_30 = arith.constant dense<0.000000e+00> : vector<1xf32>
    %83 = vector.multi_reduction <add>, %82, %cst_30 [0] : vector<16x1xf32> to vector<1xf32>
    %84 = vector.shape_cast %83 : vector<1xf32> to vector<1x1xf32>
    %85 = vector.extract_strided_slice %5 {offsets = [0, 256], sizes = [16, 128], strides = [1, 1]} : vector<16x512xf32> to vector<16x128xf32>
    %86 = vector.extract_strided_slice %15 {offsets = [0, 2], sizes = [16, 1], strides = [1, 1]} : vector<16x3xi32> to vector<16x1xi32>
    %87 = tpu.iota {dimensions = array<i32: 1>} : vector<16x128xi32>
    %c20_i32 = arith.constant 20 : i32
    %88 = vector.broadcast %c20_i32 : i32 to vector<16x128xi32>
    %89 = arith.cmpi slt, %87, %88 : vector<16x128xi32>
    %cst_31 = arith.constant -1.000000e+09 : f32
    %90 = vector.broadcast %cst_31 : f32 to vector<16x128xf32>
    %91 = arith.select %89, %85, %90 : vector<16x128xi1>, vector<16x128xf32>
    %c-100_i32_32 = arith.constant -100 : i32
    %92 = vector.broadcast %c-100_i32_32 : i32 to vector<16x1xi32>
    %93 = arith.cmpi ne, %86, %92 : vector<16x1xi32>
    %94 = arith.andi %93, %14 : vector<16x1xi1>
    %cst_33 = arith.constant dense<0xFF800000> : vector<16xf32>
    %95 = vector.multi_reduction <maximumf>, %91, %cst_33 [1] : vector<16x128xf32> to vector<16xf32>
    %96 = vector.shape_cast %95 : vector<16xf32> to vector<16x1xf32>
    %97 = vector.broadcast %96 : vector<16x1xf32> to vector<16x128xf32>
    %98 = arith.subf %91, %97 : vector<16x128xf32>
    %99 = math.exp %98 : vector<16x128xf32>
    %cst_34 = arith.constant dense<0.000000e+00> : vector<16xf32>
    %100 = vector.multi_reduction <add>, %99, %cst_34 [1] : vector<16x128xf32> to vector<16xf32>
    %101 = vector.shape_cast %100 : vector<16xf32> to vector<16x1xf32>
    %102 = math.log %101 : vector<16x1xf32>
    %103 = arith.addf %102, %96 : vector<16x1xf32>
    %104 = vector.broadcast %86 : vector<16x1xi32> to vector<16x128xi32>
    %105 = arith.cmpi eq, %87, %104 : vector<16x128xi32>
    %cst_35 = arith.constant 0.000000e+00 : f32
    %106 = vector.broadcast %cst_35 : f32 to vector<16x128xf32>
    %107 = arith.select %105, %91, %106 : vector<16x128xi1>, vector<16x128xf32>
    %cst_36 = arith.constant dense<0.000000e+00> : vector<16xf32>
    %108 = vector.multi_reduction <add>, %107, %cst_36 [1] : vector<16x128xf32> to vector<16xf32>
    %109 = vector.shape_cast %108 : vector<16xf32> to vector<16x1xf32>
    %110 = arith.subf %103, %109 : vector<16x1xf32>
    %cst_37 = arith.constant 0.000000e+00 : f32
    %111 = vector.broadcast %cst_37 : f32 to vector<16x1xf32>
    %112 = arith.select %94, %110, %111 : vector<16x1xi1>, vector<16x1xf32>
    %cst_38 = arith.constant dense<0.000000e+00> : vector<1xf32>
    %113 = vector.multi_reduction <add>, %112, %cst_38 [0] : vector<16x1xf32> to vector<1xf32>
    %114 = vector.shape_cast %113 : vector<1xf32> to vector<1x1xf32>
    %115 = arith.extui %94 : vector<16x1xi1> to vector<16x1xi32>
    %116 = arith.sitofp %115 : vector<16x1xi32> to vector<16x1xf32>
    %cst_39 = arith.constant dense<0.000000e+00> : vector<1xf32>
    %117 = vector.multi_reduction <add>, %116, %cst_39 [0] : vector<16x1xf32> to vector<1xf32>
    %118 = vector.shape_cast %117 : vector<1xf32> to vector<1x1xf32>
    %119 = vector.extract_strided_slice %5 {offsets = [0, 384], sizes = [16, 128], strides = [1, 1]} : vector<16x512xf32> to vector<16x128xf32>
    %120 = arith.truncf %119 : vector<16x128xf32> to vector<16x128xbf16>
    %c0_40 = arith.constant 0 : index
    %c0_41 = arith.constant 0 : index
    %121 = vector.load %arg7[%c0_40, %c0_41] : memref<16x128xbf16, #tpu.memory_space<vmem>>, vector<16x128xbf16>
    tpu.vector_store %arg7[%c0_40, %c0_41], %120 {strides = array<i32>} : memref<16x128xbf16, #tpu.memory_space<vmem>>, vector<16x128xbf16>,
    %122 = tpu.iota {dimensions = array<i32: 1>} : vector<1x8xi32>
    %cst_42 = arith.constant 0.000000e+00 : f32
    %123 = vector.broadcast %cst_42 : f32 to vector<1x8xf32>
    %c0_i32 = arith.constant 0 : i32
    %124 = vector.broadcast %c0_i32 : i32 to vector<1x8xi32>
    %125 = arith.cmpi eq, %122, %124 : vector<1x8xi32>
    %cst_43 = arith.constant 0.000000e+00 : f32
    %126 = vector.shape_cast %45 : vector<1x1xf32> to vector<1x1xf32>
    %127 = vector.broadcast %126 : vector<1x1xf32> to vector<1x8xf32>
    %128 = vector.broadcast %cst_43 : f32 to vector<1x8xf32>
    %129 = arith.select %125, %127, %128 : vector<1x8xi1>, vector<1x8xf32>
    %130 = arith.addf %123, %129 : vector<1x8xf32>
    %c1_i32 = arith.constant 1 : i32
    %131 = vector.broadcast %c1_i32 : i32 to vector<1x8xi32>
    %132 = arith.cmpi eq, %122, %131 : vector<1x8xi32>
    %cst_44 = arith.constant 0.000000e+00 : f32
    %133 = vector.shape_cast %49 : vector<1x1xf32> to vector<1x1xf32>
    %134 = vector.broadcast %133 : vector<1x1xf32> to vector<1x8xf32>
    %135 = vector.broadcast %cst_44 : f32 to vector<1x8xf32>
    %136 = arith.select %132, %134, %135 : vector<1x8xi1>, vector<1x8xf32>
    %137 = arith.addf %130, %136 : vector<1x8xf32>
    %c2_i32 = arith.constant 2 : i32
    %138 = vector.broadcast %c2_i32 : i32 to vector<1x8xi32>
    %139 = arith.cmpi eq, %122, %138 : vector<1x8xi32>
    %cst_45 = arith.constant 0.000000e+00 : f32
    %140 = vector.shape_cast %80 : vector<1x1xf32> to vector<1x1xf32>
    %141 = vector.broadcast %140 : vector<1x1xf32> to vector<1x8xf32>
    %142 = vector.broadcast %cst_45 : f32 to vector<1x8xf32>
    %143 = arith.select %139, %141, %142 : vector<1x8xi1>, vector<1x8xf32>
    %144 = arith.addf %137, %143 : vector<1x8xf32>
    %c3_i32 = arith.constant 3 : i32
    %145 = vector.broadcast %c3_i32 : i32 to vector<1x8xi32>
    %146 = arith.cmpi eq, %122, %145 : vector<1x8xi32>
    %cst_46 = arith.constant 0.000000e+00 : f32
    %147 = vector.shape_cast %84 : vector<1x1xf32> to vector<1x1xf32>
    %148 = vector.broadcast %147 : vector<1x1xf32> to vector<1x8xf32>
    %149 = vector.broadcast %cst_46 : f32 to vector<1x8xf32>
    %150 = arith.select %146, %148, %149 : vector<1x8xi1>, vector<1x8xf32>
    %151 = arith.addf %144, %150 : vector<1x8xf32>
    %c4_i32 = arith.constant 4 : i32
    %152 = vector.broadcast %c4_i32 : i32 to vector<1x8xi32>
    %153 = arith.cmpi eq, %122, %152 : vector<1x8xi32>
    %cst_47 = arith.constant 0.000000e+00 : f32
    %154 = vector.shape_cast %114 : vector<1x1xf32> to vector<1x1xf32>
    %155 = vector.broadcast %154 : vector<1x1xf32> to vector<1x8xf32>
    %156 = vector.broadcast %cst_47 : f32 to vector<1x8xf32>
    %157 = arith.select %153, %155, %156 : vector<1x8xi1>, vector<1x8xf32>
    %158 = arith.addf %151, %157 : vector<1x8xf32>
    %c5_i32 = arith.constant 5 : i32
    %159 = vector.broadcast %c5_i32 : i32 to vector<1x8xi32>
    %160 = arith.cmpi eq, %122, %159 : vector<1x8xi32>
    %cst_48 = arith.constant 0.000000e+00 : f32
    %161 = vector.shape_cast %118 : vector<1x1xf32> to vector<1x1xf32>
    %162 = vector.broadcast %161 : vector<1x1xf32> to vector<1x8xf32>
    %163 = vector.broadcast %cst_48 : f32 to vector<1x8xf32>
    %164 = arith.select %160, %162, %163 : vector<1x8xi1>, vector<1x8xf32>
    %165 = arith.addf %158, %164 : vector<1x8xf32>
    %c0_49 = arith.constant 0 : index
    %c0_50 = arith.constant 0 : index
    %c0_51 = arith.constant 0 : index
    %166 = vector.load %arg8[%c0_49, %c0_50, %c0_51] : memref<1x1x8xf32, #tpu.memory_space<vmem>>, vector<1x1x8xf32>
    %167 = vector.shape_cast %166 : vector<1x1x8xf32> to vector<1x8xf32>
    %168 = vector.shape_cast %165 : vector<1x8xf32> to vector<1x1x8xf32>
    tpu.vector_store %arg8[%c0_49, %c0_50, %c0_51], %168 {strides = array<i32>} : memref<1x1x8xf32, #tpu.memory_space<vmem>>, vector<1x1x8xf32>,
    return
  }
  func.func @transform_0(%arg0: i32) -> (i32, i32) {
    %c0_i32 = arith.constant 0 : i32
    %c0_i32_0 = arith.constant 0 : i32
    return %arg0, %c0_i32 : i32, i32
  }
  func.func @transform_1(%arg0: i32) -> (i32, i32) {
    %c0_i32 = arith.constant 0 : i32
    %c0_i32_0 = arith.constant 0 : i32
    return %arg0, %c0_i32 : i32, i32
  }
  func.func @transform_2(%arg0: i32) -> (i32, i32) {
    %c0_i32 = arith.constant 0 : i32
    %c0_i32_0 = arith.constant 0 : i32
    return %arg0, %c0_i32 : i32, i32
  }
  func.func @transform_3(%arg0: i32) -> (i32, i32) {
    %c0_i32 = arith.constant 0 : i32
    %c0_i32_0 = arith.constant 0 : i32
    %c0_i32_1 = arith.constant 0 : i32
    return %c0_i32, %c0_i32_0 : i32, i32
  }
  func.func @transform_4(%arg0: i32) -> (i32, i32) {
    %c0_i32 = arith.constant 0 : i32
    %c0_i32_0 = arith.constant 0 : i32
    %c0_i32_1 = arith.constant 0 : i32
    return %c0_i32, %c0_i32_0 : i32, i32
  }
  func.func @transform_5(%arg0: i32) -> (i32, i32) {
    %c0_i32 = arith.constant 0 : i32
    %c0_i32_0 = arith.constant 0 : i32
    %c0_i32_1 = arith.constant 0 : i32
    return %c0_i32, %c0_i32_0 : i32, i32
  }
  func.func @transform_6(%arg0: i32) -> (i32, i32) {
    %c0_i32 = arith.constant 0 : i32
    %c0_i32_0 = arith.constant 0 : i32
    return %arg0, %c0_i32 : i32, i32
  }
  func.func @transform_7(%arg0: i32) -> (i32, i32, i32) {
    %c0_i32 = arith.constant 0 : i32
    %c0_i32_0 = arith.constant 0 : i32
    %c0_i32_1 = arith.constant 0 : i32
    return %arg0, %c0_i32, %c0_i32_0 : i32, i32, i32
  }
}

module attributes {stable_mosaic.version = 11 : i64} {
  func.func @_hproj_kernel(%arg0: i32, %arg1: memref<18x128xbf16, #tpu.memory_space<vmem>>, %arg2: memref<128x512xbf16, #tpu.memory_space<vmem>>, %arg3: memref<1x512xf32, #tpu.memory_space<vmem>>, %arg4: memref<18x128xbf16, #tpu.memory_space<vmem>>, %arg5: memref<18x128xbf16, #tpu.memory_space<vmem>>, %arg6: memref<18x128xbf16, #tpu.memory_space<vmem>>, %arg7: memref<18x128xbf16, #tpu.memory_space<vmem>>) attributes {dimension_semantics = [#tpu.dimension_semantics<parallel>], iteration_bounds = array<i64: 1>, scalar_prefetch = 0 : i64, scratch_operands = 0 : i64, tpu.core_type = #tpu.core_type<tc>, window_params = [{transform_indices = @transform_0, window_bounds = array<i64: 18, 128>}, {pipeline_mode = #tpu.pipeline_mode<synchronous>, transform_indices = @transform_1, window_bounds = array<i64: 128, 512>}, {pipeline_mode = #tpu.pipeline_mode<synchronous>, transform_indices = @transform_2, window_bounds = array<i64: 1, 512>}, {transform_indices = @transform_3, window_bounds = array<i64: 18, 128>}, {transform_indices = @transform_4, window_bounds = array<i64: 18, 128>}, {transform_indices = @transform_5, window_bounds = array<i64: 18, 128>}, {transform_indices = @transform_6, window_bounds = array<i64: 18, 128>}]} {
    %c0 = arith.constant 0 : index
    %c0_0 = arith.constant 0 : index
    %0 = vector.load %arg1[%c0, %c0_0] : memref<18x128xbf16, #tpu.memory_space<vmem>>, vector<18x128xbf16>
    %c0_1 = arith.constant 0 : index
    %c0_2 = arith.constant 0 : index
    %1 = vector.load %arg2[%c0_1, %c0_2] : memref<128x512xbf16, #tpu.memory_space<vmem>>, vector<128x512xbf16>
    %cst = arith.constant dense<0.000000e+00> : vector<18x512xf32>
    %2 = tpu.matmul %0, %1, %cst {dimension_numbers = #tpu.dot_dimension_numbers<[1], [0], [0], [1], [0, 0, 1, 1], [], []>} : vector<18x128xbf16>, vector<128x512xbf16>, vector<18x512xf32> -> vector<18x512xf32>
    %c0_3 = arith.constant 0 : index
    %c0_4 = arith.constant 0 : index
    %3 = vector.load %arg3[%c0_3, %c0_4] : memref<1x512xf32, #tpu.memory_space<vmem>>, vector<1x512xf32>
    %4 = vector.broadcast %3 : vector<1x512xf32> to vector<18x512xf32>
    %5 = arith.addf %2, %4 : vector<18x512xf32>
    %cst_5 = arith.constant 0.000000e+00 : f32
    %6 = vector.broadcast %cst_5 : f32 to vector<18x512xf32>
    %7 = arith.maximumf %5, %6 : vector<18x512xf32>
    %8 = vector.extract_strided_slice %7 {offsets = [0, 0], sizes = [18, 128], strides = [1, 1]} : vector<18x512xf32> to vector<18x128xf32>
    %9 = arith.truncf %8 : vector<18x128xf32> to vector<18x128xbf16>
    %c0_6 = arith.constant 0 : index
    %c0_7 = arith.constant 0 : index
    %10 = vector.load %arg4[%c0_6, %c0_7] : memref<18x128xbf16, #tpu.memory_space<vmem>>, vector<18x128xbf16>
    tpu.vector_store %arg4[%c0_6, %c0_7], %9 {strides = array<i32>} : memref<18x128xbf16, #tpu.memory_space<vmem>>, vector<18x128xbf16>,
    %11 = vector.extract_strided_slice %7 {offsets = [0, 128], sizes = [18, 128], strides = [1, 1]} : vector<18x512xf32> to vector<18x128xf32>
    %12 = arith.truncf %11 : vector<18x128xf32> to vector<18x128xbf16>
    %c0_8 = arith.constant 0 : index
    %c0_9 = arith.constant 0 : index
    %13 = vector.load %arg5[%c0_8, %c0_9] : memref<18x128xbf16, #tpu.memory_space<vmem>>, vector<18x128xbf16>
    tpu.vector_store %arg5[%c0_8, %c0_9], %12 {strides = array<i32>} : memref<18x128xbf16, #tpu.memory_space<vmem>>, vector<18x128xbf16>,
    %14 = vector.extract_strided_slice %7 {offsets = [0, 256], sizes = [18, 128], strides = [1, 1]} : vector<18x512xf32> to vector<18x128xf32>
    %15 = arith.truncf %14 : vector<18x128xf32> to vector<18x128xbf16>
    %c0_10 = arith.constant 0 : index
    %c0_11 = arith.constant 0 : index
    %16 = vector.load %arg6[%c0_10, %c0_11] : memref<18x128xbf16, #tpu.memory_space<vmem>>, vector<18x128xbf16>
    tpu.vector_store %arg6[%c0_10, %c0_11], %15 {strides = array<i32>} : memref<18x128xbf16, #tpu.memory_space<vmem>>, vector<18x128xbf16>,
    %17 = vector.extract_strided_slice %7 {offsets = [0, 384], sizes = [18, 128], strides = [1, 1]} : vector<18x512xf32> to vector<18x128xf32>
    %18 = arith.truncf %17 : vector<18x128xf32> to vector<18x128xbf16>
    %c0_12 = arith.constant 0 : index
    %c0_13 = arith.constant 0 : index
    %19 = vector.load %arg7[%c0_12, %c0_13] : memref<18x128xbf16, #tpu.memory_space<vmem>>, vector<18x128xbf16>
    tpu.vector_store %arg7[%c0_12, %c0_13], %18 {strides = array<i32>} : memref<18x128xbf16, #tpu.memory_space<vmem>>, vector<18x128xbf16>,
    return
  }
  func.func @transform_0(%arg0: i32) -> (i32, i32) {
    %c0_i32 = arith.constant 0 : i32
    %c0_i32_0 = arith.constant 0 : i32
    return %arg0, %c0_i32 : i32, i32
  }
  func.func @transform_1(%arg0: i32) -> (i32, i32) {
    %c0_i32 = arith.constant 0 : i32
    %c0_i32_0 = arith.constant 0 : i32
    %c0_i32_1 = arith.constant 0 : i32
    return %c0_i32, %c0_i32_0 : i32, i32
  }
  func.func @transform_2(%arg0: i32) -> (i32, i32) {
    %c0_i32 = arith.constant 0 : i32
    %c0_i32_0 = arith.constant 0 : i32
    %c0_i32_1 = arith.constant 0 : i32
    return %c0_i32, %c0_i32_0 : i32, i32
  }
  func.func @transform_3(%arg0: i32) -> (i32, i32) {
    %c0_i32 = arith.constant 0 : i32
    %c0_i32_0 = arith.constant 0 : i32
    return %arg0, %c0_i32 : i32, i32
  }
  func.func @transform_4(%arg0: i32) -> (i32, i32) {
    %c0_i32 = arith.constant 0 : i32
    %c0_i32_0 = arith.constant 0 : i32
    return %arg0, %c0_i32 : i32, i32
  }
  func.func @transform_5(%arg0: i32) -> (i32, i32) {
    %c0_i32 = arith.constant 0 : i32
    %c0_i32_0 = arith.constant 0 : i32
    return %arg0, %c0_i32 : i32, i32
  }
  func.func @transform_6(%arg0: i32) -> (i32, i32) {
    %c0_i32 = arith.constant 0 : i32
    %c0_i32_0 = arith.constant 0 : i32
    return %arg0, %c0_i32 : i32, i32
  }
}

module attributes {stable_mosaic.version = 11 : i64} {
  func.func @_unlabeled_ce_kernel(%arg0: i32, %arg1: memref<2x9x128xbf16, #tpu.memory_space<vmem>>, %arg2: memref<2x9x128xbf16, #tpu.memory_space<vmem>>, %arg3: memref<2x1x9xi32, #tpu.memory_space<vmem>>, %arg4: memref<2x9x1xi32, #tpu.memory_space<vmem>>, %arg5: memref<128x128xbf16, #tpu.memory_space<vmem>>, %arg6: memref<1x128xf32, #tpu.memory_space<vmem>>, %arg7: memref<1x128xf32, #tpu.memory_space<vmem>>, %arg8: memref<1x1xf32, #tpu.memory_space<vmem>>, %arg9: memref<1x1x8xf32, #tpu.memory_space<vmem>>) attributes {dimension_semantics = [#tpu.dimension_semantics<parallel>], iteration_bounds = array<i64: 1>, scalar_prefetch = 0 : i64, scratch_operands = 0 : i64, tpu.core_type = #tpu.core_type<tc>, window_params = [{transform_indices = @transform_0, window_bounds = array<i64: 2, 9, 128>}, {transform_indices = @transform_1, window_bounds = array<i64: 2, 9, 128>}, {transform_indices = @transform_2, window_bounds = array<i64: 2, 1, 9>}, {transform_indices = @transform_3, window_bounds = array<i64: 2, 9, 1>}, {pipeline_mode = #tpu.pipeline_mode<synchronous>, transform_indices = @transform_4, window_bounds = array<i64: 128, 128>}, {pipeline_mode = #tpu.pipeline_mode<synchronous>, transform_indices = @transform_5, window_bounds = array<i64: 1, 128>}, {pipeline_mode = #tpu.pipeline_mode<synchronous>, transform_indices = @transform_6, window_bounds = array<i64: 1, 128>}, {pipeline_mode = #tpu.pipeline_mode<synchronous>, transform_indices = @transform_7, window_bounds = array<i64: 1, 1>}, {transform_indices = @transform_8, window_bounds = array<i64: 1, 1, 8>}]} {
    %c2_i32 = arith.constant 2 : i32
    %0 = arith.muli %arg0, %c2_i32 : i32
    %c0 = arith.constant 0 : index
    %c0_0 = arith.constant 0 : index
    %1 = vector.load %arg5[%c0, %c0_0] : memref<128x128xbf16, #tpu.memory_space<vmem>>, vector<128x128xbf16>
    %c0_1 = arith.constant 0 : index
    %c0_2 = arith.constant 0 : index
    %2 = vector.load %arg6[%c0_1, %c0_2] : memref<1x128xf32, #tpu.memory_space<vmem>>, vector<1x128xf32>
    %c0_3 = arith.constant 0 : index
    %c0_4 = arith.constant 0 : index
    %3 = vector.load %arg7[%c0_3, %c0_4] : memref<1x128xf32, #tpu.memory_space<vmem>>, vector<1x128xf32>
    %c0_5 = arith.constant 0 : index
    %c0_6 = arith.constant 0 : index
    %4 = vector.load %arg8[%c0_5, %c0_6] : memref<1x1xf32, #tpu.memory_space<vmem>>, vector<1x1xf32>
    %cst = arith.constant 0.000000e+00 : f32
    %5 = vector.broadcast %cst : f32 to vector<1x1xf32>
    %cst_7 = arith.constant 0.000000e+00 : f32
    %6 = vector.broadcast %cst_7 : f32 to vector<1x1xf32>
    %c0_8 = arith.constant 0 : index
    %c0_9 = arith.constant 0 : index
    %c0_10 = arith.constant 0 : index
    %7 = vector.load %arg1[%c0_8, %c0_9, %c0_10] : memref<2x9x128xbf16, #tpu.memory_space<vmem>>, vector<1x9x128xbf16>
    %8 = vector.shape_cast %7 : vector<1x9x128xbf16> to vector<9x128xbf16>
    %c0_11 = arith.constant 0 : index
    %c0_12 = arith.constant 0 : index
    %c0_13 = arith.constant 0 : index
    %9 = vector.load %arg2[%c0_11, %c0_12, %c0_13] : memref<2x9x128xbf16, #tpu.memory_space<vmem>>, vector<1x9x128xbf16>
    %10 = vector.shape_cast %9 : vector<1x9x128xbf16> to vector<9x128xbf16>
    %cst_14 = arith.constant dense<0.000000e+00> : vector<9x128xf32>
    %11 = tpu.matmul %8, %1, %cst_14 {dimension_numbers = #tpu.dot_dimension_numbers<[1], [0], [0], [1], [0, 0, 1, 1], [], []>} : vector<9x128xbf16>, vector<128x128xbf16>, vector<9x128xf32> -> vector<9x128xf32>
    %12 = vector.broadcast %3 : vector<1x128xf32> to vector<9x128xf32>
    %13 = arith.addf %11, %12 : vector<9x128xf32>
    %14 = arith.truncf %13 : vector<9x128xf32> to vector<9x128xbf16>
    %cst_15 = arith.constant dense<0.000000e+00> : vector<9x9xf32>
    %15 = tpu.matmul %14, %10, %cst_15 {dimension_numbers = #tpu.dot_dimension_numbers<[1], [1], [0], [0], [0, 0, 1, 0], [], []>} : vector<9x128xbf16>, vector<9x128xbf16>, vector<9x9xf32> -> vector<9x9xf32>
    %16 = arith.extf %8 : vector<9x128xbf16> to vector<9x128xf32>
    %17 = vector.broadcast %2 : vector<1x128xf32> to vector<9x128xf32>
    %18 = arith.mulf %16, %17 : vector<9x128xf32>
    %cst_16 = arith.constant dense<0.000000e+00> : vector<9xf32>
    %19 = vector.multi_reduction <add>, %18, %cst_16 [1] : vector<9x128xf32> to vector<9xf32>
    %20 = vector.shape_cast %19 : vector<9xf32> to vector<9x1xf32>
    %21 = vector.broadcast %20 : vector<9x1xf32> to vector<9x9xf32>
    %22 = arith.addf %15, %21 : vector<9x9xf32>
    %23 = vector.broadcast %4 : vector<1x1xf32> to vector<9x9xf32>
    %24 = arith.addf %22, %23 : vector<9x9xf32>
    %25 = tpu.iota {dimensions = array<i32: 0>} : vector<9x9xi32>
    %26 = tpu.iota {dimensions = array<i32: 1>} : vector<9x9xi32>
    %27 = arith.cmpi eq, %25, %26 : vector<9x9xi32>
    %cst_17 = arith.constant -1.000000e+09 : f32
    %28 = vector.broadcast %cst_17 : f32 to vector<9x9xf32>
    %29 = arith.select %27, %28, %24 : vector<9x9xi1>, vector<9x9xf32>
    %c0_18 = arith.constant 0 : index
    %c0_19 = arith.constant 0 : index
    %c0_20 = arith.constant 0 : index
    %30 = vector.load %arg3[%c0_18, %c0_19, %c0_20] : memref<2x1x9xi32, #tpu.memory_space<vmem>>, vector<1x1x9xi32>
    %31 = vector.shape_cast %30 : vector<1x1x9xi32> to vector<1x9xi32>
    %c0_i32 = arith.constant 0 : i32
    %32 = vector.broadcast %c0_i32 : i32 to vector<1x9xi32>
    %33 = arith.cmpi ne, %31, %32 : vector<1x9xi32>
    %cst_21 = arith.constant -1.000000e+09 : f32
    %34 = vector.shape_cast %33 : vector<1x9xi1> to vector<1x9xi1>
    %35 = vector.broadcast %34 : vector<1x9xi1> to vector<9x9xi1>
    %36 = vector.broadcast %cst_21 : f32 to vector<9x9xf32>
    %37 = arith.select %35, %36, %29 : vector<9x9xi1>, vector<9x9xf32>
    %c0_22 = arith.constant 0 : index
    %c0_23 = arith.constant 0 : index
    %c0_24 = arith.constant 0 : index
    %38 = vector.load %arg4[%c0_22, %c0_23, %c0_24] : memref<2x9x1xi32, #tpu.memory_space<vmem>>, vector<1x9x1xi32>
    %39 = vector.shape_cast %38 : vector<1x9x1xi32> to vector<9x1xi32>
    %c0_i32_25 = arith.constant 0 : i32
    %40 = arith.addi %0, %c0_i32_25 : i32
    %c2_i32_26 = arith.constant 2 : i32
    %41 = arith.cmpi slt, %40, %c2_i32_26 : i32
    %42 = tpu.iota {dimensions = array<i32: 1>} : vector<9x9xi32>
    %c-100_i32 = arith.constant -100 : i32
    %43 = vector.broadcast %c-100_i32 : i32 to vector<9x1xi32>
    %44 = arith.cmpi ne, %39, %43 : vector<9x1xi32>
    %45 = vector.broadcast %41 : i1 to vector<9x1xi1>
    %46 = arith.andi %44, %45 : vector<9x1xi1>
    %cst_27 = arith.constant dense<0xFF800000> : vector<9xf32>
    %47 = vector.multi_reduction <maximumf>, %37, %cst_27 [1] : vector<9x9xf32> to vector<9xf32>
    %48 = vector.shape_cast %47 : vector<9xf32> to vector<9x1xf32>
    %49 = vector.broadcast %48 : vector<9x1xf32> to vector<9x9xf32>
    %50 = arith.subf %37, %49 : vector<9x9xf32>
    %51 = math.exp %50 : vector<9x9xf32>
    %cst_28 = arith.constant dense<0.000000e+00> : vector<9xf32>
    %52 = vector.multi_reduction <add>, %51, %cst_28 [1] : vector<9x9xf32> to vector<9xf32>
    %53 = vector.shape_cast %52 : vector<9xf32> to vector<9x1xf32>
    %54 = math.log %53 : vector<9x1xf32>
    %55 = arith.addf %54, %48 : vector<9x1xf32>
    %56 = vector.broadcast %39 : vector<9x1xi32> to vector<9x9xi32>
    %57 = arith.cmpi eq, %42, %56 : vector<9x9xi32>
    %cst_29 = arith.constant 0.000000e+00 : f32
    %58 = vector.broadcast %cst_29 : f32 to vector<9x9xf32>
    %59 = arith.select %57, %37, %58 : vector<9x9xi1>, vector<9x9xf32>
    %cst_30 = arith.constant dense<0.000000e+00> : vector<9xf32>
    %60 = vector.multi_reduction <add>, %59, %cst_30 [1] : vector<9x9xf32> to vector<9xf32>
    %61 = vector.shape_cast %60 : vector<9xf32> to vector<9x1xf32>
    %62 = arith.subf %55, %61 : vector<9x1xf32>
    %cst_31 = arith.constant 0.000000e+00 : f32
    %63 = vector.broadcast %cst_31 : f32 to vector<9x1xf32>
    %64 = arith.select %46, %62, %63 : vector<9x1xi1>, vector<9x1xf32>
    %cst_32 = arith.constant dense<0.000000e+00> : vector<1xf32>
    %65 = vector.multi_reduction <add>, %64, %cst_32 [0] : vector<9x1xf32> to vector<1xf32>
    %66 = vector.shape_cast %65 : vector<1xf32> to vector<1x1xf32>
    %67 = arith.extui %46 : vector<9x1xi1> to vector<9x1xi32>
    %68 = arith.sitofp %67 : vector<9x1xi32> to vector<9x1xf32>
    %cst_33 = arith.constant dense<0.000000e+00> : vector<1xf32>
    %69 = vector.multi_reduction <add>, %68, %cst_33 [0] : vector<9x1xf32> to vector<1xf32>
    %70 = vector.shape_cast %69 : vector<1xf32> to vector<1x1xf32>
    %71 = arith.addf %5, %66 : vector<1x1xf32>
    %72 = arith.addf %6, %70 : vector<1x1xf32>
    %c1 = arith.constant 1 : index
    %c0_34 = arith.constant 0 : index
    %c0_35 = arith.constant 0 : index
    %73 = vector.load %arg1[%c1, %c0_34, %c0_35] : memref<2x9x128xbf16, #tpu.memory_space<vmem>>, vector<1x9x128xbf16>
    %74 = vector.shape_cast %73 : vector<1x9x128xbf16> to vector<9x128xbf16>
    %c1_36 = arith.constant 1 : index
    %c0_37 = arith.constant 0 : index
    %c0_38 = arith.constant 0 : index
    %75 = vector.load %arg2[%c1_36, %c0_37, %c0_38] : memref<2x9x128xbf16, #tpu.memory_space<vmem>>, vector<1x9x128xbf16>
    %76 = vector.shape_cast %75 : vector<1x9x128xbf16> to vector<9x128xbf16>
    %cst_39 = arith.constant dense<0.000000e+00> : vector<9x128xf32>
    %77 = tpu.matmul %74, %1, %cst_39 {dimension_numbers = #tpu.dot_dimension_numbers<[1], [0], [0], [1], [0, 0, 1, 1], [], []>} : vector<9x128xbf16>, vector<128x128xbf16>, vector<9x128xf32> -> vector<9x128xf32>
    %78 = vector.broadcast %3 : vector<1x128xf32> to vector<9x128xf32>
    %79 = arith.addf %77, %78 : vector<9x128xf32>
    %80 = arith.truncf %79 : vector<9x128xf32> to vector<9x128xbf16>
    %cst_40 = arith.constant dense<0.000000e+00> : vector<9x9xf32>
    %81 = tpu.matmul %80, %76, %cst_40 {dimension_numbers = #tpu.dot_dimension_numbers<[1], [1], [0], [0], [0, 0, 1, 0], [], []>} : vector<9x128xbf16>, vector<9x128xbf16>, vector<9x9xf32> -> vector<9x9xf32>
    %82 = arith.extf %74 : vector<9x128xbf16> to vector<9x128xf32>
    %83 = vector.broadcast %2 : vector<1x128xf32> to vector<9x128xf32>
    %84 = arith.mulf %82, %83 : vector<9x128xf32>
    %cst_41 = arith.constant dense<0.000000e+00> : vector<9xf32>
    %85 = vector.multi_reduction <add>, %84, %cst_41 [1] : vector<9x128xf32> to vector<9xf32>
    %86 = vector.shape_cast %85 : vector<9xf32> to vector<9x1xf32>
    %87 = vector.broadcast %86 : vector<9x1xf32> to vector<9x9xf32>
    %88 = arith.addf %81, %87 : vector<9x9xf32>
    %89 = vector.broadcast %4 : vector<1x1xf32> to vector<9x9xf32>
    %90 = arith.addf %88, %89 : vector<9x9xf32>
    %91 = tpu.iota {dimensions = array<i32: 0>} : vector<9x9xi32>
    %92 = tpu.iota {dimensions = array<i32: 1>} : vector<9x9xi32>
    %93 = arith.cmpi eq, %91, %92 : vector<9x9xi32>
    %cst_42 = arith.constant -1.000000e+09 : f32
    %94 = vector.broadcast %cst_42 : f32 to vector<9x9xf32>
    %95 = arith.select %93, %94, %90 : vector<9x9xi1>, vector<9x9xf32>
    %c1_43 = arith.constant 1 : index
    %c0_44 = arith.constant 0 : index
    %c0_45 = arith.constant 0 : index
    %96 = vector.load %arg3[%c1_43, %c0_44, %c0_45] : memref<2x1x9xi32, #tpu.memory_space<vmem>>, vector<1x1x9xi32>
    %97 = vector.shape_cast %96 : vector<1x1x9xi32> to vector<1x9xi32>
    %c0_i32_46 = arith.constant 0 : i32
    %98 = vector.broadcast %c0_i32_46 : i32 to vector<1x9xi32>
    %99 = arith.cmpi ne, %97, %98 : vector<1x9xi32>
    %cst_47 = arith.constant -1.000000e+09 : f32
    %100 = vector.shape_cast %99 : vector<1x9xi1> to vector<1x9xi1>
    %101 = vector.broadcast %100 : vector<1x9xi1> to vector<9x9xi1>
    %102 = vector.broadcast %cst_47 : f32 to vector<9x9xf32>
    %103 = arith.select %101, %102, %95 : vector<9x9xi1>, vector<9x9xf32>
    %c1_48 = arith.constant 1 : index
    %c0_49 = arith.constant 0 : index
    %c0_50 = arith.constant 0 : index
    %104 = vector.load %arg4[%c1_48, %c0_49, %c0_50] : memref<2x9x1xi32, #tpu.memory_space<vmem>>, vector<1x9x1xi32>
    %105 = vector.shape_cast %104 : vector<1x9x1xi32> to vector<9x1xi32>
    %c1_i32 = arith.constant 1 : i32
    %106 = arith.addi %0, %c1_i32 : i32
    %c2_i32_51 = arith.constant 2 : i32
    %107 = arith.cmpi slt, %106, %c2_i32_51 : i32
    %108 = tpu.iota {dimensions = array<i32: 1>} : vector<9x9xi32>
    %c-100_i32_52 = arith.constant -100 : i32
    %109 = vector.broadcast %c-100_i32_52 : i32 to vector<9x1xi32>
    %110 = arith.cmpi ne, %105, %109 : vector<9x1xi32>
    %111 = vector.broadcast %107 : i1 to vector<9x1xi1>
    %112 = arith.andi %110, %111 : vector<9x1xi1>
    %cst_53 = arith.constant dense<0xFF800000> : vector<9xf32>
    %113 = vector.multi_reduction <maximumf>, %103, %cst_53 [1] : vector<9x9xf32> to vector<9xf32>
    %114 = vector.shape_cast %113 : vector<9xf32> to vector<9x1xf32>
    %115 = vector.broadcast %114 : vector<9x1xf32> to vector<9x9xf32>
    %116 = arith.subf %103, %115 : vector<9x9xf32>
    %117 = math.exp %116 : vector<9x9xf32>
    %cst_54 = arith.constant dense<0.000000e+00> : vector<9xf32>
    %118 = vector.multi_reduction <add>, %117, %cst_54 [1] : vector<9x9xf32> to vector<9xf32>
    %119 = vector.shape_cast %118 : vector<9xf32> to vector<9x1xf32>
    %120 = math.log %119 : vector<9x1xf32>
    %121 = arith.addf %120, %114 : vector<9x1xf32>
    %122 = vector.broadcast %105 : vector<9x1xi32> to vector<9x9xi32>
    %123 = arith.cmpi eq, %108, %122 : vector<9x9xi32>
    %cst_55 = arith.constant 0.000000e+00 : f32
    %124 = vector.broadcast %cst_55 : f32 to vector<9x9xf32>
    %125 = arith.select %123, %103, %124 : vector<9x9xi1>, vector<9x9xf32>
    %cst_56 = arith.constant dense<0.000000e+00> : vector<9xf32>
    %126 = vector.multi_reduction <add>, %125, %cst_56 [1] : vector<9x9xf32> to vector<9xf32>
    %127 = vector.shape_cast %126 : vector<9xf32> to vector<9x1xf32>
    %128 = arith.subf %121, %127 : vector<9x1xf32>
    %cst_57 = arith.constant 0.000000e+00 : f32
    %129 = vector.broadcast %cst_57 : f32 to vector<9x1xf32>
    %130 = arith.select %112, %128, %129 : vector<9x1xi1>, vector<9x1xf32>
    %cst_58 = arith.constant dense<0.000000e+00> : vector<1xf32>
    %131 = vector.multi_reduction <add>, %130, %cst_58 [0] : vector<9x1xf32> to vector<1xf32>
    %132 = vector.shape_cast %131 : vector<1xf32> to vector<1x1xf32>
    %133 = arith.extui %112 : vector<9x1xi1> to vector<9x1xi32>
    %134 = arith.sitofp %133 : vector<9x1xi32> to vector<9x1xf32>
    %cst_59 = arith.constant dense<0.000000e+00> : vector<1xf32>
    %135 = vector.multi_reduction <add>, %134, %cst_59 [0] : vector<9x1xf32> to vector<1xf32>
    %136 = vector.shape_cast %135 : vector<1xf32> to vector<1x1xf32>
    %137 = arith.addf %71, %132 : vector<1x1xf32>
    %138 = arith.addf %72, %136 : vector<1x1xf32>
    %139 = tpu.iota {dimensions = array<i32: 1>} : vector<1x8xi32>
    %cst_60 = arith.constant 0.000000e+00 : f32
    %140 = vector.broadcast %cst_60 : f32 to vector<1x8xf32>
    %c0_i32_61 = arith.constant 0 : i32
    %141 = vector.broadcast %c0_i32_61 : i32 to vector<1x8xi32>
    %142 = arith.cmpi eq, %139, %141 : vector<1x8xi32>
    %cst_62 = arith.constant 0.000000e+00 : f32
    %143 = vector.shape_cast %137 : vector<1x1xf32> to vector<1x1xf32>
    %144 = vector.broadcast %143 : vector<1x1xf32> to vector<1x8xf32>
    %145 = vector.broadcast %cst_62 : f32 to vector<1x8xf32>
    %146 = arith.select %142, %144, %145 : vector<1x8xi1>, vector<1x8xf32>
    %147 = arith.addf %140, %146 : vector<1x8xf32>
    %c1_i32_63 = arith.constant 1 : i32
    %148 = vector.broadcast %c1_i32_63 : i32 to vector<1x8xi32>
    %149 = arith.cmpi eq, %139, %148 : vector<1x8xi32>
    %cst_64 = arith.constant 0.000000e+00 : f32
    %150 = vector.shape_cast %138 : vector<1x1xf32> to vector<1x1xf32>
    %151 = vector.broadcast %150 : vector<1x1xf32> to vector<1x8xf32>
    %152 = vector.broadcast %cst_64 : f32 to vector<1x8xf32>
    %153 = arith.select %149, %151, %152 : vector<1x8xi1>, vector<1x8xf32>
    %154 = arith.addf %147, %153 : vector<1x8xf32>
    %c0_65 = arith.constant 0 : index
    %c0_66 = arith.constant 0 : index
    %c0_67 = arith.constant 0 : index
    %155 = vector.load %arg9[%c0_65, %c0_66, %c0_67] : memref<1x1x8xf32, #tpu.memory_space<vmem>>, vector<1x1x8xf32>
    %156 = vector.shape_cast %155 : vector<1x1x8xf32> to vector<1x8xf32>
    %157 = vector.shape_cast %154 : vector<1x8xf32> to vector<1x1x8xf32>
    tpu.vector_store %arg9[%c0_65, %c0_66, %c0_67], %157 {strides = array<i32>} : memref<1x1x8xf32, #tpu.memory_space<vmem>>, vector<1x1x8xf32>,
    return
  }
  func.func @transform_0(%arg0: i32) -> (i32, i32, i32) {
    %c0_i32 = arith.constant 0 : i32
    %c0_i32_0 = arith.constant 0 : i32
    %c0_i32_1 = arith.constant 0 : i32
    return %arg0, %c0_i32, %c0_i32_0 : i32, i32, i32
  }
  func.func @transform_1(%arg0: i32) -> (i32, i32, i32) {
    %c0_i32 = arith.constant 0 : i32
    %c0_i32_0 = arith.constant 0 : i32
    %c0_i32_1 = arith.constant 0 : i32
    return %arg0, %c0_i32, %c0_i32_0 : i32, i32, i32
  }
  func.func @transform_2(%arg0: i32) -> (i32, i32, i32) {
    %c0_i32 = arith.constant 0 : i32
    %c0_i32_0 = arith.constant 0 : i32
    %c0_i32_1 = arith.constant 0 : i32
    return %arg0, %c0_i32, %c0_i32_0 : i32, i32, i32
  }
  func.func @transform_3(%arg0: i32) -> (i32, i32, i32) {
    %c0_i32 = arith.constant 0 : i32
    %c0_i32_0 = arith.constant 0 : i32
    %c0_i32_1 = arith.constant 0 : i32
    return %arg0, %c0_i32, %c0_i32_0 : i32, i32, i32
  }
  func.func @transform_4(%arg0: i32) -> (i32, i32) {
    %c0_i32 = arith.constant 0 : i32
    %c0_i32_0 = arith.constant 0 : i32
    %c0_i32_1 = arith.constant 0 : i32
    return %c0_i32, %c0_i32_0 : i32, i32
  }
  func.func @transform_5(%arg0: i32) -> (i32, i32) {
    %c0_i32 = arith.constant 0 : i32
    %c0_i32_0 = arith.constant 0 : i32
    %c0_i32_1 = arith.constant 0 : i32
    return %c0_i32, %c0_i32_0 : i32, i32
  }
  func.func @transform_6(%arg0: i32) -> (i32, i32) {
    %c0_i32 = arith.constant 0 : i32
    %c0_i32_0 = arith.constant 0 : i32
    %c0_i32_1 = arith.constant 0 : i32
    return %c0_i32, %c0_i32_0 : i32, i32
  }
  func.func @transform_7(%arg0: i32) -> (i32, i32) {
    %c0_i32 = arith.constant 0 : i32
    %c0_i32_0 = arith.constant 0 : i32
    %c0_i32_1 = arith.constant 0 : i32
    return %c0_i32, %c0_i32_0 : i32, i32
  }
  func.func @transform_8(%arg0: i32) -> (i32, i32, i32) {
    %c0_i32 = arith.constant 0 : i32
    %c0_i32_0 = arith.constant 0 : i32
    %c0_i32_1 = arith.constant 0 : i32
    return %arg0, %c0_i32, %c0_i32_0 : i32, i32, i32
  }
}

module attributes {stable_mosaic.version = 11 : i64} {
  func.func @_deprel_ce_kernel(%arg0: i32, %arg1: memref<16x128xbf16, #tpu.memory_space<vmem>>, %arg2: memref<16x128xbf16, #tpu.memory_space<vmem>>, %arg3: memref<16x1xi32, #tpu.memory_space<vmem>>, %arg4: memref<128x1024xbf16, #tpu.memory_space<vmem>>, %arg5: memref<1024x128xbf16, #tpu.memory_space<vmem>>, %arg6: memref<128x128xbf16, #tpu.memory_space<vmem>>, %arg7: memref<128x128xbf16, #tpu.memory_space<vmem>>, %arg8: memref<1x128xf32, #tpu.memory_space<vmem>>, %arg9: memref<1x1x8xf32, #tpu.memory_space<vmem>>) attributes {dimension_semantics = [#tpu.dimension_semantics<parallel>], iteration_bounds = array<i64: 1>, scalar_prefetch = 0 : i64, scratch_operands = 0 : i64, tpu.core_type = #tpu.core_type<tc>, window_params = [{transform_indices = @transform_0, window_bounds = array<i64: 16, 128>}, {transform_indices = @transform_1, window_bounds = array<i64: 16, 128>}, {transform_indices = @transform_2, window_bounds = array<i64: 16, 1>}, {pipeline_mode = #tpu.pipeline_mode<synchronous>, transform_indices = @transform_3, window_bounds = array<i64: 128, 1024>}, {pipeline_mode = #tpu.pipeline_mode<synchronous>, transform_indices = @transform_4, window_bounds = array<i64: 1024, 128>}, {pipeline_mode = #tpu.pipeline_mode<synchronous>, transform_indices = @transform_5, window_bounds = array<i64: 128, 128>}, {pipeline_mode = #tpu.pipeline_mode<synchronous>, transform_indices = @transform_6, window_bounds = array<i64: 128, 128>}, {pipeline_mode = #tpu.pipeline_mode<synchronous>, transform_indices = @transform_7, window_bounds = array<i64: 1, 128>}, {transform_indices = @transform_8, window_bounds = array<i64: 1, 1, 8>}]} {
    %c0 = arith.constant 0 : index
    %c0_0 = arith.constant 0 : index
    %0 = vector.load %arg1[%c0, %c0_0] : memref<16x128xbf16, #tpu.memory_space<vmem>>, vector<16x128xbf16>
    %c0_1 = arith.constant 0 : index
    %c0_2 = arith.constant 0 : index
    %1 = vector.load %arg2[%c0_1, %c0_2] : memref<16x128xbf16, #tpu.memory_space<vmem>>, vector<16x128xbf16>
    %c0_3 = arith.constant 0 : index
    %c0_4 = arith.constant 0 : index
    %2 = vector.load %arg4[%c0_3, %c0_4] : memref<128x1024xbf16, #tpu.memory_space<vmem>>, vector<128x1024xbf16>
    %cst = arith.constant dense<0.000000e+00> : vector<16x1024xf32>
    %3 = tpu.matmul %0, %2, %cst {dimension_numbers = #tpu.dot_dimension_numbers<[1], [0], [0], [1], [0, 0, 1, 1], [], []>} : vector<16x128xbf16>, vector<128x1024xbf16>, vector<16x1024xf32> -> vector<16x1024xf32>
    %4 = arith.extf %1 : vector<16x128xbf16> to vector<16x128xf32>
    %5 = tpu.concatenate %4, %4, %4, %4, %4, %4, %4, %4 in 1 : vector<16x128xf32>, vector<16x128xf32>, vector<16x128xf32>, vector<16x128xf32>, vector<16x128xf32>, vector<16x128xf32>, vector<16x128xf32>, vector<16x128xf32> -> vector<16x1024xf32>
    %6 = arith.mulf %3, %5 : vector<16x1024xf32>
    %7 = arith.truncf %6 : vector<16x1024xf32> to vector<16x1024xbf16>
    %c0_5 = arith.constant 0 : index
    %c0_6 = arith.constant 0 : index
    %8 = vector.load %arg5[%c0_5, %c0_6] : memref<1024x128xbf16, #tpu.memory_space<vmem>>, vector<1024x128xbf16>
    %cst_7 = arith.constant dense<0.000000e+00> : vector<16x128xf32>
    %9 = tpu.matmul %7, %8, %cst_7 {dimension_numbers = #tpu.dot_dimension_numbers<[1], [0], [0], [1], [0, 0, 1, 1], [], []>} : vector<16x1024xbf16>, vector<1024x128xbf16>, vector<16x128xf32> -> vector<16x128xf32>
    %c0_8 = arith.constant 0 : index
    %c0_9 = arith.constant 0 : index
    %10 = vector.load %arg6[%c0_8, %c0_9] : memref<128x128xbf16, #tpu.memory_space<vmem>>, vector<128x128xbf16>
    %cst_10 = arith.constant dense<0.000000e+00> : vector<16x128xf32>
    %11 = tpu.matmul %0, %10, %cst_10 {dimension_numbers = #tpu.dot_dimension_numbers<[1], [0], [0], [1], [0, 0, 1, 1], [], []>} : vector<16x128xbf16>, vector<128x128xbf16>, vector<16x128xf32> -> vector<16x128xf32>
    %c0_11 = arith.constant 0 : index
    %c0_12 = arith.constant 0 : index
    %12 = vector.load %arg7[%c0_11, %c0_12] : memref<128x128xbf16, #tpu.memory_space<vmem>>, vector<128x128xbf16>
    %cst_13 = arith.constant dense<0.000000e+00> : vector<16x128xf32>
    %13 = tpu.matmul %1, %12, %cst_13 {dimension_numbers = #tpu.dot_dimension_numbers<[1], [0], [0], [1], [0, 0, 1, 1], [], []>} : vector<16x128xbf16>, vector<128x128xbf16>, vector<16x128xf32> -> vector<16x128xf32>
    %14 = arith.addf %11, %13 : vector<16x128xf32>
    %c0_14 = arith.constant 0 : index
    %c0_15 = arith.constant 0 : index
    %15 = vector.load %arg8[%c0_14, %c0_15] : memref<1x128xf32, #tpu.memory_space<vmem>>, vector<1x128xf32>
    %16 = vector.broadcast %15 : vector<1x128xf32> to vector<16x128xf32>
    %17 = arith.addf %14, %16 : vector<16x128xf32>
    %18 = arith.addf %9, %17 : vector<16x128xf32>
    %19 = tpu.iota {dimensions = array<i32: 0>} : vector<16x1xi32>
    %c16_i32 = arith.constant 16 : i32
    %20 = arith.muli %arg0, %c16_i32 : i32
    %21 = vector.broadcast %20 : i32 to vector<16x1xi32>
    %22 = arith.addi %19, %21 : vector<16x1xi32>
    %c0_16 = arith.constant 0 : index
    %c0_17 = arith.constant 0 : index
    %23 = vector.load %arg3[%c0_16, %c0_17] : memref<16x1xi32, #tpu.memory_space<vmem>>, vector<16x1xi32>
    %c16_i32_18 = arith.constant 16 : i32
    %24 = vector.broadcast %c16_i32_18 : i32 to vector<16x1xi32>
    %25 = arith.cmpi slt, %22, %24 : vector<16x1xi32>
    %26 = tpu.iota {dimensions = array<i32: 1>} : vector<16x128xi32>
    %c8_i32 = arith.constant 8 : i32
    %27 = vector.broadcast %c8_i32 : i32 to vector<16x128xi32>
    %28 = arith.cmpi slt, %26, %27 : vector<16x128xi32>
    %cst_19 = arith.constant -1.000000e+09 : f32
    %29 = vector.broadcast %cst_19 : f32 to vector<16x128xf32>
    %30 = arith.select %28, %18, %29 : vector<16x128xi1>, vector<16x128xf32>
    %c-100_i32 = arith.constant -100 : i32
    %31 = vector.broadcast %c-100_i32 : i32 to vector<16x1xi32>
    %32 = arith.cmpi ne, %23, %31 : vector<16x1xi32>
    %33 = arith.andi %32, %25 : vector<16x1xi1>
    %cst_20 = arith.constant dense<0xFF800000> : vector<16xf32>
    %34 = vector.multi_reduction <maximumf>, %30, %cst_20 [1] : vector<16x128xf32> to vector<16xf32>
    %35 = vector.shape_cast %34 : vector<16xf32> to vector<16x1xf32>
    %36 = vector.broadcast %35 : vector<16x1xf32> to vector<16x128xf32>
    %37 = arith.subf %30, %36 : vector<16x128xf32>
    %38 = math.exp %37 : vector<16x128xf32>
    %cst_21 = arith.constant dense<0.000000e+00> : vector<16xf32>
    %39 = vector.multi_reduction <add>, %38, %cst_21 [1] : vector<16x128xf32> to vector<16xf32>
    %40 = vector.shape_cast %39 : vector<16xf32> to vector<16x1xf32>
    %41 = math.log %40 : vector<16x1xf32>
    %42 = arith.addf %41, %35 : vector<16x1xf32>
    %43 = vector.broadcast %23 : vector<16x1xi32> to vector<16x128xi32>
    %44 = arith.cmpi eq, %26, %43 : vector<16x128xi32>
    %cst_22 = arith.constant 0.000000e+00 : f32
    %45 = vector.broadcast %cst_22 : f32 to vector<16x128xf32>
    %46 = arith.select %44, %30, %45 : vector<16x128xi1>, vector<16x128xf32>
    %cst_23 = arith.constant dense<0.000000e+00> : vector<16xf32>
    %47 = vector.multi_reduction <add>, %46, %cst_23 [1] : vector<16x128xf32> to vector<16xf32>
    %48 = vector.shape_cast %47 : vector<16xf32> to vector<16x1xf32>
    %49 = arith.subf %42, %48 : vector<16x1xf32>
    %cst_24 = arith.constant 0.000000e+00 : f32
    %50 = vector.broadcast %cst_24 : f32 to vector<16x1xf32>
    %51 = arith.select %33, %49, %50 : vector<16x1xi1>, vector<16x1xf32>
    %cst_25 = arith.constant dense<0.000000e+00> : vector<1xf32>
    %52 = vector.multi_reduction <add>, %51, %cst_25 [0] : vector<16x1xf32> to vector<1xf32>
    %53 = vector.shape_cast %52 : vector<1xf32> to vector<1x1xf32>
    %54 = arith.extui %33 : vector<16x1xi1> to vector<16x1xi32>
    %55 = arith.sitofp %54 : vector<16x1xi32> to vector<16x1xf32>
    %cst_26 = arith.constant dense<0.000000e+00> : vector<1xf32>
    %56 = vector.multi_reduction <add>, %55, %cst_26 [0] : vector<16x1xf32> to vector<1xf32>
    %57 = vector.shape_cast %56 : vector<1xf32> to vector<1x1xf32>
    %58 = tpu.iota {dimensions = array<i32: 1>} : vector<1x8xi32>
    %cst_27 = arith.constant 0.000000e+00 : f32
    %59 = vector.broadcast %cst_27 : f32 to vector<1x8xf32>
    %c0_i32 = arith.constant 0 : i32
    %60 = vector.broadcast %c0_i32 : i32 to vector<1x8xi32>
    %61 = arith.cmpi eq, %58, %60 : vector<1x8xi32>
    %cst_28 = arith.constant 0.000000e+00 : f32
    %62 = vector.shape_cast %53 : vector<1x1xf32> to vector<1x1xf32>
    %63 = vector.broadcast %62 : vector<1x1xf32> to vector<1x8xf32>
    %64 = vector.broadcast %cst_28 : f32 to vector<1x8xf32>
    %65 = arith.select %61, %63, %64 : vector<1x8xi1>, vector<1x8xf32>
    %66 = arith.addf %59, %65 : vector<1x8xf32>
    %c1_i32 = arith.constant 1 : i32
    %67 = vector.broadcast %c1_i32 : i32 to vector<1x8xi32>
    %68 = arith.cmpi eq, %58, %67 : vector<1x8xi32>
    %cst_29 = arith.constant 0.000000e+00 : f32
    %69 = vector.shape_cast %57 : vector<1x1xf32> to vector<1x1xf32>
    %70 = vector.broadcast %69 : vector<1x1xf32> to vector<1x8xf32>
    %71 = vector.broadcast %cst_29 : f32 to vector<1x8xf32>
    %72 = arith.select %68, %70, %71 : vector<1x8xi1>, vector<1x8xf32>
    %73 = arith.addf %66, %72 : vector<1x8xf32>
    %c0_30 = arith.constant 0 : index
    %c0_31 = arith.constant 0 : index
    %c0_32 = arith.constant 0 : index
    %74 = vector.load %arg9[%c0_30, %c0_31, %c0_32] : memref<1x1x8xf32, #tpu.memory_space<vmem>>, vector<1x1x8xf32>
    %75 = vector.shape_cast %74 : vector<1x1x8xf32> to vector<1x8xf32>
    %76 = vector.shape_cast %73 : vector<1x8xf32> to vector<1x1x8xf32>
    tpu.vector_store %arg9[%c0_30, %c0_31, %c0_32], %76 {strides = array<i32>} : memref<1x1x8xf32, #tpu.memory_space<vmem>>, vector<1x1x8xf32>,
    return
  }
  func.func @transform_0(%arg0: i32) -> (i32, i32) {
    %c0_i32 = arith.constant 0 : i32
    %c0_i32_0 = arith.constant 0 : i32
    return %arg0, %c0_i32 : i32, i32
  }
  func.func @transform_1(%arg0: i32) -> (i32, i32) {
    %c0_i32 = arith.constant 0 : i32
    %c0_i32_0 = arith.constant 0 : i32
    return %arg0, %c0_i32 : i32, i32
  }
  func.func @transform_2(%arg0: i32) -> (i32, i32) {
    %c0_i32 = arith.constant 0 : i32
    %c0_i32_0 = arith.constant 0 : i32
    return %arg0, %c0_i32 : i32, i32
  }
  func.func @transform_3(%arg0: i32) -> (i32, i32) {
    %c0_i32 = arith.constant 0 : i32
    %c0_i32_0 = arith.constant 0 : i32
    %c0_i32_1 = arith.constant 0 : i32
    return %c0_i32, %c0_i32_0 : i32, i32
  }
  func.func @transform_4(%arg0: i32) -> (i32, i32) {
    %c0_i32 = arith.constant 0 : i32
    %c0_i32_0 = arith.constant 0 : i32
    %c0_i32_1 = arith.constant 0 : i32
    return %c0_i32, %c0_i32_0 : i32, i32
  }
  func.func @transform_5(%arg0: i32) -> (i32, i32) {
    %c0_i32 = arith.constant 0 : i32
    %c0_i32_0 = arith.constant 0 : i32
    %c0_i32_1 = arith.constant 0 : i32
    return %c0_i32, %c0_i32_0 : i32, i32
  }
  func.func @transform_6(%arg0: i32) -> (i32, i32) {
    %c0_i32 = arith.constant 0 : i32
    %c0_i32_0 = arith.constant 0 : i32
    %c0_i32_1 = arith.constant 0 : i32
    return %c0_i32, %c0_i32_0 : i32, i32
  }
  func.func @transform_7(%arg0: i32) -> (i32, i32) {
    %c0_i32 = arith.constant 0 : i32
    %c0_i32_0 = arith.constant 0 : i32
    %c0_i32_1 = arith.constant 0 : i32
    return %c0_i32, %c0_i32_0 : i32, i32
  }
  func.func @transform_8(%arg0: i32) -> (i32, i32, i32) {
    %c0_i32 = arith.constant 0 : i32
    %c0_i32_0 = arith.constant 0 : i32
    %c0_i32_1 = arith.constant 0 : i32
    return %arg0, %c0_i32, %c0_i32_0 : i32, i32, i32
  }
}

</mosaic_0001>

<bundles_post_ra>
// kernel: posdep_forward.6
= control target key start
LH: loop header
LB: loop body
LE: loop exit
PB: predicated region body
PF: predicated region fallthrough
CT: control target
= control target key end

     0   :  { %v134_v0 = vmov 0.0   ;;  %vm135_vm0 = vmmov 0   ;;  %vm55_vm1 = vcmask 523264   ;;  %s177_s1 = inlined_call_operand.vmem [shape: bf16[64,128], index: 1, kind: input, shape index: {}]   ;;  %s178_s0 = inlined_call_operand.vmem [shape: bf16[2,64], index: 0, kind: input, shape index: {}]   ;;  %s179_s2 = inlined_call_operand.vmem [shape: f32[1,128], index: 2, kind: input, shape index: {}]   ;;  %s180_s3 = inlined_call_operand.vmem [shape: bf16[2,128], index: 3, kind: output, shape index: {}]  }
   0x1   :  { %116 = vmatprep.subr.bf16.mxu0 %v134_v0  ;;  %v130_v1 = vld [vmem:[%s177_s1] sm:$0xff]   ;;  %124 = vmatprep.mubr.msk.bf16.mxu0 %vm135_vm0, %v134_v0  ;;  %v131_v2 = vld [vmem:[%s177_s1 + $0x8] sm:$0xff]   ;;  %v132_v3 = vld [vmem:[%s177_s1 + $0x10] sm:$0xff]  }
   0x2   :  { %117 = vmatpush3.bf16.msra.mxu0 %v130_v1  ;;  %v133_v4 = vld [vmem:[%s177_s1 + $0x18] sm:$0xff]   ;;  %v15_v5 = vld [vmem:[%s178_s0] sm:$0x1] }
   0x3   :  { %118 = vmatprep.subr.bf16.mxu0 %v134_v0  ;;  %v105_v6 = vld [vmem:[%s179_s2] ss:$0 sm:$0xff] }
   0x6   :  { %119 = vmatpush3.bf16.msra.mxu0 %v131_v2 }
   0x7   :  { %120 = vmatprep.subr.bf16.mxu0 %v134_v0 }
   0xa   :  { %121 = vmatpush3.bf16.msra.mxu0 %v132_v3 }
   0xb   :  { %122 = vmatprep.subr.bf16.mxu0 %v134_v0 }
   0xe   :  { %123 = vmatpush3.bf16.msra.mxu0 %v133_v4 }
  0x11   :  { %125 = vmatmul.mubr.msk.bf16.vlgmr.msra.gmra.mrb[0].mxu0 %vm55_vm1, %v15_v5 }
  0xe4   :  { %v93_v7 = vpop.f32.mrb[0].mxu0 }
  0xe5   :  { %v94_v8 = vadd.f32 %v105_v6, %v93_v7  ;;  %v126_v9 = vpop.f32.mrb[1].mxu0 }
  0xe6   :  { %v96_v10 = vpop.f32.mrb[2].mxu0 }
  0xe7   :  { %v99_v11 = vpack.c.bf16 %v94_v8, %v94_v8  ;;  %v127_v12 = vpop.f32.mrb[3].mxu0 }
  0xe9   :  { %100 = vst [vmem:[%s180_s3] sm:$0x1] %v99_v11 }

// kernel: posdep_forward.7
= control target key start
LH: loop header
LB: loop body
LE: loop exit
PB: predicated region body
PF: predicated region fallthrough
CT: control target
= control target key end

     0   :  { %v569_v1 = vmov 0   ;;  %v56_v35 = vlaneseq  ;;  %s738_s1 = inlined_call_operand.vmem [shape: bf16[128,512], index: 1, kind: input, shape index: {}]   ;;  %s739_s0 = inlined_call_operand.vmem [shape: bf16[18,128], index: 0, kind: input, shape index: {}]   ;;  %s740_s2 = inlined_call_operand.vmem [shape: f32[1,512], index: 2, kind: input, shape index: {}]   ;;  %s741_s3 = inlined_call_operand.vmem [shape: bf16[18,128], index: 3, kind: output, shape index: {0}]   ;;  %s742_s5 = inlined_call_operand.vmem [shape: bf16[18,128], index: 5, kind: output, shape index: {2}]   ;;  %s743_s4 = inlined_call_operand.vmem [shape: bf16[18,128], index: 4, kind: output, shape index: {1}]   ;;  %s744_s6 = inlined_call_operand.vmem [shape: bf16[18,128], index: 6, kind: output, shape index: {3}]  }
   0x1   :  { %v519_v0 = vld [vmem:[%s738_s1 + $0x4] ss:$16 sps:$4 sm:$0xff]   ;;  %278 = vmatprep.mubr.bf16.mxu0 %v569_v1  ;;  %329 = vmatprep.mubr.bf16.mxu1 %v569_v1  ;;  %v521_v2 = vld [vmem:[%s738_s1 + $0xc] ss:$16 sps:$4 sm:$0xff]   ;;  %v523_v3 = vld [vmem:[%s738_s1] ss:$16 sps:$4 sm:$0xff]  }
   0x2   :  { %246 = vmatprep.subr.bf16.mxu0 %v519_v0  ;;  %v524_v4 = vld [vmem:[%s738_s1 + $0x8] ss:$16 sps:$4 sm:$0xff]   ;;  %297 = vmatprep.subr.bf16.mxu1 %v521_v2  ;;  %v525_v5 = vld [vmem:[%s738_s1 + $0x24] ss:$16 sps:$4 sm:$0xff]   ;;  %v527_v6 = vld [vmem:[%s738_s1 + $0x2c] ss:$16 sps:$4 sm:$0xff]  }
   0x3   :  { %247 = vmatpush1.bf16.msra.mxu0 %v523_v3  ;;  %298 = vmatpush1.bf16.msra.mxu1 %v524_v4  ;;  %v529_v7 = vld [vmem:[%s738_s1 + $0x20] ss:$16 sps:$4 sm:$0xff]   ;;  %v530_v8 = vld [vmem:[%s738_s1 + $0x28] ss:$16 sps:$4 sm:$0xff]   ;;  %v531_v9 = vld [vmem:[%s738_s1 + $0x44] ss:$16 sps:$4 sm:$0xff]  }
   0x4   :  { %248 = vmatprep.subr.bf16.mxu0 %v525_v5  ;;  %299 = vmatprep.subr.bf16.mxu1 %v527_v6  ;;  %v533_v10 = vld [vmem:[%s738_s1 + $0x4c] ss:$16 sps:$4 sm:$0xff]   ;;  %v535_v11 = vld [vmem:[%s738_s1 + $0x40] ss:$16 sps:$4 sm:$0xff]   ;;  %v536_v12 = vld [vmem:[%s738_s1 + $0x48] ss:$16 sps:$4 sm:$0xff]  }
   0x5   :  { %v537_v13 = vld [vmem:[%s738_s1 + $0x64] ss:$16 sps:$4 sm:$0xff]   ;;  %v539_v14 = vld [vmem:[%s738_s1 + $0x6c] ss:$16 sps:$4 sm:$0xff]   ;;  %v541_v15 = vld [vmem:[%s738_s1 + $0x60] ss:$16 sps:$4 sm:$0xff]  }
   0x6   :  { %v542_v16 = vld [vmem:[%s738_s1 + $0x68] ss:$16 sps:$4 sm:$0xff]   ;;  %v543_v17 = vld [vmem:[%s738_s1 + $0x84] ss:$16 sps:$4 sm:$0xff]   ;;  %v545_v18 = vld [vmem:[%s738_s1 + $0x8c] ss:$16 sps:$4 sm:$0xff]  }
   0x7   :  { %249 = vmatpush1.bf16.msra.mxu0 %v529_v7  ;;  %300 = vmatpush1.bf16.msra.mxu1 %v530_v8  ;;  %v547_v19 = vld [vmem:[%s738_s1 + $0x80] ss:$16 sps:$4 sm:$0xff]   ;;  %v548_v20 = vld [vmem:[%s738_s1 + $0x88] ss:$16 sps:$4 sm:$0xff]   ;;  %v549_v21 = vld [vmem:[%s738_s1 + $0xa4] ss:$16 sps:$4 sm:$0xff]  }
   0x8   :  { %250 = vmatprep.subr.bf16.mxu0 %v531_v9  ;;  %301 = vmatprep.subr.bf16.mxu1 %v533_v10  ;;  %v551_v22 = vld [vmem:[%s738_s1 + $0xac] ss:$16 sps:$4 sm:$0xff]   ;;  %v553_v23 = vld [vmem:[%s738_s1 + $0xa0] ss:$16 sps:$4 sm:$0xff]   ;;  %v554_v24 = vld [vmem:[%s738_s1 + $0xa8] ss:$16 sps:$4 sm:$0xff]  }
   0x9   :  { %v555_v25 = vld [vmem:[%s738_s1 + $0xc4] ss:$16 sps:$4 sm:$0xff]   ;;  %v557_v26 = vld [vmem:[%s738_s1 + $0xcc] ss:$16 sps:$4 sm:$0xff]   ;;  %v559_v27 = vld [vmem:[%s738_s1 + $0xc0] ss:$16 sps:$4 sm:$0xff]  }
   0xa   :  { %v560_v28 = vld [vmem:[%s738_s1 + $0xc8] ss:$16 sps:$4 sm:$0xff]   ;;  %v561_v29 = vld [vmem:[%s738_s1 + $0xe4] ss:$16 sps:$4 sm:$0xff]   ;;  %v563_v30 = vld [vmem:[%s738_s1 + $0xec] ss:$16 sps:$4 sm:$0xff]  }
   0xb   :  { %251 = vmatpush1.bf16.msra.mxu0 %v535_v11  ;;  %302 = vmatpush1.bf16.msra.mxu1 %v536_v12  ;;  %v565_v31 = vld [vmem:[%s738_s1 + $0xe0] ss:$16 sps:$4 sm:$0xff]   ;;  %v566_v32 = vld [vmem:[%s738_s1 + $0xe8] ss:$16 sps:$4 sm:$0xff]   ;;  %v57_v36 = vshrl.u32 %v56_v35, 7 }
   0xc   :  { %252 = vmatprep.subr.bf16.mxu0 %v537_v13  ;;  %303 = vmatprep.subr.bf16.mxu1 %v539_v14  ;;  %v567_v33 = vld [vmem:[%s739_s0] sm:$0xff]   ;;  %v568_v34 = vld [vmem:[%s739_s0 + $0x8] ss:$0 sps:$4 sm:$0x11]  }
   0xd   :  { %v58_v37 = vsub.s32 0, %v57_v36  ;;  %v66_v38 = vsub.s32 2, %v57_v36  ;;  %v54_v39 = vld [vmem:[%s740_s2] sm:$0xf]  ;;  %v62_v40 = vsub.s32 1, %v57_v36  ;;  %v70_v41 = vsub.s32 3, %v57_v36 }
   0xf   :  { %253 = vmatpush1.bf16.msra.mxu0 %v541_v15  ;;  %304 = vmatpush1.bf16.msra.mxu1 %v542_v16  ;;  %v59_v42 = vrot.slane %v54_v39, %v58_v37  ;;  %v67_v43 = vrot.slane %v54_v39, %v66_v38  ;;  %v63_v44 = vrot.slane %v54_v39, %v62_v40 }
  0x10   :  { %254 = vmatprep.subr.bf16.mxu0 %v543_v17  ;;  %305 = vmatprep.subr.bf16.mxu1 %v545_v18  ;;  %v71_v45 = vrot.slane %v54_v39, %v70_v41 }
  0x13   :  { %255 = vmatpush1.bf16.msra.mxu0 %v547_v19  ;;  %306 = vmatpush1.bf16.msra.mxu1 %v548_v20 }
  0x14   :  { %256 = vmatprep.subr.bf16.mxu0 %v549_v21  ;;  %307 = vmatprep.subr.bf16.mxu1 %v551_v22 }
  0x17   :  { %257 = vmatpush1.bf16.msra.mxu0 %v553_v23  ;;  %308 = vmatpush1.bf16.msra.mxu1 %v554_v24 }
  0x18   :  { %258 = vmatprep.subr.bf16.mxu0 %v555_v25  ;;  %309 = vmatprep.subr.bf16.mxu1 %v557_v26 }
  0x1b   :  { %259 = vmatpush1.bf16.msra.mxu0 %v559_v27  ;;  %310 = vmatpush1.bf16.msra.mxu1 %v560_v28 }
  0x1c   :  { %260 = vmatprep.subr.bf16.mxu0 %v561_v29  ;;  %311 = vmatprep.subr.bf16.mxu1 %v563_v30 }
  0x1f   :  { %261 = vmatpush1.bf16.msra.mxu0 %v565_v31  ;;  %312 = vmatpush1.bf16.msra.mxu1 %v566_v32 }
  0x22   :  { %279 = vmatmul.mubr.bf16.vlgmr.msra.gmra.mrb[0].mxu0 %v567_v33  ;;  %330 = vmatmul.mubr.bf16.vlgmr.msra.gmra.mrb[0].mxu1 %v567_v33 }
  0x23   :  { %288 = vmatprep.mubr.bf16.mxu0 %v569_v1  ;;  %339 = vmatprep.mubr.bf16.mxu1 %v569_v1 }
  0x2a   :  { %289 = vmatmul.mubr.bf16.gmra.mrb[4].mxu0 %v568_v34  ;;  %340 = vmatmul.mubr.bf16.gmra.mrb[4].mxu1 %v568_v34 }
  0xf5   :  { %v280_v46 = vpop.f32.mrb[0].mxu0  ;;  %v331_v47 = vpop.f32.mrb[0].mxu1 }
  0xf6   :  { %v281_v48 = vadd.f32 %v280_v46, %v59_v42  ;;  %v332_v49 = vadd.f32 %v331_v47, %v67_v43  ;;  %v282_v50 = vpop.f32.mrb[1].mxu0  ;;  %v333_v51 = vpop.f32.mrb[1].mxu1 }
  0xf7   :  { %v283_v52 = vadd.f32 %v282_v50, %v63_v44  ;;  %v334_v53 = vadd.f32 %v333_v51, %v71_v45  ;;  %v284_v54 = vpop.f32.mrb[2].mxu0  ;;  %v335_v55 = vpop.f32.mrb[2].mxu1 }
  0xf8   :  { %v285_v56 = vadd.f32 %v284_v54, %v59_v42  ;;  %v336_v57 = vadd.f32 %v335_v55, %v67_v43  ;;  %v286_v58 = vpop.f32.mrb[3].mxu0  ;;  %v337_v59 = vpop.f32.mrb[3].mxu1  ;;  %v348_v62 = vmax.f32 %v281_v48, 0.0  ;;  %v350_v63 = vmax.f32 %v332_v49, 0.0 }
  0xf9   :  { %v287_v60 = vadd.f32 %v286_v58, %v63_v44  ;;  %v338_v61 = vadd.f32 %v337_v59, %v71_v45  ;;  %v349_v2 = vmax.f32 %v283_v52, 0.0  ;;  %v351_v3 = vmax.f32 %v334_v53, 0.0 }
  0xfa   :  { %v352_v0 = vmax.f32 %v285_v56, 0.0  ;;  %v354_v1 = vmax.f32 %v336_v57, 0.0 }
  0xfb   :  { %v353_v4 = vmax.f32 %v287_v60, 0.0  ;;  %v355_v5 = vmax.f32 %v338_v61, 0.0 }
  0xfc   :  { %v501_v6 = vpack.c.bf16 %v352_v0, %v348_v62  ;;  %v511_v7 = vpack.c.bf16 %v354_v1, %v350_v63 }
  0xfd   :  { %v506_v8 = vpack.c.bf16 %v353_v4, %v349_v2  ;;  %v516_v9 = vpack.c.bf16 %v355_v5, %v351_v3  ;;  %v290_v10 = vpop.f32.mrb[4].mxu0  ;;  %v341_v11 = vpop.f32.mrb[4].mxu1 }
  0xfe   :  { %v291_v12 = vadd.f32 %v290_v10, %v59_v42  ;;  %502 = vst [vmem:[%s741_s3] sm:$0xff] %v501_v6   ;;  %v342_v13 = vadd.f32 %v341_v11, %v67_v43  ;;  %512 = vst [vmem:[%s742_s5] sm:$0xff] %v511_v7   ;;  %v292_v14 = vpop.f32.mrb[5].mxu0  ;;  %v343_v15 = vpop.f32.mrb[5].mxu1 }
  0xff   :  { %v293_v16 = vadd.f32 %v292_v14, %v63_v44  ;;  %507 = vst [vmem:[%s743_s4] sm:$0xff] %v506_v8   ;;  %v344_v17 = vadd.f32 %v343_v15, %v71_v45  ;;  %517 = vst [vmem:[%s744_s6] sm:$0xff] %v516_v9   ;;  %v294_v18 = vpop.f32.mrb[6].mxu0  ;;  %v345_v19 = vpop.f32.mrb[6].mxu1 }
 0x100   :  { %v356_v20 = vmax.f32 %v291_v12, 0.0  ;;  %v358_v21 = vmax.f32 %v342_v13, 0.0  ;;  %v295_v22 = vpop.f32.mrb[7].mxu0  ;;  %v346_v23 = vpop.f32.mrb[7].mxu1 }
 0x101   :  { %v357_v24 = vmax.f32 %v293_v16, 0.0  ;;  %v359_v25 = vmax.f32 %v344_v17, 0.0 }
 0x102   :  { %v488_v26 = vpack.c.bf16 %v356_v20, %v356_v20  ;;  %v494_v27 = vpack.c.bf16 %v358_v21, %v358_v21 }
 0x103   :  { %v491_v28 = vpack.c.bf16 %v357_v24, %v357_v24  ;;  %v497_v29 = vpack.c.bf16 %v359_v25, %v359_v25 }
 0x104   :  { %375 = vst [vmem:[%s741_s3 + $0x8] sm:$0x1] %v488_v26  ;;  %407 = vst [vmem:[%s742_s5 + $0x8] sm:$0x1] %v494_v27 }
 0x105   :  { %391 = vst [vmem:[%s743_s4 + $0x8] sm:$0x1] %v491_v28  ;;  %423 = vst [vmem:[%s744_s6 + $0x8] sm:$0x1] %v497_v29 }

// kernel: posdep_forward.5
= control target key start
LH: loop header
LB: loop body
LE: loop exit
PB: predicated region body
PF: predicated region fallthrough
CT: control target
= control target key end

     0   :  { %13 = vsyncpa [#allocation3], 0  ;;  %s1028_s0 = inlined_call_operand.vmem [shape: bf16[16,64], index: 0, kind: input, shape index: {}]   ;;  %s1029_s1 = inlined_call_operand.vmem [shape: bf16[16,50], index: 1, kind: input, shape index: {}]   ;;  %s1030_s2 = inlined_call_operand.vmem [shape: s32[16,3], index: 2, kind: input, shape index: {}]   ;;  %s1031_s3 = inlined_call_operand.hbm [shape: bf16[64,512], index: 3, kind: input, shape index: {}]   ;;  %s1032_s4 = inlined_call_operand.hbm [shape: bf16[50,128], index: 4, kind: input, shape index: {}]   ;;  %s1033_s5 = inlined_call_operand.vmem [shape: f32[1,512], index: 5, kind: input, shape index: {}]   ;;  %s1034_s6 = inlined_call_operand.vmem [shape: bf16[16,128], index: 6, kind: output, shape index: {0}]   ;;  %s1035_s7 = inlined_call_operand.vmem [shape: f32[1,1,8], index: 7, kind: output, shape index: {1}]  }
   0x1   :  { %14 = vsyncpa [#allocation5], 0  ;;  %s801_s24 = smov [#allocation2]   ;;  %s753_s28 = scalar_lea.hbm %s1031_s3, 2048 }
   0x2   :  { %s26_s25 = sshll.u32 %s801_s24, 4  ;;  %p754_p0 = scmp.ne.s32.totalorder %s1031_s3, %s753_s28  ;;  %s27_s25 = int_to_ptr.vmem [resolvable:$true] %s26_s25 }
   0x3   :  { %p757_p1 = scmp.lt.u32.totalorder %s753_s28, %s1031_s3 }
   0x5   :  { %p759_p2 = pnand %p757_p1, %p754_p0 }
   0x7   :  { %762 = shalt.err (!%p759_p2)
}
   0x8   :  { %s763_s10 = scalar_lea.vmem %s27_s25, 2048  ;;  %p768_p4 = scmp.lt.s32.totalorder %s27_s25, %s27_s25 }
   0x9   :  { %p764_p3 = scmp.ne.s32.totalorder %s27_s25, %s763_s10  ;;  %p769_p5 = scmp.lt.s32.totalorder %s763_s10, %s763_s10 }
   0xb   :  { %p770_p6 = por %p769_p5, %p768_p4 }
   0xd   :  { %p771_p7 = pnand %p770_p6, %p764_p3 }
   0xf   :  { %774 = shalt.err (!%p771_p7)
}
  0x10   :  { %s802_s11 = smov 256   ;;  %s803_s12 = smov 16  }
  0x11   :  { %32 = dma.hbm_to_vmem [thread:$0]  %s1031_s3, 2048, %s27_s25, [#allocation3], %s802_s11, %s802_s11, %s803_s12  }
  0x12   :  { %s804_s15 = smov [#allocation4]   ;;  %s775_s19 = scalar_lea.hbm %s1032_s4, 448 }
  0x13   :  { %s38_s16 = sshll.u32 %s804_s15, 4  ;;  %p776_p8 = scmp.ne.s32.totalorder %s1032_s4, %s775_s19  ;;  %s39_s16 = int_to_ptr.vmem [resolvable:$true] %s38_s16 }
  0x14   :  { %p779_p9 = scmp.lt.u32.totalorder %s775_s19, %s1032_s4 }
  0x16   :  { %p781_p10 = pnand %p779_p9, %p776_p8 }
  0x18   :  { %784 = shalt.err (!%p781_p10)
}
  0x19   :  { %s785_s24 = scalar_lea.vmem %s39_s16, 448  ;;  %p790_p12 = scmp.lt.s32.totalorder %s39_s16, %s39_s16 }
  0x1a   :  { %p786_p11 = scmp.ne.s32.totalorder %s39_s16, %s785_s24  ;;  %p791_p13 = scmp.lt.s32.totalorder %s785_s24, %s785_s24 }
  0x1c   :  { %p792_p0 = por %p791_p13, %p790_p12 }
  0x1e   :  { %p793_p1 = pnand %p792_p0, %p786_p11 }
  0x20   :  { %796 = shalt.err (!%p793_p1)
}
  0x21   :  { %s805_s3 = smov 64   ;;  %s806_s25 = smov 4  }
  0x22   :  { %44 = dma.hbm_to_vmem [thread:$0]  %s1032_s4, 448, %s39_s16, [#allocation5], %s805_s3, %s805_s3, %s806_s25  }
  0x23   :  { %797 = dma.done.wait [#allocation3], 2048  }
  0x24   :  { %798 = vsyncadd [#allocation3], 4294965248 }
  0x25   :  { %799 = dma.done.wait [#allocation5], 448  }
  0x26   :  { %800 = vsyncadd [#allocation5], 4294966848  ;;  %v807_v0 = vmov 0   ;;  %v699_v1 = vld [vmem:[#allocation2 + $0x4] ss:$16 sps:$4 sm:$0xff]   ;;  %vm179_vm0 = vcmask 523264   ;;  %v74_v29 = vlaneseq }
  0x27   :  { %215 = vmatprep.mubr.bf16.mxu0 %v807_v0  ;;  %258 = vmatprep.mubr.bf16.mxu1 %v807_v0  ;;  %v701_v2 = vld [vmem:[#allocation2 + $0xc] ss:$16 sps:$4 sm:$0xff]   ;;  %v703_v3 = vld [vmem:[#allocation2] ss:$16 sps:$4 sm:$0xff]   ;;  %v704_v4 = vld [vmem:[#allocation2 + $0x8] ss:$16 sps:$4 sm:$0xff]  }
  0x28   :  { %691 = vset.pattern.permute.xlu1 %v807_v0  ;;  %690 = vset.pattern.permute.xlu0 %v807_v0  ;;  %v705_v5 = vld [vmem:[#allocation2 + $0x24] ss:$16 sps:$4 sm:$0xff]   ;;  %v707_v6 = vld [vmem:[#allocation2 + $0x2c] ss:$16 sps:$4 sm:$0xff]   ;;  %v709_v7 = vld [vmem:[#allocation2 + $0x20] ss:$16 sps:$4 sm:$0xff]  }
  0x29   :  { %183 = vmatprep.subr.bf16.mxu0 %v699_v1  ;;  %226 = vmatprep.subr.bf16.mxu1 %v701_v2  ;;  %v710_v8 = vld [vmem:[#allocation2 + $0x28] ss:$16 sps:$4 sm:$0xff]   ;;  %v711_v9 = vld [vmem:[#allocation2 + $0x44] ss:$16 sps:$4 sm:$0xff]   ;;  %v713_v10 = vld [vmem:[#allocation2 + $0x4c] ss:$16 sps:$4 sm:$0xff]  }
  0x2a   :  { %184 = vmatpush1.bf16.msra.mxu0 %v703_v3  ;;  %227 = vmatpush1.bf16.msra.mxu1 %v704_v4  ;;  %v715_v11 = vld [vmem:[#allocation2 + $0x40] ss:$16 sps:$4 sm:$0xff]   ;;  %v716_v12 = vld [vmem:[#allocation2 + $0x48] ss:$16 sps:$4 sm:$0xff]   ;;  %v717_v13 = vld [vmem:[#allocation2 + $0x64] ss:$16 sps:$4 sm:$0xff]  }
  0x2b   :  { %185 = vmatprep.subr.bf16.mxu0 %v705_v5  ;;  %228 = vmatprep.subr.bf16.mxu1 %v707_v6  ;;  %v719_v14 = vld [vmem:[#allocation2 + $0x6c] ss:$16 sps:$4 sm:$0xff]   ;;  %v721_v15 = vld [vmem:[#allocation2 + $0x60] ss:$16 sps:$4 sm:$0xff]   ;;  %v722_v16 = vld [vmem:[#allocation2 + $0x68] ss:$16 sps:$4 sm:$0xff]  }
  0x2c   :  { %v723_v17 = vld [vmem:[%s1028_s0] sm:$0xff]   ;;  %v724_v18 = vld [vmem:[#allocation4] sm:$0xff]   ;;  %v886_v19 = vld [vmem:[%s1030_s2 + $0x8] sm:$0xff]  ;;  %v808_v20 = vmov 0.0   ;;  %vm809_vm1 = vmmov 0   ;;  %v810_v23 = vmov 1  }
  0x2d   :  { %397 = vperm.xlu1 %691, %v886_v19   ;;  %v893_v21 = vld [vmem:[%s1030_s2] sm:$0xff]  ;;  %v725_v22 = vld [vmem:[#allocation4 + $0x8] sm:$0xff]   ;;  %v727_v25 = vld [vmem:[#allocation4 + $0x18] ss:$0 sps:$4 sm:$0x11]   ;;  %vm308_vm2 = vcmask 1040384  }
  0x2e   :  { %186 = vmatpush1.bf16.msra.mxu0 %v709_v7  ;;  %229 = vmatpush1.bf16.msra.mxu1 %v710_v8  ;;  %v726_v24 = vld [vmem:[#allocation4 + $0x10] sm:$0xff]   ;;  %v310_v26 = vsel %vm308_vm2, %v727_v25, 0  ;;  %vm304_vm3 = vcmask 408576   ;;  %v811_v28 = vmov 2   ;;  %v75_v30 = vshrl.u32 %v74_v29, 7 }
  0x2f   :  { %187 = vmatprep.subr.bf16.mxu0 %v711_v9  ;;  %230 = vmatprep.subr.bf16.mxu1 %v713_v10  ;;  %v728_v27 = vld [vmem:[%s1029_s1] sm:$0xff]   ;;  %v909_v35 = vand.u32 127, %v74_v29  ;;  %vm369_vm13 = vcmp.ne.s32.totalorder %v893_v21, 4294967196  ;;  %vm370_vm14 = vcmp.ne.s32.totalorder %v886_v19, 4294967196  ;;  %vm411_vm15 = vcmask 7168  }
  0x30   :  { %v76_v31 = vsub.s32 0, %v75_v30  ;;  %v72_v32 = vld [vmem:[%s1033_s5] sm:$0xf]  ;;  %v88_v33 = vsub.s32 3, %v75_v30  ;;  %v84_v34 = vsub.s32 2, %v75_v30  ;;  %v80_v56 = vsub.s32 1, %v75_v30 }
  0x31   :  { %692 = vset.pattern.permute.xlu1 %v810_v23  ;;  %vm366_vm4 = vcmp.lt.s32.totalorder %v909_v35, 16  ;;  %vm496_vm5 = vcmp.lt.s32.totalorder %v909_v35, 20  ;;  %vm436_vm6 = vcmp.lt.s32.totalorder %v909_v35, 24  ;;  %vm574_vm2 = vcmp.eq.s32.totalorder %v909_v35, 1 }
  0x32   :  { %188 = vmatpush1.bf16.msra.mxu0 %v715_v11  ;;  %231 = vmatpush1.bf16.msra.mxu1 %v716_v12  ;;  %v77_v36 = vrot.slane %v72_v32, %v76_v31  ;;  %v89_v37 = vrot.slane %v72_v32, %v88_v33  ;;  %v85_v38 = vrot.slane %v72_v32, %v84_v34 }
  0x33   :  { %189 = vmatprep.subr.bf16.mxu0 %v717_v13  ;;  %232 = vmatprep.subr.bf16.mxu1 %v719_v14  ;;  %v81_v59 = vrot.slane %v72_v32, %v80_v56 }
  0x34   :  { %460 = vperm.xlu1 %692, %v893_v21  }
  0x36   :  { %190 = vmatpush1.bf16.msra.mxu0 %v721_v15  ;;  %233 = vmatpush1.bf16.msra.mxu1 %v722_v16 }
  0x37   :  { %667 = vmatprep.subr.bf16.mxu0 %v808_v20 }
  0x38   :  { %463 = vperm.xlu1 %692, %v886_v19  }
  0x39   :  { %643 = vmatmul.mubr.msk.bf16.vlgmr.msra.gmra.mrb[0].mxu0 %vm179_vm0, %v723_v17  ;;  %644 = vmatmul.mubr.msk.bf16.vlgmr.msra.gmra.mrb[0].mxu1 %vm179_vm0, %v723_v17  ;;  %vm477_vm0 = vcmask 15368  }
  0x3a   :  { %668 = vmatpush3.bf16.msra.mxu0 %v724_v18  ;;  %675 = vmatprep.mubr.msk.bf16.mxu0 %vm809_vm1, %v808_v20  ;;  %vm537_vm1 = vcmask 23568  }
  0x3b   :  { %669 = vmatprep.subr.bf16.mxu0 %v808_v20 }
  0x3c   :  { %693 = vset.pattern.permute.xlu1 %v811_v28 }
  0x3e   :  { %670 = vmatpush3.bf16.msra.mxu0 %v725_v22 }
  0x3f   :  { %671 = vmatprep.subr.bf16.mxu0 %v808_v20 }
  0x42   :  { %672 = vmatpush3.bf16.msra.mxu0 %v726_v24 }
  0x43   :  { %673 = vmatprep.subr.bf16.mxu0 %v808_v20 }
  0x46   :  { %674 = vmatpush3.bf16.msra.mxu0 %v310_v26 }
  0x49   :  { %676 = vmatmul.mubr.msk.bf16.vlgmr.msra.gmra.mrb[4].mxu0 %vm304_vm3, %v728_v27  ;;  %vm566_vm3 = vcmp.eq.s32.totalorder %v909_v35, 0 }
  0xac   :  { %v398_v7 = vpop.permute.xlu1 %397 }
  0xad   :  { %vm400_vm10 = vcmp.eq.s32.totalorder %v909_v35, %v398_v7 }
  0xb3   :  { %v461_v10 = vpop.permute.xlu1 %460 }
  0xb4   :  { %vm465_vm8 = vcmp.eq.s32.totalorder %v909_v35, %v461_v10 }
  0xb7   :  { %v464_v15 = vpop.permute.xlu1 %463 }
  0xb8   :  { %vm466_vm11 = vcmp.eq.s32.totalorder %v909_v35, %v464_v15 }
 0x10c   :  { %v217_v39 = vpop.f32.mrb[0].mxu0  ;;  %v260_v40 = vpop.f32.mrb[0].mxu1 }
 0x10d   :  { %v218_v41 = vadd.f32 %v217_v39, %v77_v36  ;;  %v219_v42 = vpop.f32.mrb[1].mxu0  ;;  %v262_v43 = vpop.f32.mrb[1].mxu1  ;;  %v261_v53 = vadd.f32 %v260_v40, %v85_v38 }
 0x10e   :  { %v263_v44 = vadd.f32 %v262_v43, %v89_v37  ;;  %v221_v45 = vpop.f32.mrb[2].mxu0  ;;  %v264_v46 = vpop.f32.mrb[2].mxu1  ;;  %v220_v60 = vadd.f32 %v219_v42, %v81_v59 }
 0x10f   :  { %v222_v47 = vadd.f32 %v221_v45, %v77_v36  ;;  %v265_v48 = vadd.f32 %v264_v46, %v85_v38  ;;  %v223_v49 = vpop.f32.mrb[3].mxu0  ;;  %v915_v50 = vsel %vm366_vm4, %v218_v41, -1e+09  ;;  %v266_v51 = vpop.f32.mrb[3].mxu1  ;;  %v933_v58 = vsel %vm496_vm5, %v261_v53, -1e+09 }
 0x110   :  { %373 = vmax.xlane.f32.xlu0 %v915_v50  ;;  %v267_v52 = vadd.f32 %v266_v51, %v89_v37  ;;  %v224_v62 = vadd.f32 %v223_v49, %v81_v59  ;;  %v652_v49 = vsel %vm370_vm14, 1.0, %v808_v20 }
 0x111   :  { %v920_v54 = vsel %vm496_vm5, %v265_v48, -1e+09  ;;  %v925_v57 = vsel %vm366_vm4, %v222_v47, -1e+09  ;;  %v651_v48 = vsel %vm369_vm13, 1.0, %v808_v20  ;;  %v426_v51 = vsel %vm411_vm15, %v652_v49, 0.0 }
 0x112   :  { %501 = vmax.xlane.f32.xlu1 %v920_v54  ;;  %v660_v55 = vpack.c.bf16 %v267_v52, %v263_v44  ;;  %v402_v44 = vsel %vm400_vm10, %v925_v57, 0.0  ;;  %v547_v20 = vsel %vm537_vm1, %v651_v48, 0.0  ;;  %vm582_vm4 = vcmp.eq.s32.totalorder %v909_v35, 2 }
 0x113   :  { %vm590_vm5 = vcmp.eq.s32.totalorder %v909_v35, 3 }
 0x114   :  { %375 = vmax.xlane.f32.xlu0 %v925_v57  ;;  %661 = vst [vmem:[%s1034_s6] sm:$0xff] %v660_v55  }
 0x118   :  { %499 = vmax.xlane.f32.xlu0 %v933_v58 }
 0x11c   :  { %v346_v61 = vpop.f32.mrb[4].mxu0 }
 0x11d   :  { %v434_v63 = vadd.f32 %v346_v61, %v220_v60  ;;  %v677_v1 = vpop.f32.mrb[5].mxu0 }
 0x11e   :  { %v349_v2 = vpop.f32.mrb[6].mxu0 }
 0x11f   :  { %v435_v3 = vadd.f32 %v349_v2, %v224_v62  ;;  %v678_v4 = vpop.f32.mrb[7].mxu0  ;;  %v437_v5 = vsel %vm436_vm6, %v434_v63, -1e+09  ;;  %v548_v62 = vsel %vm537_vm1, %v652_v49, 0.0 }
 0x120   :  { %439 = vmax.xlane.f32.xlu1 %v437_v5  ;;  %v467_v40 = vsel %vm465_vm8, %v437_v5, 0.0  ;;  %v987_v63 = vadd.f32 %v548_v62, %v547_v20  ;;  %vm614_vm8 = vcmask 57344  }
 0x121   :  { %v438_v6 = vsel %vm436_vm6, %v435_v3, -1e+09  ;;  %vm598_vm6 = vcmp.eq.s32.totalorder %v909_v35, 4 }
 0x122   :  { %v468_v46 = vsel %vm466_vm11, %v438_v6, 0.0 }
 0x124   :  { %441 = vmax.xlane.f32.xlu1 %v438_v6 }
 0x12e   :  { %394 = vperm.xlu0 %690, %v893_v21  }
 0x135   :  { %520 = vperm.xlu1 %693, %v893_v21  }
 0x139   :  { %523 = vperm.xlu1 %693, %v886_v19  }
 0x13d   :  { %694 = vset.pattern.permute.xlu1 %v807_v0 }
 0x19d   :  { %v941_v8 = vpop.xlane.xlu0 %373 }
 0x19e   :  { %v377_v9 = vsub.f32 %v915_v50, %v941_v8 }
 0x19f   :  { %v953_v18 = vpop.xlane.xlu1 %501 }
 0x1a0   :  { %v379_v11 = vmul.f32 1.442695, %v377_v9  ;;  %v504_v30 = vsub.f32 %v920_v54, %v953_v18 }
 0x1a1   :  { %v945_v12 = vpop.xlane.xlu0 %375 }
 0x1a2   :  { %729 = vpow2.f32 %v379_v11  ;;  %v378_v13 = vsub.f32 %v925_v57, %v945_v12  ;;  %v507_v36 = vmul.f32 1.442695, %v504_v30  ;;  %v487_v57 = vsel %vm477_vm0, %v651_v48, 0.0 }
 0x1a4   :  { %v381_v14 = vmul.f32 1.442695, %v378_v13 }
 0x1a5   :  { %v949_v16 = vpop.xlane.xlu0 %499 }
 0x1a6   :  { %731 = vpow2.f32 %v381_v14  ;;  %v503_v0 = vsub.f32 %v933_v58, %v949_v16 }
 0x1a8   :  { %v505_v17 = vmul.f32 1.442695, %v503_v0 }
 0x1aa   :  { %733 = vpow2.f32 %v505_v17 }
 0x1ac   :  { %v730_v22 = vpop.eup %729 }
 0x1ad   :  { %v955_v24 = vpop.xlane.xlu1 %439  ;;  %383 = vadd.xlane.f32.xlu1 %v730_v22  ;;  %v395_v31 = vpop.permute.xlu0 %394 }
 0x1ae   :  { %v443_v25 = vsub.f32 %v437_v5, %v955_v24  ;;  %vm399_vm7 = vcmp.eq.s32.totalorder %v909_v35, %v395_v31 }
 0x1af   :  { %v401_v37 = vsel %vm399_vm7, %v915_v50, 0.0  ;;  %v425_v50 = vsel %vm411_vm15, %v651_v48, 0.0  ;;  %vm606_vm7 = vcmp.eq.s32.totalorder %v909_v35, 5 }
 0x1b0   :  { %v732_v26 = vpop.eup %731  ;;  %v445_v27 = vmul.f32 1.442695, %v443_v25  ;;  %v427_v52 = vadd.f32 %v426_v51, %v425_v50 }
 0x1b1   :  { %v958_v29 = vpop.xlane.xlu1 %441  ;;  %385 = vadd.xlane.f32.xlu0 %v732_v26 }
 0x1b2   :  { %735 = vpow2.f32 %v445_v27  ;;  %v444_v32 = vsub.f32 %v438_v6, %v958_v29  ;;  %v428_v53 = vrot.slane %v427_v52, 4 }
 0x1b4   :  { %v734_v33 = vpop.eup %733  ;;  %v447_v34 = vmul.f32 1.442695, %v444_v32 }
 0x1b5   :  { %509 = vadd.xlane.f32.xlu0 %v734_v33  ;;  %v521_v38 = vpop.permute.xlu1 %520 }
 0x1b6   :  { %737 = vpow2.f32 %v447_v34  ;;  %vm525_vm9 = vcmp.eq.s32.totalorder %v909_v35, %v521_v38 }
 0x1b7   :  { %739 = vpow2.f32 %v507_v36  ;;  %v527_v42 = vsel %vm525_vm9, %v933_v58, 0.0  ;;  %v488_v58 = vsel %vm477_vm0, %v652_v49, 0.0 }
 0x1b8   :  { %v489_v59 = vadd.f32 %v488_v58, %v487_v57  ;;  %v550_v57 = vrot.slane %v987_v63, 4 }
 0x1b9   :  { %403 = vadd.xlane.f32.xlu0 %v401_v37  ;;  %v524_v45 = vpop.permute.xlu1 %523 }
 0x1ba   :  { %vm526_vm12 = vcmp.eq.s32.totalorder %v909_v35, %v524_v45  ;;  %v490_v25 = vrot.slane %v489_v59, 4 }
 0x1bb   :  { %v528_v47 = vsel %vm526_vm12, %v920_v54, 0.0  ;;  %v429_v54 = vadd.f32 %v428_v53, %v427_v52 }
 0x1bc   :  { %v736_v39 = vpop.eup %735  ;;  %v491_v38 = vadd.f32 %v490_v25, %v489_v59 }
 0x1bd   :  { %449 = vadd.xlane.f32.xlu1 %v736_v39  ;;  %469 = vadd.xlane.f32.xlu0 %v467_v40  ;;  %v430_v55 = vrot.slane %v429_v54, 2 }
 0x1bf   :  { %v431_v56 = vadd.f32 %v430_v55, %v429_v54 }
 0x1c0   :  { %v738_v41 = vpop.eup %737 }
 0x1c1   :  { %451 = vadd.xlane.f32.xlu1 %v738_v41  ;;  %529 = vadd.xlane.f32.xlu0 %v527_v42  ;;  %v740_v43 = vpop.eup %739  ;;  %v432_v60 = vrot.slane %v431_v56, 1 }
 0x1c3   :  { %v433_v61 = vadd.f32 %v432_v60, %v431_v56 }
 0x1c5   :  { %511 = vadd.xlane.f32.xlu1 %v740_v43 }
 0x1c9   :  { %405 = vadd.xlane.f32.xlu1 %v402_v44 }
 0x1cd   :  { %471 = vadd.xlane.f32.xlu1 %v468_v46 }
 0x1d1   :  { %531 = vadd.xlane.f32.xlu1 %v528_v47  ;;  %v492_v47 = vrot.slane %v491_v38, 2 }
 0x1e2   :  { %577 = vperm.xlu1 %694, %v433_v61   ;;  %v493_v61 = vadd.f32 %v492_v47, %v491_v38 }
 0x1e6   :  { %695 = vset.pattern.permute.xlu1 %v810_v23 }
 0x23a   :  { %v384_v1 = vpop.xlane.xlu1 %383 }
 0x23b   :  { %741 = vlog2.f32 %v384_v1 }
 0x23e   :  { %v386_v2 = vpop.xlane.xlu0 %385 }
 0x23f   :  { %743 = vlog2.f32 %v386_v2 }
 0x242   :  { %v510_v3 = vpop.xlane.xlu0 %509 }
 0x243   :  { %745 = vlog2.f32 %v510_v3 }
 0x245   :  { %v742_v4 = vpop.eup %741 }
 0x246   :  { %v388_v5 = vmul.f32 0.6931472, %v742_v4  ;;  %v404_v13 = vpop.xlane.xlu0 %403  ;;  %v551_v4 = vadd.f32 %v550_v57, %v987_v63 }
 0x248   :  { %v391_v9 = vadd.f32 %v388_v5, %v941_v8 }
 0x249   :  { %v744_v7 = vpop.eup %743 }
 0x24a   :  { %v450_v6 = vpop.xlane.xlu1 %449  ;;  %v390_v11 = vmul.f32 0.6931472, %v744_v7  ;;  %v407_v14 = vsub.f32 %v391_v9, %v404_v13  ;;  %v470_v32 = vpop.xlane.xlu0 %469  ;;  %v494_v7 = vrot.slane %v493_v61, 1 }
 0x24b   :  { %747 = vlog2.f32 %v450_v6 }
 0x24c   :  { %v392_v22 = vadd.f32 %v390_v11, %v945_v12  ;;  %v409_v27 = vsel %vm369_vm13, %v407_v14, 0.0  ;;  %v552_v11 = vrot.slane %v551_v4, 2 }
 0x24d   :  { %v746_v0 = vpop.eup %745  ;;  %v412_v36 = vsel %vm411_vm15, %v409_v27, 0.0 }
 0x24e   :  { %v452_v10 = vpop.xlane.xlu1 %451  ;;  %v514_v26 = vmul.f32 0.6931472, %v746_v0  ;;  %v530_v46 = vpop.xlane.xlu0 %529 }
 0x24f   :  { %749 = vlog2.f32 %v452_v10 }
 0x250   :  { %v517_v40 = vadd.f32 %v514_v26, %v949_v16 }
 0x252   :  { %v512_v15 = vpop.xlane.xlu1 %511  ;;  %v533_v49 = vsub.f32 %v517_v40, %v530_v46 }
 0x253   :  { %751 = vlog2.f32 %v512_v15  ;;  %v495_v15 = vadd.f32 %v494_v7, %v493_v61 }
 0x254   :  { %v535_v58 = vsel %vm369_vm13, %v533_v49, 0.0 }
 0x255   :  { %v748_v17 = vpop.eup %747 }
 0x256   :  { %v454_v30 = vmul.f32 0.6931472, %v748_v17  ;;  %v406_v31 = vpop.xlane.xlu1 %405  ;;  %v553_v17 = vadd.f32 %v552_v11, %v551_v4 }
 0x257   :  { %v408_v8 = vsub.f32 %v392_v22, %v406_v31 }
 0x258   :  { %v457_v33 = vadd.f32 %v454_v30, %v955_v24  ;;  %v554_v26 = vrot.slane %v553_v17, 1 }
 0x259   :  { %v750_v34 = vpop.eup %749  ;;  %v410_v37 = vsel %vm370_vm14, %v408_v8, 0.0 }
 0x25a   :  { %v473_v39 = vsub.f32 %v457_v33, %v470_v32  ;;  %v456_v12 = vmul.f32 0.6931472, %v750_v34  ;;  %v413_v41 = vsel %vm411_vm15, %v410_v37, 0.0  ;;  %v472_v43 = vpop.xlane.xlu1 %471  ;;  %v555_v30 = vadd.f32 %v554_v26, %v553_v17 }
 0x25b   :  { %v414_v42 = vadd.f32 %v413_v41, %v412_v36 }
 0x25c   :  { %v458_v44 = vadd.f32 %v456_v12, %v958_v29  ;;  %v475_v48 = vsel %vm369_vm13, %v473_v39, 0.0 }
 0x25d   :  { %v752_v45 = vpop.eup %751  ;;  %v415_v24 = vrot.slane %v414_v42, 4  ;;  %v478_v54 = vsel %vm477_vm0, %v475_v48, 0.0 }
 0x25e   :  { %v516_v50 = vmul.f32 0.6931472, %v752_v45  ;;  %v474_v51 = vsub.f32 %v458_v44, %v472_v43  ;;  %v532_v55 = vpop.xlane.xlu1 %531 }
 0x25f   :  { %v416_v52 = vadd.f32 %v415_v24, %v414_v42 }
 0x260   :  { %v476_v16 = vsel %vm370_vm14, %v474_v51, 0.0  ;;  %v518_v53 = vadd.f32 %v516_v50, %v953_v18  ;;  %v538_v18 = vsel %vm537_vm1, %v535_v58, 0.0 }
 0x261   :  { %v479_v29 = vsel %vm477_vm0, %v476_v16, 0.0  ;;  %v417_v56 = vrot.slane %v416_v52, 2 }
 0x262   :  { %v480_v59 = vadd.f32 %v479_v29, %v478_v54  ;;  %v534_v60 = vsub.f32 %v518_v53, %v532_v55  ;;  %v578_v31 = vpop.permute.xlu1 %577 }
 0x263   :  { %v418_v20 = vadd.f32 %v417_v56, %v416_v52  ;;  %v580_v32 = vsel %vm574_vm2, %v578_v31, 0.0 }
 0x264   :  { %v481_v62 = vrot.slane %v480_v59, 4  ;;  %v536_v1 = vsel %vm370_vm14, %v534_v60, 0.0 }
 0x265   :  { %v539_v2 = vsel %vm537_vm1, %v536_v1, 0.0  ;;  %v419_v3 = vrot.slane %v418_v20, 1 }
 0x266   :  { %v482_v5 = vadd.f32 %v481_v62, %v480_v59  ;;  %v540_v6 = vadd.f32 %v539_v2, %v538_v18 }
 0x267   :  { %v420_v21 = vadd.f32 %v419_v3, %v418_v20 }
 0x268   :  { %v541_v9 = vrot.slane %v540_v6, 4  ;;  %v483_v10 = vrot.slane %v482_v5, 2 }
 0x269   :  { %569 = vperm.xlu0 %690, %v420_v21  }
 0x26a   :  { %v542_v13 = vadd.f32 %v541_v9, %v540_v6  ;;  %v484_v14 = vadd.f32 %v483_v10, %v482_v5 }
 0x26c   :  { %v485_v19 = vrot.slane %v484_v14, 1  ;;  %v543_v0 = vrot.slane %v542_v13, 2 }
 0x26d   :  { %696 = vset.pattern.permute.xlu0 %v810_v23 }
 0x26e   :  { %v486_v22 = vadd.f32 %v485_v19, %v484_v14  ;;  %593 = vperm.xlu0 %696, %v495_v15   ;;  %v544_v25 = vadd.f32 %v543_v0, %v542_v13 }
 0x270   :  { %585 = vperm.xlu1 %695, %v486_v22   ;;  %v545_v63 = vrot.slane %v544_v25, 1 }
 0x272   :  { %v546_v27 = vadd.f32 %v545_v63, %v544_v25  ;;  %698 = vset.pattern.permute.xlu0 %v811_v28 }
 0x274   :  { %697 = vset.pattern.permute.xlu1 %v811_v28 }
 0x275   :  { %601 = vperm.xlu1 %697, %v546_v27  }
 0x279   :  { %609 = vperm.xlu1 %697, %v555_v30  }
 0x2e8   :  { %v570_v23 = vpop.permute.xlu0 %569 }
 0x2e9   :  { %v572_v8 = vsel %vm566_vm3, %v570_v23, 0.0 }
 0x2ea   :  { %v581_v34 = vadd.f32 %v580_v32, %v572_v8 }
 0x2ed   :  { %v594_v33 = vpop.permute.xlu0 %593 }
 0x2ee   :  { %v596_v38 = vsel %vm590_vm5, %v594_v33, 0.0 }
 0x2ef   :  { %v586_v36 = vpop.permute.xlu1 %585 }
 0x2f0   :  { %v588_v37 = vsel %vm582_vm4, %v586_v36, 0.0 }
 0x2f1   :  { %v589_v28 = vadd.f32 %v588_v37, %v581_v34 }
 0x2f3   :  { %v597_v39 = vadd.f32 %v596_v38, %v589_v28 }
 0x2f4   :  { %v602_v12 = vpop.permute.xlu1 %601 }
 0x2f5   :  { %v604_v40 = vsel %vm598_vm6, %v602_v12, 0.0 }
 0x2f6   :  { %v605_v41 = vadd.f32 %v604_v40, %v597_v39 }
 0x2f8   :  { %v610_v42 = vpop.permute.xlu1 %609 }
 0x2f9   :  { %v612_v43 = vsel %vm606_vm7, %v610_v42, 0.0 }
 0x2fa   :  { %v613_v44 = vadd.f32 %v612_v43, %v605_v41 }
 0x2fc   :  { %615 = vst.msk [vmem:[%s1035_s7] sm:$0x1] %vm614_vm8, %v613_v44 }
 0x2fd   :  { %624 = vsyncpa [#allocation3], 1 }
 0x2fe   :  { %625 = vsyncpa [#allocation5], 1 }

// kernel: posdep_forward.8
= control target key start
LH: loop header
LB: loop body
LE: loop exit
PB: predicated region body
PF: predicated region fallthrough
CT: control target
= control target key end

     0   :  { %v693_v0 = vmov 0.0   ;;  %vm694_vm0 = vmmov 0   ;;  %vm170_vm1 = vcmask 1040384   ;;  %v695_v25 = vmov 0   ;;  %s986_s4 = inlined_call_operand.vmem [shape: bf16[128,128], index: 4, kind: input, shape index: {}]   ;;  %s987_s1 = inlined_call_operand.vmem [shape: bf16[2,9,128], index: 1, kind: input, shape index: {}]   ;;  %s988_s0 = inlined_call_operand.vmem [shape: bf16[2,9,128], index: 0, kind: input, shape index: {}]   ;;  %s989_s5 = inlined_call_operand.vmem [shape: f32[1,128], index: 5, kind: input, shape index: {}]   ;;  %s990_s7 = inlined_call_operand.<no memory space> [shape: f32[1,1], index: 7, kind: input, shape index: {}]   ;;  %s991_s3 = inlined_call_operand.vmem [shape: s32[2,9,1], index: 3, kind: input, shape index: {}]   ;;  %s992_s6 = inlined_call_operand.vmem [shape: f32[1,128], index: 6, kind: input, shape index: {}]   ;;  %s993_s2 = inlined_call_operand.vmem [shape: s32[2,1,9], index: 2, kind: input, shape index: {}]   ;;  %s994_s8 = inlined_call_operand.vmem [shape: f32[1,1,8], index: 8, kind: output, shape index: {}]  }
   0x1   :  { %608 = vmatprep.subr.bf16.mxu0 %v693_v0  ;;  %v745_v1 = vld [vmem:[%s986_s4] sm:$0xff]   ;;  %624 = vmatprep.mubr.msk.bf16.mxu0 %vm694_vm0, %v693_v0  ;;  %v756_v2 = vld [vmem:[%s986_s4 + $0x8] sm:$0xff]   ;;  %v763_v3 = vld [vmem:[%s986_s4 + $0x10] sm:$0xff]   ;;  %v13_v21 = vstv %s990_s7  ;;  %v232_v42 = vlaneseq  ;;  %vm261_vm5 = vcmask 72704   ;;  %vm265_vm7 = vcmask 65536  }
   0x2   :  { %628 = vmatprep.subr.bf16.mxu1 %v693_v0  ;;  %630 = vmatprep.mubr.msk.bf16.mxu1 %vm694_vm0, %v693_v0  ;;  %v674_v4 = vld [vmem:[%s987_s1] sm:$0x1f]   ;;  %v773_v5 = vld [vmem:[%s986_s4 + $0x18] sm:$0xff]   ;;  %v788_v7 = vld [vmem:[%s986_s4 + $0x28] sm:$0xff]   ;;  %14 = vst [vmem:[#allocation2] sm:$0x1] %v13_v21 }
   0x3   :  { %609 = vmatpush3.bf16.msra.mxu0 %v745_v1  ;;  %629 = vmatpush3.bf16.xpose.msra.mxu1 %v674_v4  ;;  %v781_v6 = vld [vmem:[%s986_s4 + $0x20] sm:$0xff]   ;;  %v795_v8 = vld [vmem:[%s986_s4 + $0x30] sm:$0xff]   ;;  %v802_v9 = vld [vmem:[%s986_s4 + $0x38] sm:$0xff]   ;;  %v877_v45 = vshrl.u32 %v232_v42, 7  ;;  %v881_v49 = vand.u32 127, %v232_v42 }
   0x4   :  { %610 = vmatprep.subr.bf16.mxu0 %v693_v0  ;;  %634 = vmatprep.subr.bf16.mxu1 %v693_v0  ;;  %v52_v10 = vld [vmem:[%s988_s0] sm:$0xf]  ;;  %v53_v11 = vld [vmem:[%s988_s0 + $0x4] sm:$0x1]  ;;  %v575_v13 = vld [vmem:[%s988_s0 + $0x8] sm:$0xf] }
   0x5   :  { %v561_v12 = vcombine.low %v52_v10, %v53_v11  ;;  %v576_v14 = vld [vmem:[%s988_s0 + $0xc] sm:$0x1]  ;;  %v158_v16 = vunpack.c.l.bf16 %v52_v10  ;;  %v159_v17 = vunpack.c.l.bf16 %v53_v11  ;;  %v387_v18 = vunpack.c.l.bf16 %v575_v13  ;;  %v570_v19 = vld [vmem:[%s989_s5] ss:$0 sm:$0xff]  ;;  %663 = vset.pattern.permute.xlu0 %v695_v25  ;;  %664 = vset.pattern.permute.xlu1 %v695_v25  ;;  %v838_v30 = vld [vmem:[%s991_s3 + $0x8] sm:$0x1] }
   0x6   :  { %v579_v15 = vcombine.low %v575_v13, %v576_v14  ;;  %v388_v20 = vunpack.c.l.bf16 %v576_v14  ;;  %v832_v29 = vld [vmem:[%s991_s3] sm:$0xff]  ;;  %v844_v32 = vld [vmem:[%s991_s3 + $0x10] sm:$0xff]  ;;  %v676_v41 = vld [vmem:[%s987_s1 + $0x8] sm:$0x1f]   ;;  %v246_v47 = vsub.s32 0, %v877_v45  ;;  %v234_v53 = vadd.s32 8, %v877_v45 }
   0x7   :  { %611 = vmatpush3.bf16.msra.mxu0 %v756_v2  ;;  %v166_v22 = vmul.f32 %v570_v19, %v158_v16  ;;  %v167_v23 = vmul.f32 %v570_v19, %v159_v17  ;;  %v389_v24 = vmul.f32 %v570_v19, %v387_v18  ;;  %v850_v33 = vld [vmem:[%s992_s6] ss:$0 sm:$0xff]  ;;  %vm237_vm3 = vcmp.eq.s32.totalorder %v877_v45, %v881_v49  ;;  %v581_v21 = vld [vmem:[%s993_s2 + $0x1] sm:$0x1] }
   0x8   :  { %612 = vmatprep.subr.bf16.mxu0 %v693_v0  ;;  %v390_v26 = vmul.f32 %v570_v19, %v388_v20  ;;  %v241_v44 = vld [vmem:[%s993_s2] sm:$0x1]  ;;  %vm238_vm6 = vcmp.eq.s32.totalorder %v234_v53, %v881_v49  ;;  %vm449_vm8 = vcmp.ne.s32.totalorder %v581_v21, 0  ;;  %vm254_vm12 = vcmp.ne.s32.totalorder %v832_v29, 4294967196 }
   0x9   :  { %168 = vadd.xlane.f32.xlu0 %v166_v22  ;;  %391 = vadd.xlane.f32.xlu1 %v389_v24  ;;  %v171_v27 = vsel %vm170_vm1, %v167_v23, 0.0  ;;  %v572_v31 = vld [vmem:[#allocation2] ss:$0 sm:$0xff]  ;;  %vm242_vm2 = vcmp.ne.s32.totalorder %v241_v44, 0  ;;  %v450_v22 = vsel %vm449_vm8, 1, %v695_v25  ;;  %vm255_vm13 = vcmp.ne.s32.totalorder %v838_v30, 4294967196 }
   0xa   :  { %v393_v28 = vsel %vm170_vm1, %v390_v26, 0.0  ;;  %v243_v48 = vsel %vm242_vm2, 1, %v695_v25  ;;  %v454_v23 = vrot.slane %v450_v22, %v246_v47  ;;  %vm463_vm14 = vcmp.ne.s32.totalorder %v844_v32, 4294967196 }
   0xb   :  { %613 = vmatpush3.bf16.msra.mxu0 %v763_v3  ;;  %v247_v50 = vrot.slane %v243_v48, %v246_v47  ;;  %vm309_vm1 = vcmask 0  }
   0xc   :  { %614 = vmatprep.subr.bf16.mxu0 %v693_v0  ;;  %vm455_vm9 = vcmp.eq.s32.totalorder %v454_v23, 1 }
   0xd   :  { %172 = vadd.xlane.f32.xlu0 %v171_v27  ;;  %394 = vadd.xlane.f32.xlu1 %v393_v28  ;;  %vm248_vm4 = vcmp.eq.s32.totalorder %v247_v50, 1 }
   0xf   :  { %615 = vmatpush3.bf16.msra.mxu0 %v773_v5 }
  0x10   :  { %616 = vmatprep.subr.bf16.mxu0 %v693_v0 }
  0x13   :  { %617 = vmatpush3.bf16.msra.mxu0 %v781_v6 }
  0x14   :  { %618 = vmatprep.subr.bf16.mxu0 %v693_v0 }
  0x17   :  { %619 = vmatpush3.bf16.msra.mxu0 %v788_v7 }
  0x18   :  { %620 = vmatprep.subr.bf16.mxu0 %v693_v0 }
  0x1b   :  { %621 = vmatpush3.bf16.msra.mxu0 %v795_v8 }
  0x1c   :  { %622 = vmatprep.subr.bf16.mxu0 %v693_v0 }
  0x1e   :  { %288 = vperm.xlu1 %664, %v832_v29  }
  0x1f   :  { %623 = vmatpush3.bf16.msra.mxu0 %v802_v9 }
  0x20   :  { %654 = vmatprep.subr.bf16.mxu0 %v693_v0 }
  0x22   :  { %625 = vmatmul.mubr.bf16.vlgmr.msra.gmra.mrb[0].mxu0 %v561_v12  ;;  %291 = vperm.xlu1 %664, %v838_v30  }
  0x23   :  { %656 = vmatprep.mubr.msk.bf16.mxu0 %vm694_vm0, %v693_v0  ;;  %227 = vperm.xlu0 %663, %v572_v31  }
  0x26   :  { %495 = vperm.xlu1 %664, %v844_v32  }
  0x28   :  { %655 = vmatpush3.bf16.xpose.msra.mxu0 %v676_v41  ;;  %v919_v41 = vld [vmem:[%s991_s3 + $0x18] sm:$0x1] }
  0x29   :  { %vm464_vm15 = vcmp.ne.s32.totalorder %v919_v41, 4294967196 }
  0x96   :  { %v169_v43 = vpop.xlane.xlu0 %168  ;;  %v392_v11 = vpop.xlane.xlu1 %391 }
  0x9a   :  { %v173_v46 = vpop.xlane.xlu0 %172  ;;  %v395_v12 = vpop.xlane.xlu1 %394 }
  0x9e   :  { %v289_v13 = vpop.permute.xlu1 %288 }
  0x9f   :  { %vm293_vm10 = vcmp.eq.s32.totalorder %v881_v49, %v289_v13 }
  0xa2   :  { %v228_v52 = vpop.permute.xlu0 %227  ;;  %v899_v14 = vpop.permute.xlu1 %291 }
  0xa3   :  { %vm294_vm2 = vcmp.eq.s32.totalorder %v881_v49, %v899_v14 }
  0xf5   :  { %v150_v34 = vpop.f32.mrb[0].mxu0 }
  0xf6   :  { %v626_v35 = vpop.f32.mrb[1].mxu0  ;;  %v151_v37 = vadd.f32 %v850_v33, %v150_v34 }
  0xf7   :  { %v153_v36 = vpop.f32.mrb[2].mxu0 }
  0xf8   :  { %v154_v38 = vadd.f32 %v850_v33, %v153_v36  ;;  %v627_v39 = vpop.f32.mrb[3].mxu0 }
  0xfa   :  { %v157_v40 = vpack.c.bf16 %v154_v38, %v151_v37 }
  0xfc   :  { %631 = vmatmul.mubr.bf16.vlgmr.msra.gmra.mrb[0].mxu1 %v157_v40 }
  0xfd   :  { %635 = vmatpush3.bf16.msra.mxu1 %v745_v1  ;;  %650 = vmatprep.mubr.msk.bf16.mxu1 %vm694_vm0, %v693_v0  ;;  %vm307_vm0 = vcmask 7168  }
  0xfe   :  { %636 = vmatprep.subr.bf16.mxu1 %v693_v0 }
 0x101   :  { %637 = vmatpush3.bf16.msra.mxu1 %v756_v2 }
 0x102   :  { %638 = vmatprep.subr.bf16.mxu1 %v693_v0 }
 0x105   :  { %639 = vmatpush3.bf16.msra.mxu1 %v763_v3 }
 0x106   :  { %640 = vmatprep.subr.bf16.mxu1 %v693_v0 }
 0x109   :  { %641 = vmatpush3.bf16.msra.mxu1 %v773_v5 }
 0x10a   :  { %642 = vmatprep.subr.bf16.mxu1 %v693_v0 }
 0x10d   :  { %643 = vmatpush3.bf16.msra.mxu1 %v781_v6 }
 0x10e   :  { %644 = vmatprep.subr.bf16.mxu1 %v693_v0 }
 0x111   :  { %645 = vmatpush3.bf16.msra.mxu1 %v788_v7 }
 0x112   :  { %646 = vmatprep.subr.bf16.mxu1 %v693_v0 }
 0x115   :  { %647 = vmatpush3.bf16.msra.mxu1 %v795_v8 }
 0x116   :  { %648 = vmatprep.subr.bf16.mxu1 %v693_v0 }
 0x119   :  { %649 = vmatpush3.bf16.msra.mxu1 %v802_v9 }
 0x11c   :  { %651 = vmatmul.mubr.bf16.vlgmr.msra.gmra.mrb[4].mxu1 %v579_v15  ;;  %v496_v15 = vpop.permute.xlu1 %495 }
 0x11d   :  { %vm500_vm11 = vcmp.eq.s32.totalorder %v881_v49, %v496_v15 }
 0x1cf   :  { %v214_v51 = vpop.f32.mrb[0].mxu1 }
 0x1d0   :  { %v215_v54 = vadd.f32 %v214_v51, %v169_v43  ;;  %v632_v55 = vpop.f32.mrb[1].mxu1 }
 0x1d1   :  { %v217_v56 = vpop.f32.mrb[2].mxu1 }
 0x1d2   :  { %v218_v57 = vadd.f32 %v217_v56, %v173_v46  ;;  %v633_v58 = vpop.f32.mrb[3].mxu1  ;;  %v230_v59 = vadd.f32 %v228_v52, %v215_v54 }
 0x1d3   :  { %v573_v58 = vsel %vm254_vm12, 1.0, %v693_v0 }
 0x1d4   :  { %v231_v60 = vadd.f32 %v228_v52, %v218_v57  ;;  %v239_v61 = vsel %vm237_vm3, -1e+09, %v230_v59  ;;  %v574_v59 = vsel %vm255_vm13, 1.0, %v693_v0 }
 0x1d5   :  { %v249_v62 = vsel %vm248_vm4, -1e+09, %v239_v61  ;;  %v585_v61 = vsel %vm464_vm15, 1.0, %v693_v0 }
 0x1d6   :  { %v262_v63 = vsel %vm261_vm5, %v249_v62, -inf  ;;  %v240_v1 = vsel %vm238_vm6, -1e+09, %v231_v60  ;;  %v295_v47 = vsel %vm293_vm10, %v249_v62, 0.0  ;;  %v584_v60 = vsel %vm463_vm14, 1.0, %v693_v0 }
 0x1d7   :  { %263 = vmax.xlane.f32.xlu1 %v262_v63  ;;  %v893_v2 = vsel %vm248_vm4, -1e+09, %v240_v1  ;;  %v297_v48 = vsel %vm261_vm5, %v295_v47, 0.0  ;;  %v322_v63 = vsel %vm307_vm0, %v573_v58, 0.0  ;;  %v323_v1 = vsel %vm309_vm1, %v574_v59, 0.0 }
 0x1d8   :  { %v266_v3 = vsel %vm265_vm7, %v893_v2, -inf  ;;  %vm546_vm4 = vcmp.eq.s32.totalorder %v881_v49, 1 }
 0x1db   :  { %267 = vmax.xlane.f32.xlu1 %v266_v3  ;;  %v527_v3 = vsel %vm307_vm0, %v584_v60, 0.0 }
 0x1ef   :  { %v379_v4 = vpop.f32.mrb[4].mxu1 }
 0x1f0   :  { %v652_v5 = vpop.f32.mrb[5].mxu1  ;;  %v380_v7 = vadd.f32 %v850_v33, %v379_v4  ;;  %v528_v4 = vsel %vm309_vm1, %v585_v61, 0.0 }
 0x1f1   :  { %v382_v6 = vpop.f32.mrb[6].mxu1 }
 0x1f2   :  { %v383_v8 = vadd.f32 %v850_v33, %v382_v6  ;;  %v653_v9 = vpop.f32.mrb[7].mxu1 }
 0x1f4   :  { %v386_v10 = vpack.c.bf16 %v383_v8, %v380_v7  ;;  %v324_v7 = vadd.f32 %v323_v1, %v322_v63  ;;  %v529_v8 = vadd.f32 %v528_v4, %v527_v3 }
 0x1f6   :  { %657 = vmatmul.mubr.bf16.vlgmr.msra.gmra.mrb[4].mxu0 %v386_v10  ;;  %v296_v10 = vsel %vm294_vm2, %v893_v2, 0.0 }
 0x1f7   :  { %v300_v13 = vsel %vm265_vm7, %v296_v10, 0.0 }
 0x264   :  { %v901_v16 = vpop.xlane.xlu1 %263 }
 0x265   :  { %v269_v17 = vsub.f32 %v249_v62, %v901_v16 }
 0x267   :  { %v271_v18 = vmul.f32 1.442695, %v269_v17 }
 0x268   :  { %v922_v42 = vpop.xlane.xlu1 %267 }
 0x269   :  { %677 = vpow2.f32 %v271_v18  ;;  %v270_v43 = vsub.f32 %v893_v2, %v922_v42 }
 0x26b   :  { %v273_v44 = vmul.f32 1.442695, %v270_v43 }
 0x26d   :  { %679 = vpow2.f32 %v273_v44 }
 0x273   :  { %v678_v19 = vpop.eup %677 }
 0x274   :  { %v275_v20 = vsel %vm261_vm5, %v678_v19, 0.0 }
 0x275   :  { %276 = vadd.xlane.f32.xlu0 %v275_v20 }
 0x277   :  { %v680_v45 = vpop.eup %679 }
 0x278   :  { %v278_v46 = vsel %vm265_vm7, %v680_v45, 0.0 }
 0x2c9   :  { %v436_v24 = vpop.f32.mrb[4].mxu0 }
 0x2ca   :  { %v437_v26 = vadd.f32 %v436_v24, %v392_v11  ;;  %v658_v27 = vpop.f32.mrb[5].mxu0  ;;  %v325_v11 = vrot.slane %v324_v7, 4 }
 0x2cb   :  { %v439_v28 = vpop.f32.mrb[6].mxu0 }
 0x2cc   :  { %v443_v31 = vadd.f32 %v437_v26, %v228_v52  ;;  %v440_v33 = vadd.f32 %v439_v28, %v395_v12  ;;  %v659_v34 = vpop.f32.mrb[7].mxu0  ;;  %v530_v12 = vrot.slane %v529_v8, 4  ;;  %v326_v17 = vadd.f32 %v325_v11, %v324_v7 }
 0x2ce   :  { %v444_v35 = vadd.f32 %v440_v33, %v228_v52  ;;  %v445_v36 = vsel %vm237_vm3, -1e+09, %v443_v31  ;;  %v531_v18 = vadd.f32 %v530_v12, %v529_v8  ;;  %v327_v19 = vrot.slane %v326_v17, 2 }
 0x2cf   :  { %v456_v37 = vsel %vm455_vm9, -1e+09, %v445_v36 }
 0x2d0   :  { %v470_v38 = vsel %vm261_vm5, %v456_v37, -inf  ;;  %v446_v25 = vsel %vm238_vm6, -1e+09, %v444_v35  ;;  %v502_v50 = vsel %vm500_vm11, %v456_v37, 0.0  ;;  %v532_v20 = vrot.slane %v531_v18, 2 }
 0x2d1   :  { %471 = vmax.xlane.f32.xlu1 %v470_v38  ;;  %v457_v39 = vsel %vm455_vm9, -1e+09, %v446_v25  ;;  %v504_v51 = vsel %vm261_vm5, %v502_v50, 0.0  ;;  %v328_v21 = vadd.f32 %v327_v19, %v326_v17  ;;  %vm554_vm6 = vcmask 57344  }
 0x2d2   :  { %v473_v40 = vsel %vm265_vm7, %v457_v39, -inf  ;;  %v533_v22 = vadd.f32 %v532_v20, %v531_v18 }
 0x2d3   :  { %v329_v23 = vrot.slane %v328_v21, 1 }
 0x2d4   :  { %v534_v24 = vrot.slane %v533_v22, 1 }
 0x2d5   :  { %474 = vmax.xlane.f32.xlu1 %v473_v40  ;;  %v330_v2 = vadd.f32 %v329_v23, %v328_v21 }
 0x2d6   :  { %v535_v26 = vadd.f32 %v534_v24, %v533_v22 }
 0x2d8   :  { %v537_v27 = vadd.f32 %v535_v26, %v330_v2 }
 0x2e6   :  { %498 = vperm.xlu1 %664, %v919_v41  }
 0x302   :  { %v277_v28 = vpop.xlane.xlu0 %276 }
 0x30a   :  { %279 = vadd.xlane.f32.xlu1 %v278_v46 }
 0x30e   :  { %298 = vadd.xlane.f32.xlu1 %v297_v48 }
 0x312   :  { %505 = vadd.xlane.f32.xlu1 %v504_v51 }
 0x35e   :  { %v931_v52 = vpop.xlane.xlu1 %471 }
 0x35f   :  { %v476_v53 = vsub.f32 %v456_v37, %v931_v52 }
 0x361   :  { %v478_v54 = vmul.f32 1.442695, %v476_v53 }
 0x362   :  { %v934_v55 = vpop.xlane.xlu1 %474 }
 0x363   :  { %681 = vpow2.f32 %v478_v54  ;;  %v477_v56 = vsub.f32 %v457_v39, %v934_v55 }
 0x365   :  { %v480_v57 = vmul.f32 1.442695, %v477_v56 }
 0x366   :  { %v499_v9 = vpop.permute.xlu1 %498 }
 0x367   :  { %683 = vpow2.f32 %v480_v57  ;;  %vm501_vm3 = vcmp.eq.s32.totalorder %v881_v49, %v499_v9 }
 0x368   :  { %v503_v15 = vsel %vm501_vm3, %v457_v39, 0.0  ;;  %685 = vlog2.f32 %v277_v28 }
 0x369   :  { %v507_v14 = vsel %vm265_vm7, %v503_v15, 0.0 }
 0x36d   :  { %v682_v62 = vpop.eup %681 }
 0x36e   :  { %v482_v5 = vsel %vm261_vm5, %v682_v62, 0.0  ;;  %vm538_vm5 = vcmp.eq.s32.totalorder %v881_v49, 0 }
 0x36f   :  { %483 = vadd.xlane.f32.xlu0 %v482_v5 }
 0x371   :  { %v684_v6 = vpop.eup %683 }
 0x372   :  { %v485_v0 = vsel %vm265_vm7, %v684_v6, 0.0  ;;  %v686_v33 = vpop.eup %685 }
 0x373   :  { %486 = vadd.xlane.f32.xlu0 %v485_v0  ;;  %v282_v34 = vmul.f32 0.6931472, %v686_v33 }
 0x375   :  { %v285_v25 = vadd.f32 %v282_v34, %v901_v16 }
 0x377   :  { %301 = vadd.xlane.f32.xlu0 %v300_v13 }
 0x37b   :  { %508 = vadd.xlane.f32.xlu0 %v507_v14 }
 0x391   :  { %549 = vperm.xlu0 %663, %v537_v27  }
 0x397   :  { %v280_v31 = vpop.xlane.xlu1 %279 }
 0x398   :  { %687 = vlog2.f32 %v280_v31 }
 0x39b   :  { %v299_v37 = vpop.xlane.xlu1 %298 }
 0x39c   :  { %v303_v40 = vsub.f32 %v285_v25, %v299_v37 }
 0x39e   :  { %v305_v45 = vsel %vm254_vm12, %v303_v40, 0.0 }
 0x39f   :  { %v308_v50 = vsel %vm307_vm0, %v305_v45, 0.0  ;;  %v506_v57 = vpop.xlane.xlu1 %505 }
 0x3a2   :  { %v688_v35 = vpop.eup %687 }
 0x3a3   :  { %v284_v38 = vmul.f32 0.6931472, %v688_v35 }
 0x3a5   :  { %v286_v43 = vadd.f32 %v284_v38, %v922_v42 }
 0x3fc   :  { %v484_v36 = vpop.xlane.xlu0 %483 }
 0x3fd   :  { %689 = vlog2.f32 %v484_v36 }
 0x400   :  { %v487_v39 = vpop.xlane.xlu0 %486 }
 0x401   :  { %691 = vlog2.f32 %v487_v39 }
 0x404   :  { %v302_v44 = vpop.xlane.xlu0 %301 }
 0x405   :  { %v304_v46 = vsub.f32 %v286_v43, %v302_v44 }
 0x407   :  { %v690_v47 = vpop.eup %689  ;;  %v306_v48 = vsel %vm255_vm13, %v304_v46, 0.0 }
 0x408   :  { %v489_v51 = vmul.f32 0.6931472, %v690_v47  ;;  %v310_v53 = vsel %vm309_vm1, %v306_v48, 0.0  ;;  %v509_v60 = vpop.xlane.xlu0 %508 }
 0x409   :  { %v311_v16 = vadd.f32 %v310_v53, %v308_v50 }
 0x40a   :  { %v492_v54 = vadd.f32 %v489_v51, %v931_v52 }
 0x40b   :  { %v692_v56 = vpop.eup %691  ;;  %v312_v59 = vrot.slane %v311_v16, 4 }
 0x40c   :  { %v510_v42 = vsub.f32 %v492_v54, %v506_v57  ;;  %v491_v58 = vmul.f32 0.6931472, %v692_v56 }
 0x40d   :  { %v313_v61 = vadd.f32 %v312_v59, %v311_v16 }
 0x40e   :  { %v493_v29 = vadd.f32 %v491_v58, %v934_v55  ;;  %v512_v30 = vsel %vm463_vm14, %v510_v42, 0.0 }
 0x40f   :  { %v514_v1 = vsel %vm307_vm0, %v512_v30, 0.0  ;;  %v314_v3 = vrot.slane %v313_v61, 2 }
 0x410   :  { %v511_v62 = vsub.f32 %v493_v29, %v509_v60  ;;  %v550_v41 = vpop.permute.xlu0 %549 }
 0x411   :  { %v315_v7 = vadd.f32 %v314_v3, %v313_v61  ;;  %v552_v13 = vsel %vm546_vm4, %v550_v41, 0.0 }
 0x412   :  { %v513_v63 = vsel %vm464_vm15, %v511_v62, 0.0 }
 0x413   :  { %v515_v52 = vsel %vm309_vm1, %v513_v63, 0.0  ;;  %v316_v55 = vrot.slane %v315_v7, 1 }
 0x414   :  { %v516_v4 = vadd.f32 %v515_v52, %v514_v1 }
 0x415   :  { %v317_v10 = vadd.f32 %v316_v55, %v315_v7 }
 0x416   :  { %v517_v5 = vrot.slane %v516_v4, 4 }
 0x418   :  { %v518_v6 = vadd.f32 %v517_v5, %v516_v4 }
 0x41a   :  { %v519_v8 = vrot.slane %v518_v6, 2 }
 0x41c   :  { %v520_v9 = vadd.f32 %v519_v8, %v518_v6 }
 0x41e   :  { %v521_v0 = vrot.slane %v520_v9, 1 }
 0x420   :  { %v522_v11 = vadd.f32 %v521_v0, %v520_v9 }
 0x422   :  { %v536_v32 = vadd.f32 %v522_v11, %v317_v10 }
 0x424   :  { %541 = vperm.xlu1 %664, %v536_v32  }
 0x4a3   :  { %v542_v12 = vpop.permute.xlu1 %541 }
 0x4a4   :  { %v544_v15 = vsel %vm538_vm5, %v542_v12, 0.0 }
 0x4a5   :  { %v553_v17 = vadd.f32 %v552_v13, %v544_v15 }
 0x4a7   :  { %555 = vst.msk [vmem:[%s994_s8] sm:$0x1] %vm554_vm6, %v553_v17 }

// kernel: posdep_forward.9
= control target key start
LH: loop header
LB: loop body
LE: loop exit
PB: predicated region body
PF: predicated region fallthrough
CT: control target
= control target key end

     0   :  { %v2017_v3 = vmov 0   ;;  %vm2019_vm0 = vmmov 0   ;;  %vm1581_vm4 = vcmask 7168   ;;  %vm1620_vm9 = vcmask 57344   ;;  %s2600_s3 = inlined_call_operand.vmem [shape: bf16[128,1024], index: 3, kind: input, shape index: {}]   ;;  %s2601_s0 = inlined_call_operand.vmem [shape: bf16[16,128], index: 0, kind: input, shape index: {}]   ;;  %s2602_s6 = inlined_call_operand.vmem [shape: bf16[128,128], index: 6, kind: input, shape index: {}]   ;;  %s2603_s5 = inlined_call_operand.vmem [shape: bf16[128,128], index: 5, kind: input, shape index: {}]   ;;  %s2604_s4 = inlined_call_operand.vmem [shape: bf16[1024,128], index: 4, kind: input, shape index: {}]   ;;  %s2605_s1 = inlined_call_operand.vmem [shape: bf16[16,128], index: 1, kind: input, shape index: {}]   ;;  %s2606_s2 = inlined_call_operand.vmem [shape: s32[16,1], index: 2, kind: input, shape index: {}]   ;;  %s2607_s7 = inlined_call_operand.vmem [shape: f32[1,128], index: 7, kind: input, shape index: {}]   ;;  %s2608_s8 = inlined_call_operand.vmem [shape: f32[1,1,8], index: 8, kind: output, shape index: {}]  }
   0x1   :  { %v34_v0 = vld [vmem:[%s2600_s3] sm:$0xff]  ;;  %v35_v2 = vld [vmem:[%s2600_s3 + $0x8] sm:$0xff]  ;;  %456 = vmatprep.mubr.bf16.mxu0 %v2017_v3  ;;  %499 = vmatprep.mubr.bf16.mxu1 %v2017_v3  ;;  %v36_v60 = vld [vmem:[%s2600_s3 + $0x10] sm:$0xff] }
   0x2   :  { %v38_v1 = vld [vmem:[%s2600_s3 + $0x20] sm:$0xff]  ;;  %v39_v5 = vld [vmem:[%s2600_s3 + $0x28] sm:$0xff]  ;;  %1924 = vset.pattern.permute.xlu1 %v2017_v3  ;;  %1925 = vset.pattern.permute.xlu0 %v2017_v3  ;;  %v40_v63 = vld [vmem:[%s2600_s3 + $0x30] sm:$0xff] }
   0x3   :  { %v1628_v4 = vcombine.high %v34_v0, %v38_v1  ;;  %v1627_v6 = vcombine.low %v34_v0, %v38_v1  ;;  %v42_v7 = vld [vmem:[%s2600_s3 + $0x40] sm:$0xff]  ;;  %v1630_v9 = vcombine.high %v35_v2, %v39_v5  ;;  %v1629_v10 = vcombine.low %v35_v2, %v39_v5  ;;  %v43_v12 = vld [vmem:[%s2600_s3 + $0x48] sm:$0xff]  ;;  %v37_v1 = vld [vmem:[%s2600_s3 + $0x18] sm:$0xff] }
   0x4   :  { %v46_v8 = vld [vmem:[%s2600_s3 + $0x60] sm:$0xff]  ;;  %v47_v13 = vld [vmem:[%s2600_s3 + $0x68] sm:$0xff]  ;;  %v41_v2 = vld [vmem:[%s2600_s3 + $0x38] sm:$0xff] }
   0x5   :  { %v1636_v11 = vcombine.high %v42_v7, %v46_v8  ;;  %v50_v14 = vld [vmem:[%s2600_s3 + $0x80] sm:$0xff]  ;;  %424 = vmatprep.subr.bf16.mxu0 %v1628_v4  ;;  %v1638_v15 = vcombine.high %v43_v12, %v47_v13  ;;  %v51_v17 = vld [vmem:[%s2600_s3 + $0x88] sm:$0xff]  ;;  %467 = vmatprep.subr.bf16.mxu1 %v1630_v9  ;;  %v1635_v19 = vcombine.low %v42_v7, %v46_v8  ;;  %v44_v5 = vld [vmem:[%s2600_s3 + $0x50] sm:$0xff] }
   0x6   :  { %v54_v16 = vld [vmem:[%s2600_s3 + $0xa0] sm:$0xff]  ;;  %v55_v18 = vld [vmem:[%s2600_s3 + $0xa8] sm:$0xff]  ;;  %425 = vmatpush1.bf16.msra.mxu0 %v1627_v6  ;;  %468 = vmatpush1.bf16.msra.mxu1 %v1629_v10  ;;  %v1637_v20 = vcombine.low %v43_v12, %v47_v13  ;;  %v1632_v8 = vcombine.high %v36_v60, %v40_v63  ;;  %v48_v9 = vld [vmem:[%s2600_s3 + $0x70] sm:$0xff]  ;;  %v1634_v10 = vcombine.high %v37_v1, %v41_v2 }
   0x7   :  { %426 = vmatprep.subr.bf16.mxu0 %v1636_v11  ;;  %v1644_v21 = vcombine.high %v50_v14, %v54_v16  ;;  %469 = vmatprep.subr.bf16.mxu1 %v1638_v15  ;;  %v1646_v22 = vcombine.high %v51_v17, %v55_v18  ;;  %v58_v23 = vld [vmem:[%s2600_s3 + $0xc0] sm:$0xff]  ;;  %v59_v25 = vld [vmem:[%s2600_s3 + $0xc8] sm:$0xff]  ;;  %v1643_v27 = vcombine.low %v50_v14, %v54_v16  ;;  %v45_v11 = vld [vmem:[%s2600_s3 + $0x58] sm:$0xff] }
   0x8   :  { %v62_v24 = vld [vmem:[%s2600_s3 + $0xe0] sm:$0xff]  ;;  %v63_v26 = vld [vmem:[%s2600_s3 + $0xe8] sm:$0xff]  ;;  %v1645_v28 = vcombine.low %v51_v17, %v55_v18  ;;  %v49_v12 = vld [vmem:[%s2600_s3 + $0x78] sm:$0xff]  ;;  %v1631_v13 = vcombine.low %v36_v60, %v40_v63  ;;  %v1633_v15 = vcombine.low %v37_v1, %v41_v2  ;;  %v1640_v16 = vcombine.high %v44_v5, %v48_v9 }
   0x9   :  { %v1652_v29 = vcombine.high %v58_v23, %v62_v24  ;;  %v1654_v30 = vcombine.high %v59_v25, %v63_v26  ;;  %v66_v31 = vld [vmem:[%s2600_s3 + $0x100] sm:$0xff]  ;;  %v67_v33 = vld [vmem:[%s2600_s3 + $0x108] sm:$0xff]  ;;  %v1651_v35 = vcombine.low %v58_v23, %v62_v24  ;;  %v1653_v36 = vcombine.low %v59_v25, %v63_v26  ;;  %v52_v14 = vld [vmem:[%s2600_s3 + $0x90] sm:$0xff] }
   0xa   :  { %427 = vmatpush1.bf16.msra.mxu0 %v1635_v19  ;;  %470 = vmatpush1.bf16.msra.mxu1 %v1637_v20  ;;  %v70_v32 = vld [vmem:[%s2600_s3 + $0x120] sm:$0xff]  ;;  %v71_v34 = vld [vmem:[%s2600_s3 + $0x128] sm:$0xff]  ;;  %v56_v17 = vld [vmem:[%s2600_s3 + $0xb0] sm:$0xff]  ;;  %v1642_v18 = vcombine.high %v45_v11, %v49_v12 }
   0xb   :  { %428 = vmatprep.subr.bf16.mxu0 %v1644_v21  ;;  %471 = vmatprep.subr.bf16.mxu1 %v1646_v22  ;;  %v1660_v37 = vcombine.high %v66_v31, %v70_v32  ;;  %v1662_v38 = vcombine.high %v67_v33, %v71_v34  ;;  %v74_v39 = vld [vmem:[%s2600_s3 + $0x140] sm:$0xff]  ;;  %v75_v41 = vld [vmem:[%s2600_s3 + $0x148] sm:$0xff]  ;;  %v1659_v43 = vcombine.low %v66_v31, %v70_v32  ;;  %v53_v19 = vld [vmem:[%s2600_s3 + $0x98] sm:$0xff] }
   0xc   :  { %v78_v40 = vld [vmem:[%s2600_s3 + $0x160] sm:$0xff]  ;;  %v79_v42 = vld [vmem:[%s2600_s3 + $0x168] sm:$0xff]  ;;  %v1661_v44 = vcombine.low %v67_v33, %v71_v34  ;;  %v57_v20 = vld [vmem:[%s2600_s3 + $0xb8] sm:$0xff]  ;;  %v1639_v21 = vcombine.low %v44_v5, %v48_v9  ;;  %v1641_v22 = vcombine.low %v45_v11, %v49_v12  ;;  %v1648_v23 = vcombine.high %v52_v14, %v56_v17 }
   0xd   :  { %v1668_v45 = vcombine.high %v74_v39, %v78_v40  ;;  %v1670_v46 = vcombine.high %v75_v41, %v79_v42  ;;  %v82_v47 = vld [vmem:[%s2600_s3 + $0x180] sm:$0xff]  ;;  %v83_v49 = vld [vmem:[%s2600_s3 + $0x188] sm:$0xff]  ;;  %v1667_v51 = vcombine.low %v74_v39, %v78_v40  ;;  %v1669_v52 = vcombine.low %v75_v41, %v79_v42  ;;  %v60_v24 = vld [vmem:[%s2600_s3 + $0xd0] sm:$0xff] }
   0xe   :  { %429 = vmatpush1.bf16.msra.mxu0 %v1643_v27  ;;  %472 = vmatpush1.bf16.msra.mxu1 %v1645_v28  ;;  %v86_v48 = vld [vmem:[%s2600_s3 + $0x1a0] sm:$0xff]  ;;  %v87_v50 = vld [vmem:[%s2600_s3 + $0x1a8] sm:$0xff]  ;;  %v1650_v25 = vcombine.high %v53_v19, %v57_v20  ;;  %v64_v26 = vld [vmem:[%s2600_s3 + $0xf0] sm:$0xff]  ;;  %v1649_v31 = vcombine.low %v53_v19, %v57_v20  ;;  %v2018_v5 = vmov 0.0  }
   0xf   :  { %430 = vmatprep.subr.bf16.mxu0 %v1652_v29  ;;  %473 = vmatprep.subr.bf16.mxu1 %v1654_v30  ;;  %v1676_v53 = vcombine.high %v82_v47, %v86_v48  ;;  %v90_v54 = vld [vmem:[%s2600_s3 + $0x1c0] sm:$0xff]  ;;  %v1678_v56 = vcombine.high %v83_v49, %v87_v50  ;;  %v91_v57 = vld [vmem:[%s2600_s3 + $0x1c8] sm:$0xff]  ;;  %v1675_v59 = vcombine.low %v82_v47, %v86_v48  ;;  %v61_v27 = vld [vmem:[%s2600_s3 + $0xd8] sm:$0xff] }
  0x10   :  { %v94_v55 = vld [vmem:[%s2600_s3 + $0x1e0] sm:$0xff]  ;;  %v95_v58 = vld [vmem:[%s2600_s3 + $0x1e8] sm:$0xff]  ;;  %v1677_v61 = vcombine.low %v83_v49, %v87_v50  ;;  %v65_v28 = vld [vmem:[%s2600_s3 + $0xf8] sm:$0xff]  ;;  %v1647_v29 = vcombine.low %v52_v14, %v56_v17  ;;  %v1656_v32 = vcombine.high %v60_v24, %v64_v26 }
  0x11   :  { %v1684_v62 = vcombine.high %v90_v54, %v94_v55  ;;  %v1686_v0 = vcombine.high %v91_v57, %v95_v58  ;;  %v1683_v4 = vcombine.low %v90_v54, %v94_v55  ;;  %v1685_v6 = vcombine.low %v91_v57, %v95_v58  ;;  %v2183_v7 = vld [vmem:[%s2601_s0] sm:$0xff]   ;;  %v68_v30 = vld [vmem:[%s2600_s3 + $0x110] sm:$0xff]  ;;  %v77_v42 = vld [vmem:[%s2600_s3 + $0x158] sm:$0xff] }
  0x12   :  { %431 = vmatpush1.bf16.msra.mxu0 %v1651_v35  ;;  %474 = vmatpush1.bf16.msra.mxu1 %v1653_v36  ;;  %v72_v33 = vld [vmem:[%s2600_s3 + $0x130] sm:$0xff]  ;;  %v1658_v34 = vcombine.high %v61_v27, %v65_v28  ;;  %v73_v35 = vld [vmem:[%s2600_s3 + $0x138] sm:$0xff]  ;;  %v1655_v36 = vcombine.low %v60_v24, %v64_v26  ;;  %v1927_v2 = vld [vmem:[%s2602_s6] sm:$0xff]  }
  0x13   :  { %432 = vmatprep.subr.bf16.mxu0 %v1660_v37  ;;  %475 = vmatprep.subr.bf16.mxu1 %v1662_v38  ;;  %v76_v37 = vld [vmem:[%s2600_s3 + $0x150] sm:$0xff]  ;;  %v1657_v38 = vcombine.low %v61_v27, %v65_v28  ;;  %v1664_v39 = vcombine.high %v68_v30, %v72_v33  ;;  %v85_v50 = vld [vmem:[%s2600_s3 + $0x198] sm:$0xff]  ;;  %v1936_v14 = vld [vmem:[%s2603_s5 + $0x20] sm:$0xff]  }
  0x14   :  { %v80_v40 = vld [vmem:[%s2600_s3 + $0x170] sm:$0xff]  ;;  %v93_v58 = vld [vmem:[%s2600_s3 + $0x1d8] sm:$0xff]  ;;  %v2336_v20 = vld [vmem:[%s2605_s1] sm:$0xff]  }
  0x15   :  { %v1672_v47 = vcombine.high %v76_v37, %v80_v40  ;;  %v88_v48 = vld [vmem:[%s2600_s3 + $0x1b0] sm:$0xff]  ;;  %v1933_v11 = vld [vmem:[%s2602_s6 + $0x18] sm:$0xff]   ;;  %v1946_v24 = vld [vmem:[%s2604_s4] sm:$0xff]  }
  0x16   :  { %433 = vmatpush1.bf16.msra.mxu0 %v1659_v43  ;;  %476 = vmatpush1.bf16.msra.mxu1 %v1661_v44  ;;  %v81_v43 = vld [vmem:[%s2600_s3 + $0x178] sm:$0xff]  ;;  %v1663_v44 = vcombine.low %v68_v30, %v72_v33  ;;  %v1931_v9 = vld [vmem:[%s2602_s6 + $0x10] sm:$0xff]   ;;  %v1948_v26 = vld [vmem:[%s2604_s4 + $0x48] sm:$0xff]  }
  0x17   :  { %434 = vmatprep.subr.bf16.mxu0 %v1668_v45  ;;  %477 = vmatprep.subr.bf16.mxu1 %v1670_v46  ;;  %v84_v45 = vld [vmem:[%s2600_s3 + $0x190] sm:$0xff]  ;;  %v1674_v49 = vcombine.high %v77_v42, %v81_v43  ;;  %v1673_v54 = vcombine.low %v77_v42, %v81_v43  ;;  %v1934_v12 = vld [vmem:[%s2603_s5 + $0x18] sm:$0xff]   ;;  %v1949_v27 = vld [vmem:[%s2604_s4 + $0xc8] sm:$0xff]  }
  0x18   :  { %v1680_v55 = vcombine.high %v84_v45, %v88_v48  ;;  %v1679_v60 = vcombine.low %v84_v45, %v88_v48  ;;  %v1939_v17 = vld [vmem:[%s2602_s6 + $0x30] sm:$0xff]   ;;  %v1941_v19 = vld [vmem:[%s2602_s6 + $0x38] sm:$0xff]   ;;  %v1950_v28 = vld [vmem:[%s2604_s4 + $0x8] sm:$0xff]  }
  0x19   :  { %v1952_v30 = vld [vmem:[%s2604_s4 + $0x50] sm:$0xff]   ;;  %v1956_v33 = vld [vmem:[%s2604_s4 + $0x58] sm:$0xff]   ;;  %v1966_v42 = vld [vmem:[%s2604_s4 + $0x28] sm:$0xff]  }
  0x1a   :  { %435 = vmatpush1.bf16.msra.mxu0 %v1667_v51  ;;  %478 = vmatpush1.bf16.msra.mxu1 %v1669_v52  ;;  %v89_v51 = vld [vmem:[%s2600_s3 + $0x1b8] sm:$0xff]  ;;  %v1671_v52 = vcombine.low %v76_v37, %v80_v40  ;;  %v1961_v37 = vld [vmem:[%s2604_s4 + $0xe0] sm:$0xff]   ;;  %v1964_v40 = vld [vmem:[%s2604_s4 + $0x68] sm:$0xff]  }
  0x1b   :  { %436 = vmatprep.subr.bf16.mxu0 %v1676_v53  ;;  %479 = vmatprep.subr.bf16.mxu1 %v1678_v56  ;;  %v92_v53 = vld [vmem:[%s2600_s3 + $0x1d0] sm:$0xff]  ;;  %v1682_v57 = vcombine.high %v85_v50, %v89_v51  ;;  %v1967_v43 = vld [vmem:[%s2604_s4 + $0xa8] sm:$0xff]   ;;  %v1972_v48 = vld [vmem:[%s2604_s4 + $0x78] sm:$0xff]  }
  0x1c   :  { %v96_v56 = vld [vmem:[%s2600_s3 + $0x1f0] sm:$0xff] }
  0x1d   :  { %v1969_v45 = vld [vmem:[%s2604_s4 + $0xf0] sm:$0xff]  }
  0x1e   :  { %437 = vmatpush1.bf16.msra.mxu0 %v1675_v59  ;;  %480 = vmatpush1.bf16.msra.mxu1 %v1677_v61  ;;  %v97_v59 = vld [vmem:[%s2600_s3 + $0x1f8] sm:$0xff]  ;;  %v1681_v61 = vcombine.low %v85_v50, %v89_v51 }
  0x1f   :  { %438 = vmatprep.subr.bf16.mxu0 %v1684_v62  ;;  %481 = vmatprep.subr.bf16.mxu1 %v1686_v0  ;;  %v1688_v62 = vcombine.high %v92_v53, %v96_v56  ;;  %v1690_v63 = vcombine.high %v93_v58, %v97_v59  ;;  %v1687_v0 = vcombine.low %v92_v53, %v96_v56  ;;  %v1974_v50 = vld [vmem:[%s2604_s4 + $0x38] sm:$0xff]   ;;  %v1977_v53 = vld [vmem:[%s2604_s4 + $0x1c0] sm:$0xff]   ;;  %v2460_v56 = vunpack.c.l.bf16 %v2336_v20 }
  0x20   :  { %v1689_v1 = vcombine.low %v93_v58, %v97_v59  ;;  %v1975_v51 = vld [vmem:[%s2604_s4 + $0xb8] sm:$0xff]  }
  0x22   :  { %439 = vmatpush1.bf16.msra.mxu0 %v1683_v4  ;;  %482 = vmatpush1.bf16.msra.mxu1 %v1685_v6  ;;  %v1928_v4 = vld [vmem:[%s2603_s5] sm:$0xff]   ;;  %v1929_v6 = vld [vmem:[%s2602_s6 + $0x8] sm:$0xff]  }
  0x23   :  { %510 = vmatprep.subr.bf16.mxu0 %v1632_v8  ;;  %553 = vmatprep.subr.bf16.mxu1 %v1634_v10  ;;  %v1930_v8 = vld [vmem:[%s2603_s5 + $0x8] sm:$0xff]   ;;  %v1932_v10 = vld [vmem:[%s2603_s5 + $0x10] sm:$0xff]  }
  0x25   :  { %457 = vmatmul.mubr.bf16.vlgmr.msra.gmra.mrb[0].mxu0 %v2183_v7  ;;  %500 = vmatmul.mubr.bf16.vlgmr.msra.gmra.mrb[0].mxu1 %v2183_v7 }
  0x26   :  { %511 = vmatpush1.bf16.msra.mxu0 %v1631_v13  ;;  %554 = vmatpush1.bf16.msra.mxu1 %v1633_v15  ;;  %v1935_v13 = vld [vmem:[%s2602_s6 + $0x20] sm:$0xff]   ;;  %v1937_v15 = vld [vmem:[%s2602_s6 + $0x28] sm:$0xff]  }
  0x27   :  { %512 = vmatprep.subr.bf16.mxu0 %v1640_v16  ;;  %555 = vmatprep.subr.bf16.mxu1 %v1642_v18  ;;  %v1938_v16 = vld [vmem:[%s2603_s5 + $0x28] sm:$0xff]   ;;  %v1940_v18 = vld [vmem:[%s2603_s5 + $0x30] sm:$0xff]  }
  0x28   :  { %542 = vmatprep.mubr.bf16.mxu0 %v2017_v3  ;;  %585 = vmatprep.mubr.bf16.mxu1 %v2017_v3  ;;  %v69_v3 = vld [vmem:[%s2600_s3 + $0x118] sm:$0xff] }
  0x29   :  { %v1666_v41 = vcombine.high %v69_v3, %v73_v35  ;;  %v1665_v46 = vcombine.low %v69_v3, %v73_v35  ;;  %v1958_v3 = vld [vmem:[%s2604_s4 + $0x18] sm:$0xff]  }
  0x2a   :  { %513 = vmatpush1.bf16.msra.mxu0 %v1639_v21  ;;  %556 = vmatpush1.bf16.msra.mxu1 %v1641_v22  ;;  %v1942_v21 = vld [vmem:[%s2603_s5 + $0x38] sm:$0xff]   ;;  %v1944_v22 = vld [vmem:[%s2604_s4 + $0x40] sm:$0xff]  }
  0x2b   :  { %514 = vmatprep.subr.bf16.mxu0 %v1648_v23  ;;  %557 = vmatprep.subr.bf16.mxu1 %v1650_v25  ;;  %v1945_v23 = vld [vmem:[%s2604_s4 + $0xc0] sm:$0xff]   ;;  %v1959_v35 = vld [vmem:[%s2604_s4 + $0x98] sm:$0xff]  }
  0x2c   :  { %v1947_v25 = vld [vmem:[%s2604_s4 + $0x80] sm:$0xff]  }
  0x2e   :  { %515 = vmatpush1.bf16.msra.mxu0 %v1647_v29  ;;  %558 = vmatpush1.bf16.msra.mxu1 %v1649_v31  ;;  %v1951_v29 = vld [vmem:[%s2604_s4 + $0x88] sm:$0xff]   ;;  %v1954_v31 = vld [vmem:[%s2604_s4 + $0x10] sm:$0xff]  }
  0x2f   :  { %516 = vmatprep.subr.bf16.mxu0 %v1656_v32  ;;  %559 = vmatprep.subr.bf16.mxu1 %v1658_v34  ;;  %v1955_v32 = vld [vmem:[%s2604_s4 + $0x90] sm:$0xff]   ;;  %v1957_v34 = vld [vmem:[%s2604_s4 + $0xd8] sm:$0xff]  }
  0x32   :  { %517 = vmatpush1.bf16.msra.mxu0 %v1655_v36  ;;  %560 = vmatpush1.bf16.msra.mxu1 %v1657_v38  ;;  %v1960_v36 = vld [vmem:[%s2604_s4 + $0x60] sm:$0xff]  }
  0x33   :  { %518 = vmatprep.subr.bf16.mxu0 %v1664_v39  ;;  %561 = vmatprep.subr.bf16.mxu1 %v1666_v41  ;;  %v1962_v38 = vld [vmem:[%s2604_s4 + $0x20] sm:$0xff]   ;;  %v1965_v41 = vld [vmem:[%s2604_s4 + $0xe8] sm:$0xff]  }
  0x34   :  { %v1963_v39 = vld [vmem:[%s2604_s4 + $0xa0] sm:$0xff]  }
  0x36   :  { %519 = vmatpush1.bf16.msra.mxu0 %v1663_v44  ;;  %562 = vmatpush1.bf16.msra.mxu1 %v1665_v46  ;;  %v1968_v44 = vld [vmem:[%s2604_s4 + $0x70] sm:$0xff]  }
  0x37   :  { %520 = vmatprep.subr.bf16.mxu0 %v1672_v47  ;;  %563 = vmatprep.subr.bf16.mxu1 %v1674_v49  ;;  %v1970_v46 = vld [vmem:[%s2604_s4 + $0x30] sm:$0xff]   ;;  %v1973_v49 = vld [vmem:[%s2604_s4 + $0xf8] sm:$0xff]  }
  0x38   :  { %v1971_v47 = vld [vmem:[%s2604_s4 + $0xb0] sm:$0xff]  }
  0x3a   :  { %521 = vmatpush1.bf16.msra.mxu0 %v1671_v52  ;;  %564 = vmatpush1.bf16.msra.mxu1 %v1673_v54  ;;  %v1976_v52 = vld [vmem:[%s2604_s4 + $0x140] sm:$0xff]  }
  0x3b   :  { %522 = vmatprep.subr.bf16.mxu0 %v1680_v55  ;;  %565 = vmatprep.subr.bf16.mxu1 %v1682_v57  ;;  %v2450_v54 = vld [vmem:[%s2606_s2] sm:$0xff]  ;;  %v2456_v55 = vld [vmem:[%s2606_s2 + $0x8] sm:$0xff]  ;;  %v2463_v57 = vunpack.c.h.bf16 %v2336_v20 }
  0x3c   :  { %1564 = vperm.xlu1 %1924, %v2450_v54   ;;  %vm1539_vm2 = vcmp.ne.s32.totalorder %v2450_v54, 4294967196  ;;  %vm1540_vm3 = vcmp.ne.s32.totalorder %v2456_v55, 4294967196 }
  0x3e   :  { %523 = vmatpush1.bf16.msra.mxu0 %v1679_v60  ;;  %566 = vmatpush1.bf16.msra.mxu1 %v1681_v61 }
  0x3f   :  { %524 = vmatprep.subr.bf16.mxu0 %v1688_v62  ;;  %567 = vmatprep.subr.bf16.mxu1 %v1690_v63 }
  0x40   :  { %1567 = vperm.xlu1 %1924, %v2456_v55  }
  0x42   :  { %525 = vmatpush1.bf16.msra.mxu0 %v1687_v0  ;;  %568 = vmatpush1.bf16.msra.mxu1 %v1689_v1 }
  0x43   :  { %1881 = vmatprep.subr.bf16.mxu0 %v2018_v5  ;;  %1901 = vmatprep.subr.bf16.mxu1 %v2018_v5 }
  0x45   :  { %543 = vmatmul.mubr.bf16.vlgmr.msra.gmra.mrb[4].mxu0 %v2183_v7  ;;  %586 = vmatmul.mubr.bf16.vlgmr.msra.gmra.mrb[4].mxu1 %v2183_v7 }
  0x46   :  { %1882 = vmatpush3.bf16.msra.mxu0 %v1927_v2  ;;  %1902 = vmatpush3.bf16.msra.mxu1 %v1928_v4 }
  0x47   :  { %1883 = vmatprep.subr.bf16.mxu0 %v2018_v5  ;;  %1903 = vmatprep.subr.bf16.mxu1 %v2018_v5 }
  0x48   :  { %1897 = vmatprep.mubr.msk.bf16.mxu0 %vm2019_vm0, %v2018_v5  ;;  %1917 = vmatprep.mubr.msk.bf16.mxu1 %vm2019_vm0, %v2018_v5 }
  0x4a   :  { %1884 = vmatpush3.bf16.msra.mxu0 %v1929_v6  ;;  %1904 = vmatpush3.bf16.msra.mxu1 %v1930_v8 }
  0x4b   :  { %1885 = vmatprep.subr.bf16.mxu0 %v2018_v5  ;;  %1905 = vmatprep.subr.bf16.mxu1 %v2018_v5 }
  0x4e   :  { %1886 = vmatpush3.bf16.msra.mxu0 %v1931_v9  ;;  %1906 = vmatpush3.bf16.msra.mxu1 %v1932_v10 }
  0x4f   :  { %1887 = vmatprep.subr.bf16.mxu0 %v2018_v5  ;;  %1907 = vmatprep.subr.bf16.mxu1 %v2018_v5 }
  0x52   :  { %1888 = vmatpush3.bf16.msra.mxu0 %v1933_v11  ;;  %1908 = vmatpush3.bf16.msra.mxu1 %v1934_v12 }
  0x53   :  { %1889 = vmatprep.subr.bf16.mxu0 %v2018_v5  ;;  %1909 = vmatprep.subr.bf16.mxu1 %v2018_v5 }
  0x56   :  { %1890 = vmatpush3.bf16.msra.mxu0 %v1935_v13  ;;  %1910 = vmatpush3.bf16.msra.mxu1 %v1936_v14 }
  0x57   :  { %1891 = vmatprep.subr.bf16.mxu0 %v2018_v5  ;;  %1911 = vmatprep.subr.bf16.mxu1 %v2018_v5 }
  0x5a   :  { %1892 = vmatpush3.bf16.msra.mxu0 %v1937_v15  ;;  %1912 = vmatpush3.bf16.msra.mxu1 %v1938_v16  ;;  %v1978_v16 = vld [vmem:[%s2604_s4 + $0x100] sm:$0xff]  }
  0x5b   :  { %1893 = vmatprep.subr.bf16.mxu0 %v2018_v5  ;;  %1913 = vmatprep.subr.bf16.mxu1 %v2018_v5 }
  0x5e   :  { %1894 = vmatpush3.bf16.msra.mxu0 %v1939_v17  ;;  %1914 = vmatpush3.bf16.msra.mxu1 %v1940_v18  ;;  %v1979_v18 = vld [vmem:[%s2604_s4 + $0x180] sm:$0xff]  }
  0x5f   :  { %1895 = vmatprep.subr.bf16.mxu0 %v2018_v5  ;;  %1915 = vmatprep.subr.bf16.mxu1 %v2018_v5 }
  0x62   :  { %1896 = vmatpush3.bf16.msra.mxu0 %v1941_v19  ;;  %1916 = vmatpush3.bf16.msra.mxu1 %v1942_v21  ;;  %v1980_v19 = vld [vmem:[%s2604_s4 + $0x148] sm:$0xff]  }
  0x63   :  { %1793 = vmatprep.subr.bf16.mxu0 %v1944_v22  ;;  %1815 = vmatprep.subr.bf16.mxu1 %v1945_v23  ;;  %v1982_v21 = vld [vmem:[%s2604_s4 + $0x108] sm:$0xff]   ;;  %v1984_v23 = vld [vmem:[%s2604_s4 + $0x150] sm:$0xff]  }
  0x64   :  { %v1983_v22 = vld [vmem:[%s2604_s4 + $0x188] sm:$0xff]  }
  0x65   :  { %1898 = vmatmul.mubr.bf16.vlgmr.msra.gmra.mrb[8].mxu0 %v2336_v20  ;;  %1918 = vmatmul.mubr.bf16.vlgmr.msra.gmra.mrb[8].mxu1 %v2183_v7  ;;  %v1953_v7 = vld [vmem:[%s2604_s4 + $0xd0] sm:$0xff]   ;;  %v1981_v20 = vld [vmem:[%s2604_s4 + $0x1c8] sm:$0xff]  }
  0x66   :  { %1794 = vmatpush3.bf16.msra.mxu0 %v1946_v24  ;;  %1816 = vmatpush3.bf16.msra.mxu1 %v1947_v25  ;;  %v1985_v24 = vld [vmem:[%s2604_s4 + $0x1d0] sm:$0xff]  }
  0x67   :  { %1795 = vmatprep.subr.bf16.mxu0 %v1948_v26  ;;  %1817 = vmatprep.subr.bf16.mxu1 %v1949_v27  ;;  %v1986_v25 = vld [vmem:[%s2604_s4 + $0x110] sm:$0xff]   ;;  %v1988_v27 = vld [vmem:[%s2604_s4 + $0x158] sm:$0xff]  }
  0x68   :  { %v1987_v26 = vld [vmem:[%s2604_s4 + $0x190] sm:$0xff]  }
  0x6a   :  { %1796 = vmatpush3.bf16.msra.mxu0 %v1950_v28  ;;  %1818 = vmatpush3.bf16.msra.mxu1 %v1951_v29  ;;  %v1989_v28 = vld [vmem:[%s2604_s4 + $0x1d8] sm:$0xff]  }
  0x6b   :  { %1797 = vmatprep.subr.bf16.mxu0 %v1952_v30  ;;  %1819 = vmatprep.subr.bf16.mxu1 %v1953_v7  ;;  %v1990_v29 = vld [vmem:[%s2604_s4 + $0x118] sm:$0xff]   ;;  %v1992_v7 = vld [vmem:[%s2604_s4 + $0x160] sm:$0xff]  }
  0x6c   :  { %v1991_v30 = vld [vmem:[%s2604_s4 + $0x198] sm:$0xff]  }
  0x6e   :  { %1798 = vmatpush3.bf16.msra.mxu0 %v1954_v31  ;;  %1820 = vmatpush3.bf16.msra.mxu1 %v1955_v32  ;;  %v1993_v31 = vld [vmem:[%s2604_s4 + $0x1e0] sm:$0xff]  }
  0x6f   :  { %1799 = vmatprep.subr.bf16.mxu0 %v1956_v33  ;;  %1821 = vmatprep.subr.bf16.mxu1 %v1957_v34  ;;  %v1994_v32 = vld [vmem:[%s2604_s4 + $0x120] sm:$0xff]   ;;  %v1996_v34 = vld [vmem:[%s2604_s4 + $0x168] sm:$0xff]  }
  0x70   :  { %v1995_v33 = vld [vmem:[%s2604_s4 + $0x1a0] sm:$0xff]  }
  0x72   :  { %1800 = vmatpush3.bf16.msra.mxu0 %v1958_v3  ;;  %1822 = vmatpush3.bf16.msra.mxu1 %v1959_v35  ;;  %v1997_v3 = vld [vmem:[%s2604_s4 + $0x1e8] sm:$0xff]  }
  0x73   :  { %1801 = vmatprep.subr.bf16.mxu0 %v1960_v36  ;;  %1823 = vmatprep.subr.bf16.mxu1 %v1961_v37  ;;  %v1998_v35 = vld [vmem:[%s2604_s4 + $0x128] sm:$0xff]   ;;  %v2000_v37 = vld [vmem:[%s2604_s4 + $0x170] sm:$0xff]  }
  0x74   :  { %v1999_v36 = vld [vmem:[%s2604_s4 + $0x1a8] sm:$0xff]  }
  0x76   :  { %1802 = vmatpush3.bf16.msra.mxu0 %v1962_v38  ;;  %1824 = vmatpush3.bf16.msra.mxu1 %v1963_v39  ;;  %v2001_v38 = vld [vmem:[%s2604_s4 + $0x1f0] sm:$0xff]  }
  0x77   :  { %1803 = vmatprep.subr.bf16.mxu0 %v1964_v40  ;;  %1825 = vmatprep.subr.bf16.mxu1 %v1965_v41  ;;  %v2002_v39 = vld [vmem:[%s2604_s4 + $0x130] sm:$0xff]   ;;  %v2004_v41 = vld [vmem:[%s2604_s4 + $0x178] sm:$0xff]  }
  0x78   :  { %v2003_v40 = vld [vmem:[%s2604_s4 + $0x1b0] sm:$0xff]  }
  0x7a   :  { %1804 = vmatpush3.bf16.msra.mxu0 %v1966_v42  ;;  %1826 = vmatpush3.bf16.msra.mxu1 %v1967_v43  ;;  %v2005_v43 = vld [vmem:[%s2604_s4 + $0x1f8] sm:$0xff]  }
  0x7b   :  { %1805 = vmatprep.subr.bf16.mxu0 %v1968_v44  ;;  %1827 = vmatprep.subr.bf16.mxu1 %v1969_v45 }
  0x7e   :  { %1806 = vmatpush3.bf16.msra.mxu0 %v1970_v46  ;;  %1828 = vmatpush3.bf16.msra.mxu1 %v1971_v47 }
  0x7f   :  { %1807 = vmatprep.subr.bf16.mxu0 %v1972_v48  ;;  %1829 = vmatprep.subr.bf16.mxu1 %v1973_v49 }
  0x82   :  { %1808 = vmatpush3.bf16.msra.mxu0 %v1974_v50  ;;  %1830 = vmatpush3.bf16.msra.mxu1 %v1975_v51  ;;  %v2006_v51 = vld [vmem:[%s2604_s4 + $0x138] sm:$0xff]  }
  0x83   :  { %1837 = vmatprep.subr.bf16.mxu0 %v1976_v52  ;;  %1859 = vmatprep.subr.bf16.mxu1 %v1977_v53 }
  0xf8   :  { %v458_v58 = vpop.f32.mrb[0].mxu0  ;;  %v501_v60 = vpop.f32.mrb[0].mxu1 }
  0xf9   :  { %v598_v59 = vmul.f32 %v2460_v56, %v458_v58  ;;  %v460_v61 = vpop.f32.mrb[1].mxu0  ;;  %v600_v62 = vmul.f32 %v2460_v56, %v501_v60  ;;  %v503_v0 = vpop.f32.mrb[1].mxu1  ;;  %v2007_v60 = vld [vmem:[%s2604_s4 + $0x1b8] sm:$0xff]  }
  0xfa   :  { %v599_v63 = vmul.f32 %v2460_v56, %v460_v61  ;;  %v462_v1 = vpop.f32.mrb[2].mxu0  ;;  %v601_v2 = vmul.f32 %v2460_v56, %v503_v0  ;;  %v505_v6 = vpop.f32.mrb[2].mxu1 }
  0xfb   :  { %v606_v4 = vmul.f32 %v2463_v57, %v462_v1  ;;  %v464_v8 = vpop.f32.mrb[3].mxu0  ;;  %v608_v9 = vmul.f32 %v2463_v57, %v505_v6  ;;  %v507_v11 = vpop.f32.mrb[3].mxu1 }
  0xfc   :  { %v607_v10 = vmul.f32 %v2463_v57, %v464_v8  ;;  %v609_v13 = vmul.f32 %v2463_v57, %v507_v11 }
  0xfd   :  { %v614_v12 = vpack.c.bf16 %v606_v4, %v598_v59  ;;  %v616_v14 = vpack.c.bf16 %v608_v9, %v600_v62 }
  0xfe   :  { %v615_v15 = vpack.c.bf16 %v607_v10, %v599_v63  ;;  %v617_v17 = vpack.c.bf16 %v609_v13, %v601_v2 }
 0x100   :  { %1391 = vmatprep.mubr.bf16.mxu0 %v615_v15  ;;  %1432 = vmatprep.mubr.bf16.mxu1 %v617_v17 }
 0x101   :  { %1392 = vmatmul.mubr.bf16.vlgmr.msra.gmra.mrb[12].mxu0 %v614_v12  ;;  %1433 = vmatmul.mubr.bf16.vlgmr.msra.gmra.mrb[12].mxu1 %v616_v14 }
 0x102   :  { %1838 = vmatpush3.bf16.msra.mxu0 %v1978_v16  ;;  %1860 = vmatpush3.bf16.msra.mxu1 %v1979_v18 }
 0x103   :  { %1839 = vmatprep.subr.bf16.mxu0 %v1980_v19  ;;  %1861 = vmatprep.subr.bf16.mxu1 %v1981_v20 }
 0x106   :  { %1840 = vmatpush3.bf16.msra.mxu0 %v1982_v21  ;;  %1862 = vmatpush3.bf16.msra.mxu1 %v1983_v22 }
 0x107   :  { %1841 = vmatprep.subr.bf16.mxu0 %v1984_v23  ;;  %1863 = vmatprep.subr.bf16.mxu1 %v1985_v24 }
 0x10a   :  { %1842 = vmatpush3.bf16.msra.mxu0 %v1986_v25  ;;  %1864 = vmatpush3.bf16.msra.mxu1 %v1987_v26 }
 0x10b   :  { %1843 = vmatprep.subr.bf16.mxu0 %v1988_v27  ;;  %1865 = vmatprep.subr.bf16.mxu1 %v1989_v28 }
 0x10e   :  { %1844 = vmatpush3.bf16.msra.mxu0 %v1990_v29  ;;  %1866 = vmatpush3.bf16.msra.mxu1 %v1991_v30 }
 0x10f   :  { %1845 = vmatprep.subr.bf16.mxu0 %v1992_v7  ;;  %1867 = vmatprep.subr.bf16.mxu1 %v1993_v31 }
 0x112   :  { %1846 = vmatpush3.bf16.msra.mxu0 %v1994_v32  ;;  %1868 = vmatpush3.bf16.msra.mxu1 %v1995_v33 }
 0x113   :  { %1847 = vmatprep.subr.bf16.mxu0 %v1996_v34  ;;  %1869 = vmatprep.subr.bf16.mxu1 %v1997_v3  ;;  %v1534_v34 = vlaneseq }
 0x116   :  { %1848 = vmatpush3.bf16.msra.mxu0 %v1998_v35  ;;  %1870 = vmatpush3.bf16.msra.mxu1 %v1999_v36 }
 0x117   :  { %1849 = vmatprep.subr.bf16.mxu0 %v2000_v37  ;;  %1871 = vmatprep.subr.bf16.mxu1 %v2001_v38  ;;  %v2574_v37 = vand.u32 127, %v1534_v34 }
 0x118   :  { %v544_v42 = vpop.f32.mrb[4].mxu0  ;;  %v587_v45 = vpop.f32.mrb[4].mxu1 }
 0x119   :  { %v602_v44 = vmul.f32 %v2460_v56, %v544_v42  ;;  %v546_v46 = vpop.f32.mrb[5].mxu0  ;;  %v604_v47 = vmul.f32 %v2460_v56, %v587_v45  ;;  %v589_v49 = vpop.f32.mrb[5].mxu1  ;;  %vm1536_vm1 = vcmp.lt.s32.totalorder %v2574_v37, 8  ;;  %vm1612_vm7 = vcmp.eq.s32.totalorder %v2574_v37, 1 }
 0x11a   :  { %v603_v48 = vmul.f32 %v2460_v56, %v546_v46  ;;  %v548_v50 = vpop.f32.mrb[6].mxu0  ;;  %1850 = vmatpush3.bf16.msra.mxu0 %v2002_v39  ;;  %v605_v52 = vmul.f32 %v2460_v56, %v589_v49  ;;  %v591_v58 = vpop.f32.mrb[6].mxu1  ;;  %1872 = vmatpush3.bf16.msra.mxu1 %v2003_v40  ;;  %vm1604_vm8 = vcmp.eq.s32.totalorder %v2574_v37, 0 }
 0x11b   :  { %v610_v53 = vmul.f32 %v2463_v57, %v548_v50  ;;  %v550_v59 = vpop.f32.mrb[7].mxu0  ;;  %1851 = vmatprep.subr.bf16.mxu0 %v2004_v41  ;;  %v612_v61 = vmul.f32 %v2463_v57, %v591_v58  ;;  %v593_v63 = vpop.f32.mrb[7].mxu1  ;;  %1873 = vmatprep.subr.bf16.mxu1 %v2005_v43 }
 0x11c   :  { %v611_v62 = vmul.f32 %v2463_v57, %v550_v59  ;;  %v613_v1 = vmul.f32 %v2463_v57, %v593_v63  ;;  %v1708_v57 = vld [vmem:[%s2607_s7] ss:$0 sm:$0xff]  ;;  %v1773_v59 = vsel %vm1539_vm2, 1.0, %v2018_v5 }
 0x11d   :  { %v618_v0 = vpack.c.bf16 %v610_v53, %v602_v44  ;;  %v620_v56 = vpack.c.bf16 %v612_v61, %v604_v47 }
 0x11e   :  { %v619_v2 = vpack.c.bf16 %v611_v62, %v603_v48  ;;  %1852 = vmatpush3.bf16.msra.mxu0 %v2006_v51  ;;  %v621_v4 = vpack.c.bf16 %v613_v1, %v605_v52  ;;  %1874 = vmatpush3.bf16.msra.mxu1 %v2007_v60  ;;  %v1774_v60 = vsel %vm1540_vm3, 1.0, %v2018_v5 }
 0x11f   :  { %v1596_v1 = vsel %vm1581_vm4, %v1774_v60, 0.0 }
 0x120   :  { %1473 = vmatprep.mubr.bf16.mxu0 %v619_v2  ;;  %1514 = vmatprep.mubr.bf16.mxu1 %v621_v4  ;;  %v1565_v4 = vpop.permute.xlu1 %1564 }
 0x121   :  { %1474 = vmatmul.mubr.bf16.vlgmr.msra.gmra.mrb[16].mxu0 %v618_v0  ;;  %1515 = vmatmul.mubr.bf16.vlgmr.msra.gmra.mrb[16].mxu1 %v620_v56  ;;  %v1595_v0 = vsel %vm1581_vm4, %v1773_v59, 0.0  ;;  %vm1569_vm5 = vcmp.eq.s32.totalorder %v2574_v37, %v1565_v4 }
 0x122   :  { %v1597_v2 = vadd.f32 %v1596_v1, %v1595_v0 }
 0x138   :  { %v870_v6 = vpop.f32.mrb[8].mxu0  ;;  %v959_v9 = vpop.f32.mrb[8].mxu1 }
 0x139   :  { %v1899_v8 = vpop.f32.mrb[9].mxu0  ;;  %v960_v10 = vadd.f32 %v959_v9, %v870_v6  ;;  %v1919_v12 = vpop.f32.mrb[9].mxu1  ;;  %v1598_v6 = vrot.slane %v1597_v2, 4 }
 0x13a   :  { %v873_v11 = vpop.f32.mrb[10].mxu0  ;;  %v962_v14 = vpop.f32.mrb[10].mxu1 }
 0x13b   :  { %v1900_v13 = vpop.f32.mrb[11].mxu0  ;;  %v963_v15 = vadd.f32 %v962_v14, %v873_v11  ;;  %v1920_v16 = vpop.f32.mrb[11].mxu1  ;;  %v973_v20 = vadd.f32 %v1708_v57, %v960_v10  ;;  %v1599_v9 = vadd.f32 %v1598_v6, %v1597_v2 }
 0x13c   :  { %v1568_v10 = vpop.permute.xlu1 %1567 }
 0x13d   :  { %v974_v27 = vadd.f32 %v1708_v57, %v963_v15  ;;  %vm1570_vm6 = vcmp.eq.s32.totalorder %v2574_v37, %v1568_v10  ;;  %v1600_v12 = vrot.slane %v1599_v9, 2 }
 0x13f   :  { %v1601_v14 = vadd.f32 %v1600_v12, %v1599_v9 }
 0x141   :  { %v1602_v15 = vrot.slane %v1601_v14, 1 }
 0x143   :  { %v1603_v16 = vadd.f32 %v1602_v15, %v1601_v14 }
 0x1d4   :  { %v1809_v17 = vpop.f32.mrb[12].mxu0  ;;  %v1831_v18 = vpop.f32.mrb[12].mxu1 }
 0x1d5   :  { %v1810_v19 = vpop.f32.mrb[13].mxu0  ;;  %v1832_v22 = vpop.f32.mrb[13].mxu1 }
 0x1d6   :  { %v1811_v21 = vadd.f32 %v1810_v19, %v1809_v17  ;;  %v1812_v23 = vpop.f32.mrb[14].mxu0  ;;  %v1833_v24 = vadd.f32 %v1832_v22, %v1831_v18  ;;  %v1834_v25 = vpop.f32.mrb[14].mxu1 }
 0x1d7   :  { %v1813_v26 = vpop.f32.mrb[15].mxu0  ;;  %v1835_v30 = vpop.f32.mrb[15].mxu1 }
 0x1d8   :  { %v1394_v28 = vadd.f32 %v1811_v21, %v973_v20  ;;  %v1814_v29 = vadd.f32 %v1813_v26, %v1812_v23  ;;  %v1836_v7 = vadd.f32 %v1835_v30, %v1834_v25 }
 0x1da   :  { %v1435_v31 = vadd.f32 %v1833_v24, %v1394_v28  ;;  %v1397_v32 = vadd.f32 %v1814_v29, %v974_v27 }
 0x1dc   :  { %v1438_v33 = vadd.f32 %v1836_v7, %v1397_v32 }
 0x1f4   :  { %v1853_v3 = vpop.f32.mrb[16].mxu0  ;;  %v1875_v35 = vpop.f32.mrb[16].mxu1 }
 0x1f5   :  { %v1854_v36 = vpop.f32.mrb[17].mxu0  ;;  %v1876_v39 = vpop.f32.mrb[17].mxu1 }
 0x1f6   :  { %v1855_v38 = vadd.f32 %v1854_v36, %v1853_v3  ;;  %v1856_v40 = vpop.f32.mrb[18].mxu0  ;;  %v1877_v41 = vadd.f32 %v1876_v39, %v1875_v35  ;;  %v1878_v42 = vpop.f32.mrb[18].mxu1 }
 0x1f7   :  { %v1857_v43 = vpop.f32.mrb[19].mxu0  ;;  %v1879_v46 = vpop.f32.mrb[19].mxu1 }
 0x1f8   :  { %v1476_v44 = vadd.f32 %v1855_v38, %v1435_v31  ;;  %v1858_v45 = vadd.f32 %v1857_v43, %v1856_v40  ;;  %v1880_v47 = vadd.f32 %v1879_v46, %v1878_v42 }
 0x1fa   :  { %v1517_v48 = vadd.f32 %v1877_v41, %v1476_v44  ;;  %v1479_v49 = vadd.f32 %v1858_v45, %v1438_v33 }
 0x1fc   :  { %v1520_v50 = vadd.f32 %v1880_v47, %v1479_v49  ;;  %v1537_v51 = vsel %vm1536_vm1, %v1517_v48, -1e+09 }
 0x1fd   :  { %1543 = vmax.xlane.f32.xlu0 %v1537_v51  ;;  %v1571_v11 = vsel %vm1569_vm5, %v1537_v51, 0.0 }
 0x1fe   :  { %v1538_v52 = vsel %vm1536_vm1, %v1520_v50, -1e+09 }
 0x1ff   :  { %v1572_v13 = vsel %vm1570_vm6, %v1538_v52, 0.0 }
 0x201   :  { %1545 = vmax.xlane.f32.xlu0 %v1538_v52 }
 0x28a   :  { %v1544_v53 = vpop.xlane.xlu0 %1543 }
 0x28b   :  { %v1547_v58 = vsub.f32 %v1537_v51, %v1544_v53 }
 0x28d   :  { %v1549_v61 = vmul.f32 1.442695, %v1547_v58 }
 0x28e   :  { %v1546_v62 = vpop.xlane.xlu0 %1545 }
 0x28f   :  { %2009 = vpow2.f32 %v1549_v61  ;;  %v1548_v63 = vsub.f32 %v1538_v52, %v1546_v62 }
 0x291   :  { %v1551_v56 = vmul.f32 1.442695, %v1548_v63 }
 0x293   :  { %2011 = vpow2.f32 %v1551_v56 }
 0x299   :  { %v2010_v8 = vpop.eup %2009 }
 0x29a   :  { %1553 = vadd.xlane.f32.xlu0 %v2010_v8 }
 0x29d   :  { %v2012_v5 = vpop.eup %2011 }
 0x29e   :  { %1555 = vadd.xlane.f32.xlu1 %v2012_v5  ;;  %1573 = vadd.xlane.f32.xlu0 %v1571_v11 }
 0x2a2   :  { %1575 = vadd.xlane.f32.xlu0 %v1572_v13 }
 0x2af   :  { %1615 = vperm.xlu1 %1924, %v1603_v16  }
 0x327   :  { %v1554_v57 = vpop.xlane.xlu0 %1553 }
 0x328   :  { %2013 = vlog2.f32 %v1554_v57 }
 0x32b   :  { %v1556_v17 = vpop.xlane.xlu1 %1555  ;;  %v1574_v20 = vpop.xlane.xlu0 %1573 }
 0x32c   :  { %2015 = vlog2.f32 %v1556_v17 }
 0x32f   :  { %v1576_v26 = vpop.xlane.xlu0 %1575  ;;  %v1616_v54 = vpop.permute.xlu1 %1615 }
 0x330   :  { %v1618_v55 = vsel %vm1612_vm7, %v1616_v54, 0.0 }
 0x332   :  { %v2014_v18 = vpop.eup %2013 }
 0x333   :  { %v1558_v19 = vmul.f32 0.6931472, %v2014_v18 }
 0x335   :  { %v1561_v21 = vadd.f32 %v1558_v19, %v1544_v53 }
 0x336   :  { %v2016_v22 = vpop.eup %2015 }
 0x337   :  { %v1560_v23 = vmul.f32 0.6931472, %v2016_v22  ;;  %v1577_v24 = vsub.f32 %v1561_v21, %v1574_v20 }
 0x339   :  { %v1562_v25 = vadd.f32 %v1560_v23, %v1546_v62  ;;  %v1579_v27 = vsel %vm1539_vm2, %v1577_v24, 0.0 }
 0x33a   :  { %v1582_v30 = vsel %vm1581_vm4, %v1579_v27, 0.0 }
 0x33b   :  { %v1578_v28 = vsub.f32 %v1562_v25, %v1576_v26 }
 0x33d   :  { %v1580_v29 = vsel %vm1540_vm3, %v1578_v28, 0.0 }
 0x33e   :  { %v1583_v7 = vsel %vm1581_vm4, %v1580_v29, 0.0 }
 0x33f   :  { %v1584_v31 = vadd.f32 %v1583_v7, %v1582_v30 }
 0x341   :  { %v1585_v32 = vrot.slane %v1584_v31, 4 }
 0x343   :  { %v1586_v33 = vadd.f32 %v1585_v32, %v1584_v31 }
 0x345   :  { %v1587_v34 = vrot.slane %v1586_v33, 2 }
 0x347   :  { %v1588_v3 = vadd.f32 %v1587_v34, %v1586_v33 }
 0x349   :  { %v1589_v35 = vrot.slane %v1588_v3, 1 }
 0x34b   :  { %v1590_v36 = vadd.f32 %v1589_v35, %v1588_v3 }
 0x34d   :  { %1607 = vperm.xlu0 %1925, %v1590_v36  }
 0x3cc   :  { %v1608_v38 = vpop.permute.xlu0 %1607 }
 0x3cd   :  { %v1610_v39 = vsel %vm1604_vm8, %v1608_v38, 0.0 }
 0x3ce   :  { %v1619_v40 = vadd.f32 %v1618_v55, %v1610_v39 }
 0x3d0   :  { %1621 = vst.msk [vmem:[%s2608_s8] sm:$0x1] %vm1620_vm9, %v1619_v40 }

</bundles_post_ra>
